<compile_context>
chip_gen: v7x
topology: tpu7x:2x2x1
jax: 0.10.0
libtpu: 0.0.40
codegen_flags: <defaults>
</compile_context>

<pallas_src>
import functools

import numpy as np
import jax
import jax.numpy as jnp
from jax import lax
from jax.experimental import pallas as pl
from jax.experimental.pallas import tpu as pltpu

WIN = 11
SIGMA = 1.5
K1 = 0.01
K2 = 0.03


def _gaussian_window():
    coords = np.arange(WIN, dtype=np.float64) - WIN // 2
    g = np.exp(-(coords ** 2) / (2.0 * SIGMA ** 2))
    g = g / g.sum()
    return tuple(float(v) for v in g)


_WINDOW = _gaussian_window()  # compile-time constants


def _round_up(x, m):
    return ((x + m - 1) // m) * m


def _band_blocks(LN, SEG, RM):
    """Reusable band blocks for block-banded 'valid' separable filtering.

    gw: (SEG, LN)    horizontal pass,  seg @ gw   (SEG = LN + 128 halo lanes)
    gv: (RM, RM+16)  vertical pass,    gv @ slab  (16 = WIN-1 rounded to 8)
    """
    w = np.asarray(_WINDOW, dtype=np.float32)
    gw = np.zeros((SEG, LN), dtype=np.float32)
    for c in range(LN):
        gw[c:c + WIN, c] = w
    gv = np.zeros((RM, RM + 16), dtype=np.float32)
    for r in range(RM):
        gv[r, r:r + WIN] = w
    return gw, gv


def _pick_lane_tile(Wo):
    """Output lane tile (128 or 256); prefer 256 (fills v6e/v7x MXU width)
    unless 128 gives strictly less padded output width."""
    best = None
    for ln in (256, 128):
        nwt = -(-Wo // ln)
        wop = nwt * ln
        key = (wop, 0 if ln == 256 else 1)
        if best is None or key < best[0]:
            best = (key, ln, nwt, wop)
    return best[1], best[2], best[3]


def _pick_batch_tile(N, Hs, Wpad, SEG, LN):
    """Largest divisor of N (<=8) whose per-step working set is modest."""
    budget = 20 * 1024 * 1024
    for bt in (8, 4, 2, 1):
        if N % bt != 0:
            continue
        # x,y blocks (double-buffered) + stacked segment + horizontal output.
        per_step = 4 * bt * Hs * (4 * Wpad + 5 * (SEG + LN))
        if per_step <= budget:
            return bt
    return 1


def _vmem_limit_bytes():
    cap = 64 * 1024 * 1024
    try:
        cap = int(pltpu.get_tpu_info().vmem_capacity_bytes)
    except Exception:
        pass  # fall back to the most conservative (v7x-sized) assumption
    return max(32 * 1024 * 1024, min(cap * 3 // 4, 100 * 1024 * 1024))


def _ssim_kernel(c_ref, gw_ref, gv_ref, x_ref, y_ref, out_ref, *,
                 B, Hs, LN, SEG, RM, nwt, nht, Ho, Wo):
    """c_ref: SMEM (2,) = [C1, C2]; gw_ref: (SEG, LN); gv_ref: (RM, RM+16);
    x_ref/y_ref: VMEM (B, Hs, Wpad) zero-padded images;
    out_ref: (B, 8, 128) per-image SSIM mean (lane-dense scalar blocks)."""
    c1 = c_ref[0]
    c2 = c_ref[1]
    gw = gw_ref[...]          # (SEG, LN)
    gv = gv_ref[...]          # (RM, RM + 16)
    inv_area = 1.0 / float(Ho * Wo)

    acc = [jnp.float32(0.0)] * B   # per-image masked SSIM sums

    # Static loops: column tiles (lanes) x images x row tiles (sublanes).
    for j in range(nwt):
        c0 = j * LN
        col_lim = Wo - c0

        # ---- Horizontal Gaussian pass for this column tile: one batched
        # MXU matmul over 5 maps x B images (rows ordered (b, map, h)).
        parts = []
        for b in range(B):
            xb = x_ref[b, :, c0:c0 + SEG]      # (Hs, SEG), aligned slice
            yb = y_ref[b, :, c0:c0 + SEG]
            parts += [xb, yb, xb * xb, yb * yb, xb * yb]
        seg = jnp.concatenate(parts, axis=0)    # (B*5*Hs, SEG)
        hp = jnp.dot(seg, gw,
                     precision=lax.Precision.HIGHEST,
                     preferred_element_type=jnp.float32)   # (B*5*Hs, LN)

        for b in range(B):
            for i in range(nht):
                r0 = i * RM
                row_lim = Ho - r0

                # ---- Vertical Gaussian pass: one matmul over the 5 maps
                # (concatenated along lanes) for this (image, row tile).
                rows = [hp[(b * 5 + m) * Hs + r0:
                           (b * 5 + m) * Hs + r0 + RM + 16, :]
                        for m in range(5)]
                vslab = jnp.concatenate(rows, axis=1)       # (RM+16, 5*LN)
                vt = jnp.dot(gv, vslab,
                             precision=lax.Precision.HIGHEST,
                             preferred_element_type=jnp.float32)  # (RM, 5*LN)

                mu1 = vt[:, 0 * LN:1 * LN]
                mu2 = vt[:, 1 * LN:2 * LN]
                exx = vt[:, 2 * LN:3 * LN]
                eyy = vt[:, 3 * LN:4 * LN]
                exy = vt[:, 4 * LN:5 * LN]

                mu1mu2 = mu1 * mu2
                mu1sq = mu1 * mu1
                mu2sq = mu2 * mu2
                num = (2.0 * mu1mu2 + c1) * (2.0 * (exy - mu1mu2) + c2)
                den = (mu1sq + mu2sq + c1) * \
                      ((exx - mu1sq) + (eyy - mu2sq) + c2)

                # EUP approx reciprocal + 2 Newton steps (f32-accurate).
                r = pl.reciprocal(den, approx=True)
                r = r * (2.0 - den * r)
                r = r * (2.0 - den * r)
                ssim = num * r                              # (RM, LN)

                # Cheap validity masks; skipped on fully interior tiles.
                if row_lim < RM:
                    rmask = (lax.broadcasted_iota(jnp.int32, (RM, 1), 0)
                             < row_lim).astype(jnp.float32)
                    ssim = ssim * rmask
                if col_lim < LN:
                    cmask = (lax.broadcasted_iota(jnp.int32, (1, LN), 1)
                             < col_lim).astype(jnp.float32)
                    ssim = ssim * cmask

                acc[b] = acc[b] + jnp.sum(ssim)

    # Lane-dense (8,128) store of each per-image scalar; wrapper reads [:,0,0].
    for b in range(B):
        out_ref[b] = jnp.full((8, 128), acc[b] * inv_area, jnp.float32)


def ssim_loss(yhat, y):
    """yhat, y: (N, H, W). Returns scalar float32 loss = 1 - mean SSIM."""
    yhat = yhat.astype(jnp.float32)
    y = y.astype(jnp.float32)
    N, H, W = yhat.shape
    if H < WIN or W < WIN:
        raise ValueError(f"SSIM needs H,W >= {WIN}, got {(H, W)}")
    Ho = H - WIN + 1
    Wo = W - WIN + 1

    # Single fused min+max pass over yhat (one HBM read instead of two).
    mn, mx = lax.reduce(
        (yhat, yhat),
        (jnp.array(jnp.inf, jnp.float32), jnp.array(-jnp.inf, jnp.float32)),
        lambda a, b: (jnp.minimum(a[0], b[0]), jnp.maximum(a[1], b[1])),
        tuple(range(yhat.ndim)))
    data_range = mx - mn
    c1 = (K1 * data_range) ** 2
    c2 = (K2 * data_range) ** 2
    cvals = jnp.stack([c1, c2]).astype(jnp.float32)

    # ---- Static tiling config --------------------------------------------
    LN, nwt, WOP = _pick_lane_tile(Wo)     # lane (column) tile
    SEG = LN + 128                         # lane-aligned input window (+halo)
    Wpad = WOP + 128                       # padded input width (>= W)

    nht = -(-Ho // 256)                    # balanced row tiles, <=256 rows
    RM = _round_up(-(-Ho // nht), 8)
    HOP = nht * RM
    Hs = HOP + 16                          # padded input height (>= H)

    B_TILE = _pick_batch_tile(N, Hs, Wpad, SEG, LN)

    gw_np, gv_np = _band_blocks(LN, SEG, RM)
    gw = jnp.asarray(gw_np)                # (SEG, LN)
    gv = jnp.asarray(gv_np)                # (RM, RM + 16)

    # Zero-pad once in HBM so every in-kernel block/slice is (8,128)-aligned.
    xpad = jnp.pad(yhat, ((0, 0), (0, Hs - H), (0, Wpad - W)))
    ypad = jnp.pad(y, ((0, 0), (0, Hs - H), (0, Wpad - W)))

    kernel = functools.partial(
        _ssim_kernel, B=B_TILE, Hs=Hs, LN=LN, SEG=SEG, RM=RM,
        nwt=nwt, nht=nht, Ho=Ho, Wo=Wo)

    per_image = pl.pallas_call(
        kernel,
        out_shape=jax.ShapeDtypeStruct((N, 8, 128), jnp.float32),
        grid_spec=pltpu.PrefetchScalarGridSpec(
            num_scalar_prefetch=0,
            grid=(N // B_TILE,),
            in_specs=[
                pl.BlockSpec(memory_space=pltpu.MemorySpace.SMEM),  # [C1,C2]
                pl.BlockSpec((SEG, LN), lambda g: (0, 0)),          # gw block
                pl.BlockSpec((RM, RM + 16), lambda g: (0, 0)),      # gv block
                pl.BlockSpec((B_TILE, Hs, Wpad), lambda g: (g, 0, 0)),
                pl.BlockSpec((B_TILE, Hs, Wpad), lambda g: (g, 0, 0)),
            ],
            out_specs=pl.BlockSpec((B_TILE, 8, 128), lambda g: (g, 0, 0)),
        ),
        compiler_params=pltpu.CompilerParams(
            dimension_semantics=("parallel",),
            vmem_limit_bytes=_vmem_limit_bytes(),
        ),
    )(cvals, gw, gv, xpad, ypad)

    mean_ssim = jnp.mean(per_image[:, 0, 0])
    return (1.0 - mean_ssim).astype(jnp.float32)


def _ssim_loss_ref(yhat, y):
    """Pure-numpy reference of the same SSIM for correctness checking."""
    yhat = np.asarray(yhat, np.float64)
    y = np.asarray(y, np.float64)
    dr = yhat.max() - yhat.min()
    c1 = (K1 * dr) ** 2
    c2 = (K2 * dr) ** 2
    w = np.asarray(_WINDOW, np.float64)

    def filt(img):  # img: (H, W) valid separable gaussian
        H, W = img.shape
        Ho, Wo = H - WIN + 1, W - WIN + 1
        tmp = sum(w[k] * img[:, k:k + Wo] for k in range(WIN))
        return sum(w[k] * tmp[k:k + Ho, :] for k in range(WIN))

    vals = []
    for i in range(yhat.shape[0]):
        x1, x2 = yhat[i], y[i]
        mu1, mu2 = filt(x1), filt(x2)
        s11 = filt(x1 * x1) - mu1 * mu1
        s22 = filt(x2 * x2) - mu2 * mu2
        s12 = filt(x1 * x2) - mu1 * mu2
        m = ((2 * mu1 * mu2 + c1) * (2 * s12 + c2)) / \
            ((mu1 ** 2 + mu2 ** 2 + c1) * (s11 + s22 + c2))
        vals.append(m.mean())
    return 1.0 - float(np.mean(vals))


if __name__ == "__main__":
    key = jax.random.PRNGKey(0)
    k1, k2 = jax.random.split(key)
    # batch=2, H=W=16 (must exceed the 11-tap window)
    yhat = jax.random.uniform(k1, (2, 16, 16), dtype=jnp.float32)
    y = jax.random.uniform(k2, (2, 16, 16), dtype=jnp.float32)

    loss_fn = jax.jit(ssim_loss)
    out = jax.block_until_ready(loss_fn(yhat, y))

    ref = _ssim_loss_ref(np.asarray(yhat), np.asarray(y))
    np.testing.assert_allclose(float(out), ref, rtol=1e-4, atol=1e-5)

    print("KERNEL_OK")
</pallas_src>

<mosaic_0001>
module attributes {stable_mosaic.version = 11 : i64} {
  func.func @_ssim_kernel(%arg0: i32, %arg1: memref<2xf32, #tpu.memory_space<smem>>, %arg2: memref<256x128xf32, #tpu.memory_space<vmem>>, %arg3: memref<8x24xf32, #tpu.memory_space<vmem>>, %arg4: memref<2x24x256xf32, #tpu.memory_space<vmem>>, %arg5: memref<2x24x256xf32, #tpu.memory_space<vmem>>, %arg6: memref<2x8x128xf32, #tpu.memory_space<vmem>>) attributes {dimension_semantics = [#tpu.dimension_semantics<parallel>], iteration_bounds = array<i64: 1>, scalar_prefetch = 0 : i64, scratch_operands = 0 : i64, tpu.core_type = #tpu.core_type<tc>, window_params = [{transform_indices = @transform_0, window_bounds = array<i64: 2>}, {pipeline_mode = #tpu.pipeline_mode<synchronous>, transform_indices = @transform_1, window_bounds = array<i64: 256, 128>}, {pipeline_mode = #tpu.pipeline_mode<synchronous>, transform_indices = @transform_2, window_bounds = array<i64: 8, 24>}, {transform_indices = @transform_3, window_bounds = array<i64: 2, 24, 256>}, {transform_indices = @transform_4, window_bounds = array<i64: 2, 24, 256>}, {transform_indices = @transform_5, window_bounds = array<i64: 2, 8, 128>}]} {
    %c0 = arith.constant 0 : index
    %0 = memref.load %arg1[%c0] : memref<2xf32, #tpu.memory_space<smem>>
    %c1 = arith.constant 1 : index
    %1 = memref.load %arg1[%c1] : memref<2xf32, #tpu.memory_space<smem>>
    %c0_0 = arith.constant 0 : index
    %c0_1 = arith.constant 0 : index
    %2 = vector.load %arg2[%c0_0, %c0_1] : memref<256x128xf32, #tpu.memory_space<vmem>>, vector<256x128xf32>
    %c0_2 = arith.constant 0 : index
    %c0_3 = arith.constant 0 : index
    %3 = vector.load %arg3[%c0_2, %c0_3] : memref<8x24xf32, #tpu.memory_space<vmem>>, vector<8x24xf32>
    %c0_4 = arith.constant 0 : index
    %c0_5 = arith.constant 0 : index
    %c0_6 = arith.constant 0 : index
    %4 = vector.load %arg4[%c0_4, %c0_5, %c0_6] : memref<2x24x256xf32, #tpu.memory_space<vmem>>, vector<1x24x256xf32>
    %5 = vector.shape_cast %4 : vector<1x24x256xf32> to vector<24x256xf32>
    %c0_7 = arith.constant 0 : index
    %c0_8 = arith.constant 0 : index
    %c0_9 = arith.constant 0 : index
    %6 = vector.load %arg5[%c0_7, %c0_8, %c0_9] : memref<2x24x256xf32, #tpu.memory_space<vmem>>, vector<1x24x256xf32>
    %7 = vector.shape_cast %6 : vector<1x24x256xf32> to vector<24x256xf32>
    %8 = arith.mulf %5, %5 : vector<24x256xf32>
    %9 = arith.mulf %7, %7 : vector<24x256xf32>
    %10 = arith.mulf %5, %7 : vector<24x256xf32>
    %c1_10 = arith.constant 1 : index
    %c0_11 = arith.constant 0 : index
    %c0_12 = arith.constant 0 : index
    %11 = vector.load %arg4[%c1_10, %c0_11, %c0_12] : memref<2x24x256xf32, #tpu.memory_space<vmem>>, vector<1x24x256xf32>
    %12 = vector.shape_cast %11 : vector<1x24x256xf32> to vector<24x256xf32>
    %c1_13 = arith.constant 1 : index
    %c0_14 = arith.constant 0 : index
    %c0_15 = arith.constant 0 : index
    %13 = vector.load %arg5[%c1_13, %c0_14, %c0_15] : memref<2x24x256xf32, #tpu.memory_space<vmem>>, vector<1x24x256xf32>
    %14 = vector.shape_cast %13 : vector<1x24x256xf32> to vector<24x256xf32>
    %15 = arith.mulf %12, %12 : vector<24x256xf32>
    %16 = arith.mulf %14, %14 : vector<24x256xf32>
    %17 = arith.mulf %12, %14 : vector<24x256xf32>
    %18 = tpu.concatenate %5, %7, %8, %9, %10, %12, %14, %15, %16, %17 in 0 : vector<24x256xf32>, vector<24x256xf32>, vector<24x256xf32>, vector<24x256xf32>, vector<24x256xf32>, vector<24x256xf32>, vector<24x256xf32>, vector<24x256xf32>, vector<24x256xf32>, vector<24x256xf32> -> vector<240x256xf32>
    %cst = arith.constant dense<0.000000e+00> : vector<240x128xf32>
    %19 = tpu.matmul %18, %2, %cst {dimension_numbers = #tpu.dot_dimension_numbers<[1], [0], [0], [1], [0, 0, 1, 1], [], []>, precision = #tpu.contract_precision<fp32>} : vector<240x256xf32>, vector<256x128xf32>, vector<240x128xf32> -> vector<240x128xf32>
    %20 = vector.extract_strided_slice %19 {offsets = [0, 0], sizes = [24, 128], strides = [1, 1]} : vector<240x128xf32> to vector<24x128xf32>
    %21 = vector.extract_strided_slice %19 {offsets = [24, 0], sizes = [24, 128], strides = [1, 1]} : vector<240x128xf32> to vector<24x128xf32>
    %22 = vector.extract_strided_slice %19 {offsets = [48, 0], sizes = [24, 128], strides = [1, 1]} : vector<240x128xf32> to vector<24x128xf32>
    %23 = vector.extract_strided_slice %19 {offsets = [72, 0], sizes = [24, 128], strides = [1, 1]} : vector<240x128xf32> to vector<24x128xf32>
    %24 = vector.extract_strided_slice %19 {offsets = [96, 0], sizes = [24, 128], strides = [1, 1]} : vector<240x128xf32> to vector<24x128xf32>
    %25 = tpu.concatenate %20, %21, %22, %23, %24 in 1 : vector<24x128xf32>, vector<24x128xf32>, vector<24x128xf32>, vector<24x128xf32>, vector<24x128xf32> -> vector<24x640xf32>
    %cst_16 = arith.constant dense<0.000000e+00> : vector<8x640xf32>
    %26 = tpu.matmul %3, %25, %cst_16 {dimension_numbers = #tpu.dot_dimension_numbers<[1], [0], [0], [1], [0, 0, 1, 1], [], []>, precision = #tpu.contract_precision<fp32>} : vector<8x24xf32>, vector<24x640xf32>, vector<8x640xf32> -> vector<8x640xf32>
    %27 = vector.extract_strided_slice %26 {offsets = [0, 0], sizes = [8, 128], strides = [1, 1]} : vector<8x640xf32> to vector<8x128xf32>
    %28 = vector.extract_strided_slice %26 {offsets = [0, 128], sizes = [8, 128], strides = [1, 1]} : vector<8x640xf32> to vector<8x128xf32>
    %29 = vector.extract_strided_slice %26 {offsets = [0, 256], sizes = [8, 128], strides = [1, 1]} : vector<8x640xf32> to vector<8x128xf32>
    %30 = vector.extract_strided_slice %26 {offsets = [0, 384], sizes = [8, 128], strides = [1, 1]} : vector<8x640xf32> to vector<8x128xf32>
    %31 = vector.extract_strided_slice %26 {offsets = [0, 512], sizes = [8, 128], strides = [1, 1]} : vector<8x640xf32> to vector<8x128xf32>
    %32 = arith.mulf %27, %28 : vector<8x128xf32>
    %33 = arith.mulf %27, %27 : vector<8x128xf32>
    %34 = arith.mulf %28, %28 : vector<8x128xf32>
    %cst_17 = arith.constant 2.000000e+00 : f32
    %35 = vector.broadcast %cst_17 : f32 to vector<8x128xf32>
    %36 = arith.mulf %35, %32 : vector<8x128xf32>
    %37 = vector.broadcast %0 : f32 to vector<8x128xf32>
    %38 = arith.addf %36, %37 : vector<8x128xf32>
    %39 = arith.subf %31, %32 : vector<8x128xf32>
    %cst_18 = arith.constant 2.000000e+00 : f32
    %40 = vector.broadcast %cst_18 : f32 to vector<8x128xf32>
    %41 = arith.mulf %40, %39 : vector<8x128xf32>
    %42 = vector.broadcast %1 : f32 to vector<8x128xf32>
    %43 = arith.addf %41, %42 : vector<8x128xf32>
    %44 = arith.mulf %38, %43 : vector<8x128xf32>
    %45 = arith.addf %33, %34 : vector<8x128xf32>
    %46 = vector.broadcast %0 : f32 to vector<8x128xf32>
    %47 = arith.addf %45, %46 : vector<8x128xf32>
    %48 = arith.subf %29, %33 : vector<8x128xf32>
    %49 = arith.subf %30, %34 : vector<8x128xf32>
    %50 = arith.addf %48, %49 : vector<8x128xf32>
    %51 = vector.broadcast %1 : f32 to vector<8x128xf32>
    %52 = arith.addf %50, %51 : vector<8x128xf32>
    %53 = arith.mulf %47, %52 : vector<8x128xf32>
    %54 = tpu.reciprocal %53 {approx = true} : vector<8x128xf32> -> vector<8x128xf32>
    %55 = arith.mulf %53, %54 : vector<8x128xf32>
    %cst_19 = arith.constant 2.000000e+00 : f32
    %56 = vector.broadcast %cst_19 : f32 to vector<8x128xf32>
    %57 = arith.subf %56, %55 : vector<8x128xf32>
    %58 = arith.mulf %54, %57 : vector<8x128xf32>
    %59 = arith.mulf %53, %58 : vector<8x128xf32>
    %cst_20 = arith.constant 2.000000e+00 : f32
    %60 = vector.broadcast %cst_20 : f32 to vector<8x128xf32>
    %61 = arith.subf %60, %59 : vector<8x128xf32>
    %62 = arith.mulf %58, %61 : vector<8x128xf32>
    %63 = arith.mulf %44, %62 : vector<8x128xf32>
    %64 = tpu.iota {dimensions = array<i32: 0>} : vector<8x1xi32>
    %c6_i32 = arith.constant 6 : i32
    %65 = vector.broadcast %c6_i32 : i32 to vector<8x1xi32>
    %66 = arith.cmpi slt, %64, %65 : vector<8x1xi32>
    %67 = arith.extui %66 : vector<8x1xi1> to vector<8x1xi32>
    %68 = arith.sitofp %67 : vector<8x1xi32> to vector<8x1xf32>
    %69 = vector.broadcast %68 : vector<8x1xf32> to vector<8x128xf32>
    %70 = arith.mulf %63, %69 : vector<8x128xf32>
    %71 = tpu.iota {dimensions = array<i32: 1>} : vector<1x128xi32>
    %c6_i32_21 = arith.constant 6 : i32
    %72 = vector.broadcast %c6_i32_21 : i32 to vector<1x128xi32>
    %73 = arith.cmpi slt, %71, %72 : vector<1x128xi32>
    %74 = arith.extui %73 : vector<1x128xi1> to vector<1x128xi32>
    %75 = arith.sitofp %74 : vector<1x128xi32> to vector<1x128xf32>
    %76 = vector.broadcast %75 : vector<1x128xf32> to vector<8x128xf32>
    %77 = arith.mulf %70, %76 : vector<8x128xf32>
    %78 = vector.shape_cast %77 : vector<8x128xf32> to vector<1x8x128xf32>
    %cst_22 = arith.constant dense<0.000000e+00> : vector<1xf32>
    %79 = vector.multi_reduction <add>, %78, %cst_22 [1, 2] : vector<1x8x128xf32> to vector<1xf32>
    %80 = vector.shape_cast %79 : vector<1xf32> to vector<1x1x1xf32>
    %81 = vector.extract %80[0, 0, 0] : f32 from vector<1x1x1xf32>
    %cst_23 = arith.constant 0.000000e+00 : f32
    %82 = arith.addf %cst_23, %81 : f32
    %83 = vector.extract_strided_slice %19 {offsets = [120, 0], sizes = [24, 128], strides = [1, 1]} : vector<240x128xf32> to vector<24x128xf32>
    %84 = vector.extract_strided_slice %19 {offsets = [144, 0], sizes = [24, 128], strides = [1, 1]} : vector<240x128xf32> to vector<24x128xf32>
    %85 = vector.extract_strided_slice %19 {offsets = [168, 0], sizes = [24, 128], strides = [1, 1]} : vector<240x128xf32> to vector<24x128xf32>
    %86 = vector.extract_strided_slice %19 {offsets = [192, 0], sizes = [24, 128], strides = [1, 1]} : vector<240x128xf32> to vector<24x128xf32>
    %87 = vector.extract_strided_slice %19 {offsets = [216, 0], sizes = [24, 128], strides = [1, 1]} : vector<240x128xf32> to vector<24x128xf32>
    %88 = tpu.concatenate %83, %84, %85, %86, %87 in 1 : vector<24x128xf32>, vector<24x128xf32>, vector<24x128xf32>, vector<24x128xf32>, vector<24x128xf32> -> vector<24x640xf32>
    %cst_24 = arith.constant dense<0.000000e+00> : vector<8x640xf32>
    %89 = tpu.matmul %3, %88, %cst_24 {dimension_numbers = #tpu.dot_dimension_numbers<[1], [0], [0], [1], [0, 0, 1, 1], [], []>, precision = #tpu.contract_precision<fp32>} : vector<8x24xf32>, vector<24x640xf32>, vector<8x640xf32> -> vector<8x640xf32>
    %90 = vector.extract_strided_slice %89 {offsets = [0, 0], sizes = [8, 128], strides = [1, 1]} : vector<8x640xf32> to vector<8x128xf32>
    %91 = vector.extract_strided_slice %89 {offsets = [0, 128], sizes = [8, 128], strides = [1, 1]} : vector<8x640xf32> to vector<8x128xf32>
    %92 = vector.extract_strided_slice %89 {offsets = [0, 256], sizes = [8, 128], strides = [1, 1]} : vector<8x640xf32> to vector<8x128xf32>
    %93 = vector.extract_strided_slice %89 {offsets = [0, 384], sizes = [8, 128], strides = [1, 1]} : vector<8x640xf32> to vector<8x128xf32>
    %94 = vector.extract_strided_slice %89 {offsets = [0, 512], sizes = [8, 128], strides = [1, 1]} : vector<8x640xf32> to vector<8x128xf32>
    %95 = arith.mulf %90, %91 : vector<8x128xf32>
    %96 = arith.mulf %90, %90 : vector<8x128xf32>
    %97 = arith.mulf %91, %91 : vector<8x128xf32>
    %cst_25 = arith.constant 2.000000e+00 : f32
    %98 = vector.broadcast %cst_25 : f32 to vector<8x128xf32>
    %99 = arith.mulf %98, %95 : vector<8x128xf32>
    %100 = vector.broadcast %0 : f32 to vector<8x128xf32>
    %101 = arith.addf %99, %100 : vector<8x128xf32>
    %102 = arith.subf %94, %95 : vector<8x128xf32>
    %cst_26 = arith.constant 2.000000e+00 : f32
    %103 = vector.broadcast %cst_26 : f32 to vector<8x128xf32>
    %104 = arith.mulf %103, %102 : vector<8x128xf32>
    %105 = vector.broadcast %1 : f32 to vector<8x128xf32>
    %106 = arith.addf %104, %105 : vector<8x128xf32>
    %107 = arith.mulf %101, %106 : vector<8x128xf32>
    %108 = arith.addf %96, %97 : vector<8x128xf32>
    %109 = vector.broadcast %0 : f32 to vector<8x128xf32>
    %110 = arith.addf %108, %109 : vector<8x128xf32>
    %111 = arith.subf %92, %96 : vector<8x128xf32>
    %112 = arith.subf %93, %97 : vector<8x128xf32>
    %113 = arith.addf %111, %112 : vector<8x128xf32>
    %114 = vector.broadcast %1 : f32 to vector<8x128xf32>
    %115 = arith.addf %113, %114 : vector<8x128xf32>
    %116 = arith.mulf %110, %115 : vector<8x128xf32>
    %117 = tpu.reciprocal %116 {approx = true} : vector<8x128xf32> -> vector<8x128xf32>
    %118 = arith.mulf %116, %117 : vector<8x128xf32>
    %cst_27 = arith.constant 2.000000e+00 : f32
    %119 = vector.broadcast %cst_27 : f32 to vector<8x128xf32>
    %120 = arith.subf %119, %118 : vector<8x128xf32>
    %121 = arith.mulf %117, %120 : vector<8x128xf32>
    %122 = arith.mulf %116, %121 : vector<8x128xf32>
    %cst_28 = arith.constant 2.000000e+00 : f32
    %123 = vector.broadcast %cst_28 : f32 to vector<8x128xf32>
    %124 = arith.subf %123, %122 : vector<8x128xf32>
    %125 = arith.mulf %121, %124 : vector<8x128xf32>
    %126 = arith.mulf %107, %125 : vector<8x128xf32>
    %127 = tpu.iota {dimensions = array<i32: 0>} : vector<8x1xi32>
    %c6_i32_29 = arith.constant 6 : i32
    %128 = vector.broadcast %c6_i32_29 : i32 to vector<8x1xi32>
    %129 = arith.cmpi slt, %127, %128 : vector<8x1xi32>
    %130 = arith.extui %129 : vector<8x1xi1> to vector<8x1xi32>
    %131 = arith.sitofp %130 : vector<8x1xi32> to vector<8x1xf32>
    %132 = vector.broadcast %131 : vector<8x1xf32> to vector<8x128xf32>
    %133 = arith.mulf %126, %132 : vector<8x128xf32>
    %134 = tpu.iota {dimensions = array<i32: 1>} : vector<1x128xi32>
    %c6_i32_30 = arith.constant 6 : i32
    %135 = vector.broadcast %c6_i32_30 : i32 to vector<1x128xi32>
    %136 = arith.cmpi slt, %134, %135 : vector<1x128xi32>
    %137 = arith.extui %136 : vector<1x128xi1> to vector<1x128xi32>
    %138 = arith.sitofp %137 : vector<1x128xi32> to vector<1x128xf32>
    %139 = vector.broadcast %138 : vector<1x128xf32> to vector<8x128xf32>
    %140 = arith.mulf %133, %139 : vector<8x128xf32>
    %141 = vector.shape_cast %140 : vector<8x128xf32> to vector<1x8x128xf32>
    %cst_31 = arith.constant dense<0.000000e+00> : vector<1xf32>
    %142 = vector.multi_reduction <add>, %141, %cst_31 [1, 2] : vector<1x8x128xf32> to vector<1xf32>
    %143 = vector.shape_cast %142 : vector<1xf32> to vector<1x1x1xf32>
    %144 = vector.extract %143[0, 0, 0] : f32 from vector<1x1x1xf32>
    %cst_32 = arith.constant 0.000000e+00 : f32
    %145 = arith.addf %cst_32, %144 : f32
    %cst_33 = arith.constant 0.027777778 : f32
    %146 = arith.mulf %82, %cst_33 : f32
    %147 = vector.broadcast %146 : f32 to vector<8x128xf32>
    %c0_34 = arith.constant 0 : index
    %c0_35 = arith.constant 0 : index
    %c0_36 = arith.constant 0 : index
    %148 = vector.load %arg6[%c0_34, %c0_35, %c0_36] : memref<2x8x128xf32, #tpu.memory_space<vmem>>, vector<1x8x128xf32>
    %149 = vector.shape_cast %148 : vector<1x8x128xf32> to vector<8x128xf32>
    %150 = vector.shape_cast %147 : vector<8x128xf32> to vector<1x8x128xf32>
    tpu.vector_store %arg6[%c0_34, %c0_35, %c0_36], %150 {strides = array<i32>} : memref<2x8x128xf32, #tpu.memory_space<vmem>>, vector<1x8x128xf32>,
    %cst_37 = arith.constant 0.027777778 : f32
    %151 = arith.mulf %145, %cst_37 : f32
    %152 = vector.broadcast %151 : f32 to vector<8x128xf32>
    %c1_38 = arith.constant 1 : index
    %c0_39 = arith.constant 0 : index
    %c0_40 = arith.constant 0 : index
    %153 = vector.load %arg6[%c1_38, %c0_39, %c0_40] : memref<2x8x128xf32, #tpu.memory_space<vmem>>, vector<1x8x128xf32>
    %154 = vector.shape_cast %153 : vector<1x8x128xf32> to vector<8x128xf32>
    %155 = vector.shape_cast %152 : vector<8x128xf32> to vector<1x8x128xf32>
    tpu.vector_store %arg6[%c1_38, %c0_39, %c0_40], %155 {strides = array<i32>} : memref<2x8x128xf32, #tpu.memory_space<vmem>>, vector<1x8x128xf32>,
    return
  }
  func.func @transform_0(%arg0: i32) -> i32 {
    %c0_i32 = arith.constant 0 : i32
    %c0_i32_0 = arith.constant 0 : i32
    return %c0_i32 : i32
  }
  func.func @transform_1(%arg0: i32) -> (i32, i32) {
    %c0_i32 = arith.constant 0 : i32
    %c0_i32_0 = arith.constant 0 : i32
    %c0_i32_1 = arith.constant 0 : i32
    return %c0_i32, %c0_i32_0 : i32, i32
  }
  func.func @transform_2(%arg0: i32) -> (i32, i32) {
    %c0_i32 = arith.constant 0 : i32
    %c0_i32_0 = arith.constant 0 : i32
    %c0_i32_1 = arith.constant 0 : i32
    return %c0_i32, %c0_i32_0 : i32, i32
  }
  func.func @transform_3(%arg0: i32) -> (i32, i32, i32) {
    %c0_i32 = arith.constant 0 : i32
    %c0_i32_0 = arith.constant 0 : i32
    %c0_i32_1 = arith.constant 0 : i32
    return %arg0, %c0_i32, %c0_i32_0 : i32, i32, i32
  }
  func.func @transform_4(%arg0: i32) -> (i32, i32, i32) {
    %c0_i32 = arith.constant 0 : i32
    %c0_i32_0 = arith.constant 0 : i32
    %c0_i32_1 = arith.constant 0 : i32
    return %arg0, %c0_i32, %c0_i32_0 : i32, i32, i32
  }
  func.func @transform_5(%arg0: i32) -> (i32, i32, i32) {
    %c0_i32 = arith.constant 0 : i32
    %c0_i32_0 = arith.constant 0 : i32
    %c0_i32_1 = arith.constant 0 : i32
    return %arg0, %c0_i32, %c0_i32_0 : i32, i32, i32
  }
}

</mosaic_0001>

<bundles_post_ra>
// kernel: ssim_loss.1
= control target key start
LH: loop header
LB: loop body
LE: loop exit
PB: predicated region body
PF: predicated region fallthrough
CT: control target
= control target key end

     0   :  { %10 = vsyncpa [#allocation4], 0  ;;  %s9311_s0 = inlined_call_operand.vmem [shape: f32[2], index: 0, kind: input, shape index: {}]   ;;  %s9312_s1 = inlined_call_operand.hbm [shape: f32[256,128], index: 1, kind: input, shape index: {}]   ;;  %s9313_s2 = inlined_call_operand.vmem [shape: f32[8,24], index: 2, kind: input, shape index: {}]   ;;  %s9314_s3 = inlined_call_operand.vmem [shape: f32[2,24,256], index: 3, kind: input, shape index: {}]   ;;  %s9315_s4 = inlined_call_operand.vmem [shape: f32[2,24,256], index: 4, kind: input, shape index: {}]   ;;  %s9316_s5 = inlined_call_operand.vmem [shape: f32[2,8,128], index: 5, kind: output, shape index: {}]  }
   0x1   :  { %s18_s20 = sshll.u32 %s9311_s0, 4  ;;  %s19_s20 = int_to_ptr.vmem [resolvable:$true] %s18_s20 }
   0x2   :  { %11 = vsyncpa [#allocation3], 0  ;;  %s6712_s21 = scalar_lea.vmem %s19_s20, 16  ;;  %p6717_p1 = scmp.lt.s32.totalorder %s19_s20, %s19_s20 }
   0x3   :  { %p6713_p0 = scmp.ne.s32.totalorder %s19_s20, %s6712_s21  ;;  %p6718_p2 = scmp.lt.s32.totalorder %s6712_s21, %s6712_s21 }
   0x5   :  { %p6719_p3 = por %p6718_p2, %p6717_p1 }
   0x7   :  { %p6720_p4 = pnand %p6719_p3, %p6713_p0 }
   0x9   :  { %6723 = shalt.err (!%p6720_p4)
}
   0xa   :  { %s6750_s22 = smov [#allocation2]   ;;  %s6751_s23 = smov [#allocation5]  }
   0xb   :  { %21 = dma.vmem_to_smem %s19_s20, 16, %s6750_s22, [#allocation4]  }
   0xc   :  { %s27_s24 = sshll.u32 %s6751_s23, 4  ;;  %s6724_s27 = scalar_lea.hbm %s9312_s1, 4096  ;;  %s28_s24 = int_to_ptr.vmem [resolvable:$true] %s27_s24 }
   0xd   :  { %p6725_p5 = scmp.ne.s32.totalorder %s9312_s1, %s6724_s27  ;;  %p6728_p6 = scmp.lt.u32.totalorder %s6724_s27, %s9312_s1 }
   0xf   :  { %p6730_p7 = pnand %p6728_p6, %p6725_p5 }
  0x11   :  { %6733 = shalt.err (!%p6730_p7)
}
  0x12   :  { %s6734_s6 = scalar_lea.vmem %s28_s24, 4096  ;;  %p6739_p9 = scmp.lt.s32.totalorder %s28_s24, %s28_s24 }
  0x13   :  { %p6735_p8 = scmp.ne.s32.totalorder %s28_s24, %s6734_s6  ;;  %p6740_p10 = scmp.lt.s32.totalorder %s6734_s6, %s6734_s6 }
  0x15   :  { %p6741_p11 = por %p6740_p10, %p6739_p9 }
  0x17   :  { %p6742_p12 = pnand %p6741_p11, %p6735_p8 }
  0x19   :  { %6745 = shalt.err (!%p6742_p12)
}
  0x1a   :  { %s6752_s7 = smov 128   ;;  %s6753_s8 = smov 8  }
  0x1b   :  { %33 = dma.hbm_to_vmem [thread:$0]  %s9312_s1, 4096, %s28_s24, [#allocation3], %s6752_s7, %s6752_s7, %s6753_s8  }
  0x1c   :  { %6746 = dma.done.wait [#allocation4], 16  }
  0x1d   :  { %6747 = vsyncadd [#allocation4], 4294967280 }
  0x1e   :  { %6748 = dma.done.wait [#allocation3], 4096  }
  0x1f   :  { %6749 = vsyncadd [#allocation3], 4294963200 }
  0x20   :  { %46 = sfence }
  0x21   :  { %v6802_v0 = vld [vmem:[#allocation5] sm:$0xff]  ;;  %v6804_v1 = vld [vmem:[#allocation5 + $0x8] sm:$0xff]  ;;  %v6806_v2 = vld [vmem:[#allocation5 + $0x10] sm:$0xff]  ;;  %v9361_v3 = vmov 0.0|0.0   ;;  %vm2630_vm0 = vcmask 195584   ;;  %vm6756_vm1 = vmmov 0  }
  0x22   :  { %6011 = vmatprep.subr.bf16.mxu0 %v9361_v3  ;;  %v145_v4 = vand.u32 4294901760, %v6802_v0  ;;  %v148_v5 = vand.u32 4294901760, %v6804_v1  ;;  %v6811_v6 = vld [vmem:[#allocation5 + $0x18] sm:$0xff]  ;;  %v151_v7 = vand.u32 4294901760, %v6806_v2  ;;  %v6814_v8 = vld [vmem:[#allocation5 + $0x20] sm:$0xff]  ;;  %v6816_v9 = vld [vmem:[#allocation5 + $0x28] sm:$0xff]  ;;  %5915 = vmatprep.subr.bf16.mxu1 %v9361_v3 }
  0x23   :  { %v154_v10 = vand.u32 4294901760, %v6811_v6  ;;  %v157_v11 = vand.u32 4294901760, %v6814_v8  ;;  %v160_v15 = vand.u32 4294901760, %v6816_v9  ;;  %v6833_v16 = vld [vmem:[#allocation5 + $0x30] sm:$0xff]  ;;  %v6838_v18 = vld [vmem:[#allocation5 + $0x38] sm:$0xff]  ;;  %v6862_v25 = vld [vmem:[#allocation5 + $0x40] sm:$0xff] }
  0x24   :  { %v6822_v12 = vsub.f32 %v6802_v0, %v145_v4  ;;  %v6825_v13 = vsub.f32 %v6804_v1, %v148_v5  ;;  %v6830_v14 = vsub.f32 %v6806_v2, %v151_v7  ;;  %v163_v20 = vand.u32 4294901760, %v6833_v16  ;;  %v6864_v26 = vld [vmem:[#allocation5 + $0x48] sm:$0xff]  ;;  %v6883_v32 = vld [vmem:[#allocation5 + $0x50] sm:$0xff]  ;;  %v6886_v33 = vld [vmem:[#allocation5 + $0x58] sm:$0xff]  ;;  %s5743_s30 = sld [smem:[#allocation2 + $0x1]] }
  0x25   :  { %v6836_v17 = vsub.f32 %v6811_v6, %v154_v10  ;;  %v6853_v22 = vsub.f32 %v6814_v8, %v157_v11  ;;  %v6858_v23 = vsub.f32 %v6816_v9, %v160_v15  ;;  %v166_v24 = vand.u32 4294901760, %v6838_v18  ;;  %v6905_v39 = vld [vmem:[#allocation5 + $0x60] sm:$0xff]  ;;  %v6908_v40 = vld [vmem:[#allocation5 + $0x68] sm:$0xff]  ;;  %v6932_v47 = vld [vmem:[#allocation5 + $0x70] sm:$0xff] }
  0x26   :  { %v6842_v19 = vpack.c.bf16 %v6825_v13, %v6822_v12  ;;  %v6869_v27 = vsub.f32 %v6833_v16, %v163_v20  ;;  %v169_v30 = vand.u32 4294901760, %v6862_v25  ;;  %v172_v31 = vand.u32 4294901760, %v6864_v26  ;;  %v6913_v41 = vld [vmem:[%s9314_s3 + $0x8] sm:$0xff]  ;;  %v6935_v48 = vld [vmem:[#allocation5 + $0x78] sm:$0xff]  ;;  %v6964_v57 = vld [vmem:[#allocation5 + $0x80] sm:$0xff] }
  0x27   :  { %v6848_v21 = vpack.c.bf16 %v6836_v17, %v6830_v14  ;;  %v6874_v28 = vpack.c.bf16 %v6858_v23, %v6853_v22  ;;  %v6879_v29 = vsub.f32 %v6838_v18, %v166_v24  ;;  %v175_v34 = vand.u32 4294901760, %v6883_v32  ;;  %v6966_v58 = vld [vmem:[#allocation5 + $0x88] sm:$0xff]  ;;  %v6992_v1 = vld [vmem:[#allocation5 + $0x90] sm:$0xff]  ;;  %v6995_v2 = vld [vmem:[#allocation5 + $0x98] sm:$0xff] }
  0x28   :  { %9583 = vst [vmem:[#allocation8_spill] sm:$0xff] %v6842_v19  ;;  %6013 = vmatpush1.bf16.msra.mxu0 %v6842_v19  ;;  %v6897_v36 = vsub.f32 %v6862_v25, %v169_v30  ;;  %v6902_v37 = vsub.f32 %v6864_v26, %v172_v31  ;;  %v178_v38 = vand.u32 4294901760, %v6886_v33  ;;  %v9326_v42 = vand.u32 4294901760, %v6905_v39 }
  0x29   :  { %9584 = vst [vmem:[#allocation9_spill] sm:$0xff] %v6848_v21  ;;  %6014 = vmatprep.subr.bf16.mxu0 %v9361_v3  ;;  %9585 = vst [vmem:[#allocation10_spill] sm:$0xff] %v6874_v28  ;;  %v6892_v35 = vpack.c.bf16 %v6879_v29, %v6869_v27  ;;  %v6924_v44 = vsub.f32 %v6883_v32, %v175_v34  ;;  %v9324_v46 = vand.u32 4294901760, %v6908_v40  ;;  %v6938_v49 = vand.u32 4294901760, %v6913_v41 }
  0x2a   :  { %v6919_v43 = vpack.c.bf16 %v6902_v37, %v6897_v36  ;;  %v6929_v45 = vsub.f32 %v6886_v33, %v178_v38  ;;  %v6943_v50 = vsub.f32 %v6905_v39, %v9326_v42  ;;  %v9320_v51 = vand.u32 4294901760, %v6932_v47 }
  0x2b   :  { %9586 = vst [vmem:[#allocation11_spill] sm:$0xff] %v6892_v35  ;;  %9589 = vst [vmem:[#allocation14_spill] sm:$0xff] %v6938_v49  ;;  %v6948_v52 = vsub.f32 %v6913_v41, %v6938_v49  ;;  %v6958_v54 = vsub.f32 %v6908_v40, %v9324_v46  ;;  %v9319_v55 = vand.u32 4294901760, %v6935_v48  ;;  %v6961_v56 = vpack.c.bf16 %v148_v5, %v145_v4 }
  0x2c   :  { %6016 = vmatpush1.bf16.msra.mxu0 %v6848_v21  ;;  %9587 = vst [vmem:[#allocation12_spill] sm:$0xff] %v6919_v43  ;;  %9588 = vst [vmem:[#allocation13_spill] sm:$0xff] %v6929_v45  ;;  %v6953_v53 = vpack.c.bf16 %v6929_v45, %v6924_v44  ;;  %v6971_v59 = vpack.c.bf16 %v154_v10, %v151_v7  ;;  %v6977_v60 = vsub.f32 %v6932_v47, %v9320_v51  ;;  %v7022_v10 = vld [vmem:[#allocation5 + $0xa0] sm:$0xff] }
  0x2d   :  { %6017 = vmatprep.subr.bf16.mxu0 %v9361_v3  ;;  %9590 = vst [vmem:[#allocation15_spill] sm:$0xff] %v6943_v50  ;;  %9591 = vst [vmem:[#allocation16_spill] sm:$0xff] %v6948_v52  ;;  %1256 = vmatprep.mubr.f32.mxu0 %v6948_v52  ;;  %v6983_v61 = vpack.c.bf16 %v6958_v54, %v6943_v50  ;;  %v6988_v62 = vsub.f32 %v6935_v48, %v9319_v55  ;;  %v9317_v63 = vand.u32 4294901760, %v6964_v57  ;;  %v7055_v55 = vld [vmem:[#allocation5 + $0xb8] sm:$0xff] }
  0x2e   :  { %9592 = vst [vmem:[#allocation17_spill] sm:$0xff] %v6953_v53  ;;  %9593 = vst [vmem:[#allocation18_spill] sm:$0xff] %v6958_v54  ;;  %5917 = vmatpush1.bf16.msra.mxu1 %v6961_v56  ;;  %v9318_v0 = vand.u32 4294901760, %v6966_v58  ;;  %v7001_v4 = vpack.c.bf16 %v160_v15, %v157_v11  ;;  %v9322_v5 = vand.u32 4294901760, %v6992_v1  ;;  %v9321_v9 = vand.u32 4294901760, %v6995_v2  ;;  %v7025_v11 = vld [vmem:[#allocation5 + $0xa8] sm:$0xff] }
  0x2f   :  { %9594 = vst [vmem:[#allocation19_spill] sm:$0xff] %v6961_v56  ;;  %9595 = vst [vmem:[#allocation20_spill] sm:$0xff] %v6971_v59  ;;  %5918 = vmatprep.subr.bf16.mxu1 %v9361_v3  ;;  %v7009_v6 = vpack.c.bf16 %v6988_v62, %v6977_v60  ;;  %v7014_v7 = vsub.f32 %v6964_v57, %v9317_v63  ;;  %v7031_v15 = vpack.c.bf16 %v166_v24, %v163_v20  ;;  %v7053_v24 = vld [vmem:[#allocation5 + $0xb0] sm:$0xff] }
  0x30   :  { %6019 = vmatpush1.bf16.msra.mxu0 %v6874_v28  ;;  %9596 = vst [vmem:[#allocation21_spill] sm:$0xff] %v6977_v60  ;;  %9597 = vst [vmem:[#allocation22_spill] sm:$0xff] %v6983_v61  ;;  %v7019_v8 = vsub.f32 %v6966_v58, %v9318_v0  ;;  %v9323_v63 = vand.u32 4294901760, %v7022_v10  ;;  %v7044_v16 = vsub.f32 %v6992_v1, %v9322_v5  ;;  %v9325_v20 = vand.u32 4294901760, %v7025_v11 }
  0x31   :  { %6020 = vmatprep.subr.bf16.mxu0 %v9361_v3  ;;  %9598 = vst [vmem:[#allocation23_spill] sm:$0xff] %v6988_v62  ;;  %9599 = vst [vmem:[#allocation24_spill] sm:$0xff] %v7001_v4  ;;  %v7049_v18 = vsub.f32 %v6995_v2, %v9321_v9  ;;  %v7061_v51 = vpack.c.bf16 %v172_v31, %v169_v30  ;;  %v9330_v26 = vand.u32 4294901760, %v7053_v24  ;;  %v9331_v30 = vand.u32 4294901760, %v7055_v55  ;;  %v7082_v31 = vld [vmem:[#allocation5 + $0xc0] sm:$0xff] }
  0x32   :  { %5920 = vmatpush1.bf16.msra.mxu1 %v6971_v59  ;;  %9600 = vst [vmem:[#allocation25_spill] sm:$0xff] %v7009_v6  ;;  %9601 = vst [vmem:[#allocation26_spill] sm:$0xff] %v7014_v7  ;;  %v7039_v0 = vpack.c.bf16 %v7019_v8, %v7014_v7  ;;  %v7067_v9 = vsub.f32 %v7022_v10, %v9323_v63  ;;  %v7078_v25 = vsub.f32 %v7025_v11, %v9325_v20  ;;  %v7085_v63 = vld [vmem:[#allocation5 + $0xc8] sm:$0xff]  ;;  %v7115_v20 = vld [vmem:[#allocation5 + $0xd8] sm:$0xff] }
  0x33   :  { %5921 = vmatprep.subr.bf16.mxu1 %v9361_v3  ;;  %9602 = vst [vmem:[#allocation27_spill] sm:$0xff] %v7019_v8  ;;  %9603 = vst [vmem:[#allocation28_spill] sm:$0xff] %v7031_v15  ;;  %v7073_v5 = vpack.c.bf16 %v7049_v18, %v7044_v16  ;;  %v7091_v46 = vpack.c.bf16 %v178_v38, %v175_v34  ;;  %v7104_v32 = vsub.f32 %v7053_v24, %v9330_v26  ;;  %v7112_v38 = vld [vmem:[#allocation5 + $0xd0] sm:$0xff]  ;;  %v7142_v26 = vld [vmem:[#allocation5 + $0xe0] sm:$0xff] }
  0x34   :  { %6022 = vmatpush1.bf16.msra.mxu0 %v6892_v35  ;;  %9604 = vst [vmem:[#allocation29_spill] sm:$0xff] %v7039_v0  ;;  %9605 = vst [vmem:[#allocation30_spill] sm:$0xff] %v7044_v16  ;;  %v7099_v42 = vpack.c.bf16 %v7078_v25, %v7067_v9  ;;  %v7109_v33 = vsub.f32 %v7055_v55, %v9331_v30  ;;  %v9619_v34 = vand.u32 4294901760, %v7082_v31  ;;  %v9631_v35 = vand.u32 4294901760, %v6964_v57 }
  0x35   :  { %6023 = vmatprep.subr.bf16.mxu0 %v9361_v3  ;;  %9606 = vst [vmem:[#allocation31_spill] sm:$0xff] %v7049_v18  ;;  %9607 = vst [vmem:[#allocation32_spill] sm:$0xff] %v7061_v51  ;;  %v9346_v21 = vand.u32 4294901760, %v6948_v52  ;;  %v9639_v19 = vand.u32 4294901760, %v6992_v1  ;;  %v9667_v62 = vand.u32 4294901760, %v7082_v31  ;;  %v9668_v60 = vand.u32 4294901760, %v7085_v63 }
  0x36   :  { %5923 = vmatpush1.bf16.msra.mxu1 %v7001_v4  ;;  %9608 = vst [vmem:[#allocation33_spill] sm:$0xff] %v7067_v9  ;;  %9609 = vst [vmem:[#allocation34_spill] sm:$0xff] %v7073_v5  ;;  %v7129_v30 = vpack.c.bf16 %v7109_v33, %v7104_v32  ;;  %v9677_v54 = vand.u32 4294901760, %v7112_v38 }
  0x37   :  { %5924 = vmatprep.subr.bf16.mxu1 %v9361_v3  ;;  %9610 = vst [vmem:[#allocation35_spill] sm:$0xff] %v7078_v25  ;;  %9611 = vst [vmem:[#allocation36_spill] sm:$0xff] %v7091_v46 }
  0x38   :  { %6025 = vmatpush1.bf16.msra.mxu0 %v6919_v43  ;;  %9612 = vst [vmem:[#allocation37_spill] sm:$0xff] %v7099_v42  ;;  %9613 = vst [vmem:[#allocation38_spill] sm:$0xff] %v7104_v32 }
  0x39   :  { %6026 = vmatprep.subr.bf16.mxu0 %v9361_v3  ;;  %9614 = vst [vmem:[#allocation39_spill] sm:$0xff] %v7109_v33  ;;  %9618 = vst [vmem:[#allocation41_spill] sm:$0xff] %v7129_v30 }
  0x3a   :  { %5926 = vmatpush1.bf16.msra.mxu1 %v7031_v15 }
  0x3b   :  { %5927 = vmatprep.subr.bf16.mxu1 %v9361_v3 }
  0x3c   :  { %6028 = vmatpush1.bf16.msra.mxu0 %v6953_v53  ;;  %v9624_v53 = vand.u32 4294901760, %v6935_v48  ;;  %v9629_v48 = vand.u32 4294901760, %v7115_v20 }
  0x3d   :  { %6029 = vmatprep.subr.bf16.mxu0 %v9361_v3 }
  0x3e   :  { %5929 = vmatpush1.bf16.msra.mxu1 %v7061_v51 }
  0x3f   :  { %5930 = vmatprep.subr.bf16.mxu1 %v9361_v3 }
  0x40   :  { %6031 = vmatpush1.bf16.msra.mxu0 %v6983_v61  ;;  %v9623_v61 = vand.u32 4294901760, %v6932_v47 }
  0x41   :  { %6032 = vmatprep.subr.bf16.mxu0 %v9361_v3 }
  0x42   :  { %5932 = vmatpush1.bf16.msra.mxu1 %v7091_v46  ;;  %v7151_v43 = vpack.c.bf16 %v9624_v53, %v9623_v61  ;;  %v7169_v53 = vsub.f32 %v7115_v20, %v9629_v48  ;;  %v9634_v48 = vand.u32 4294901760, %v7142_v26 }
  0x43   :  { %5933 = vmatprep.subr.bf16.mxu1 %v9361_v3 }
  0x44   :  { %6034 = vmatpush1.bf16.msra.mxu0 %v7009_v6  ;;  %9625 = vst [vmem:[#allocation44_spill] sm:$0xff] %v7151_v43  ;;  %9630 = vst [vmem:[#allocation47_spill] sm:$0xff] %v7169_v53  ;;  %v7188_v61 = vsub.f32 %v7142_v26, %v9634_v48  ;;  %v243_v48 = vsub.f32 %v6948_v52, %v9346_v21 }
  0x45   :  { %6035 = vmatprep.subr.bf16.mxu0 %v9361_v3 }
  0x46   :  { %9635 = vst [vmem:[#allocation49_spill] sm:$0xff] %v7188_v61 }
  0x48   :  { %6037 = vmatpush1.bf16.msra.mxu0 %v7039_v0  ;;  %v9616_v0 = vand.u32 4294901760, %v6908_v40  ;;  %v9621_v40 = vand.u32 4294901760, %v7085_v63 }
  0x49   :  { %6038 = vmatprep.subr.bf16.mxu0 %v9361_v3 }
  0x4c   :  { %6040 = vmatpush1.bf16.msra.mxu0 %v7073_v5  ;;  %v9615_v5 = vand.u32 4294901760, %v6905_v39  ;;  %v7134_v39 = vsub.f32 %v7082_v31, %v9619_v34  ;;  %v7172_v34 = vld [vmem:[#allocation5 + $0xf0] sm:$0xff]  ;;  %v9671_v31 = vand.u32 4294901760, %v6822_v12 }
  0x4d   :  { %6041 = vmatprep.subr.bf16.mxu0 %v9361_v3  ;;  %v9643_v1 = vand.u32 4294901760, %v7172_v34 }
  0x4e   :  { %v7121_v6 = vpack.c.bf16 %v9616_v0, %v9615_v5  ;;  %9620 = vst [vmem:[#allocation42_spill] sm:$0xff] %v7134_v39  ;;  %v7139_v0 = vsub.f32 %v7085_v63, %v9621_v40  ;;  %v9627_v5 = vand.u32 4294901760, %v7112_v38  ;;  %v9672_v63 = vand.u32 4294901760, %v6825_v13 }
  0x50   :  { %9617 = vst [vmem:[#allocation40_spill] sm:$0xff] %v7121_v6  ;;  %6043 = vmatpush1.bf16.msra.mxu0 %v7099_v42  ;;  %9622 = vst [vmem:[#allocation43_spill] sm:$0xff] %v7139_v0  ;;  %v7145_v42 = vld [vmem:[#allocation5 + $0xe8] sm:$0xff]  ;;  %5935 = vmatpush1.bf16.msra.mxu1 %v7121_v6  ;;  %v7159_v40 = vpack.c.bf16 %v7139_v0, %v7134_v39  ;;  %v7164_v47 = vsub.f32 %v7112_v38, %v9627_v5  ;;  %v9632_v5 = vand.u32 4294901760, %v6966_v58 }
  0x51   :  { %6044 = vmatprep.subr.bf16.mxu0 %v9361_v3  ;;  %5936 = vmatprep.subr.bf16.mxu1 %v9361_v3  ;;  %v9657_v0 = vand.u32 4294901760, %v7055_v55  ;;  %v9660_v55 = vmov 0.0|0.0  }
  0x52   :  { %9626 = vst [vmem:[#allocation45_spill] sm:$0xff] %v7159_v40  ;;  %9628 = vst [vmem:[#allocation46_spill] sm:$0xff] %v7164_v47  ;;  %v7182_v28 = vpack.c.bf16 %v9632_v5, %v9631_v35  ;;  %v7195_v57 = vpack.c.bf16 %v7169_v53, %v7164_v47  ;;  %v9637_v35 = vand.u32 4294901760, %v7145_v42  ;;  %v244_v53 = vand.u32 4294901760, %v243_v48  ;;  %v7243_v48 = vld [vmem:[%s9314_s3 + $0x10] sm:$0xff] }
  0x53   :  { %v7265_v47 = vand.u32 4294901760, %v7243_v48  ;;  %v96_v18 = vmul.f32 %v7243_v48, %v7243_v48 }
  0x54   :  { %6046 = vmatpush1.bf16.msra.mxu0 %v7129_v30  ;;  %v7175_v30 = vld [vmem:[#allocation5 + $0xf8] sm:$0xff]  ;;  %5938 = vmatpush1.bf16.msra.mxu1 %v7151_v43  ;;  %9633 = vst [vmem:[#allocation48_spill] sm:$0xff] %v7182_v28  ;;  %9636 = vst [vmem:[#allocation50_spill] sm:$0xff] %v7195_v57  ;;  %v7200_v58 = vsub.f32 %v7145_v42, %v9637_v35  ;;  %v7217_v35 = vld [vmem:[%s9314_s3] sm:$0xff]  ;;  %v9681_v43 = vand.u32 4294901760, %v6836_v17 }
  0x55   :  { %6047 = vmatprep.subr.bf16.mxu0 %v9361_v3  ;;  %5939 = vmatprep.subr.bf16.mxu1 %v9361_v3  ;;  %v9347_v5 = vand.u32 4294901760, %v7175_v30  ;;  %9651 = vst [vmem:[#allocation59_spill] sm:$0xff] %v7265_v47  ;;  %v7322_v25 = vsub.f32 %v7243_v48, %v7265_v47  ;;  %v7443_v38 = vand.u32 4294901760, %v96_v18 }
  0x56   :  { %9638 = vst [vmem:[#allocation51_spill] sm:$0xff] %v7200_v58  ;;  %v7223_v21 = vpack.c.bf16 %v7200_v58, %v7188_v61  ;;  %245 = vmatprep.mubr.f32.mxu1 %v244_v53  ;;  %v7259_v58 = vand.u32 4294901760, %v7217_v35 }
  0x57   :  { %9683 = vst [vmem:[#allocation80_spill] sm:$0xff] %v7443_v38 }
  0x58   :  { %6049 = vmatpush1.bf16.msra.mxu0 %v7159_v40  ;;  %5941 = vmatpush1.bf16.msra.mxu1 %v7182_v28  ;;  %v9640_v40 = vand.u32 4294901760, %v6995_v2  ;;  %9642 = vst [vmem:[#allocation53_spill] sm:$0xff] %v7223_v21  ;;  %v7228_v2 = vsub.f32 %v7172_v34, %v9643_v1  ;;  %v7248_v1 = vld [vmem:[%s9314_s3 + $0x28] sm:$0xff]  ;;  %9649 = vst [vmem:[#allocation57_spill] sm:$0xff] %v7259_v58  ;;  %v7314_v33 = vsub.f32 %v7217_v35, %v7259_v58 }
  0x59   :  { %6050 = vmatprep.subr.bf16.mxu0 %v9361_v3  ;;  %5942 = vmatprep.subr.bf16.mxu1 %v9361_v3  ;;  %v7268_v53 = vand.u32 4294901760, %v7248_v1  ;;  %v94_v58 = vmul.f32 %v7217_v35, %v7217_v35 }
  0x5a   :  { %v7212_v49 = vpack.c.bf16 %v9640_v40, %v9639_v19  ;;  %9644 = vst [vmem:[#allocation54_spill] sm:$0xff] %v7228_v2  ;;  %v7233_v19 = vsub.f32 %v7175_v30, %v9347_v5  ;;  %v7238_v40 = vld [vmem:[%s9314_s3 + $0x18] sm:$0xff]  ;;  %v9646_v5 = vand.u32 4294901760, %v7022_v10  ;;  %v7273_v10 = vld [vmem:[%s9314_s3 + $0x20] sm:$0xff]  ;;  %9659 = vst [vmem:[#allocation65_spill] sm:$0xff] %v7314_v33 }
  0x5b   :  { %v7262_v61 = vand.u32 4294901760, %v7238_v40  ;;  %9652 = vst [vmem:[#allocation60_spill] sm:$0xff] %v7268_v53  ;;  %9653 = vst [vmem:[#allocation61_spill] sm:$0xff] %v7273_v10  ;;  %v7326_v9 = vsub.f32 %v7248_v1, %v7268_v53 }
  0x5c   :  { %9641 = vst [vmem:[#allocation52_spill] sm:$0xff] %v7212_v49  ;;  %6052 = vmatpush1.bf16.msra.mxu0 %v7195_v57  ;;  %9645 = vst [vmem:[#allocation55_spill] sm:$0xff] %v7233_v19  ;;  %5944 = vmatpush1.bf16.msra.mxu1 %v7212_v49  ;;  %v9647_v57 = vand.u32 4294901760, %v7025_v11  ;;  %v7279_v11 = vpack.c.bf16 %v7233_v19, %v7228_v2  ;;  %v7300_v19 = vld [vmem:[%s9315_s4 + $0x10] sm:$0xff]  ;;  %v7303_v2 = vand.u32 4294901760, %v7273_v10 }
  0x5d   :  { %6053 = vmatprep.subr.bf16.mxu0 %v9361_v3  ;;  %9650 = vst [vmem:[#allocation58_spill] sm:$0xff] %v7262_v61  ;;  %5945 = vmatprep.subr.bf16.mxu1 %v9361_v3  ;;  %v7318_v32 = vsub.f32 %v7238_v40, %v7262_v61  ;;  %v7345_v53 = vand.u32 4294901760, %v7300_v19  ;;  %v7350_v61 = vld [vmem:[%s9315_s4 + $0x20] sm:$0xff]  ;;  %v7373_v49 = vpack.c.bf16 %v9668_v60, %v9667_v62 }
  0x5e   :  { %v7256_v52 = vpack.c.bf16 %v9647_v57, %v9646_v5  ;;  %9654 = vst [vmem:[#allocation62_spill] sm:$0xff] %v7279_v11  ;;  %v7284_v57 = vld [vmem:[%s9315_s4 + $0x8] sm:$0xff]  ;;  %v7290_v5 = vld [vmem:[%s9315_s4] sm:$0xff]  ;;  %9655 = vst [vmem:[#allocation63_spill] sm:$0xff] %v7303_v2  ;;  %v7361_v8 = vsub.f32 %v7273_v10, %v7303_v2  ;;  %v7377_v16 = vand.u32 4294901760, %v7350_v61  ;;  %v7383_v2 = vmul.f32 %v7248_v1, %v7248_v1 }
  0x5f   :  { %9664 = vst [vmem:[#allocation69_spill] sm:$0xff] %v7345_v53  ;;  %9665 = vst [vmem:[#allocation70_spill] sm:$0xff] %v7350_v61  ;;  %v7390_v60 = vpack.c.bf16 %v9672_v63, %v9671_v31 }
  0x60   :  { %9648 = vst [vmem:[#allocation56_spill] sm:$0xff] %v7256_v52  ;;  %6055 = vmatpush1.bf16.msra.mxu0 %v7223_v21  ;;  %v7295_v21 = vld [vmem:[%s9315_s4 + $0x18] sm:$0xff]  ;;  %5947 = vmatpush1.bf16.msra.mxu1 %v7256_v52  ;;  %v97_v52 = vmul.f32 %v7238_v40, %v7238_v40  ;;  %9669 = vst [vmem:[#allocation72_spill] sm:$0xff] %v7373_v49 }
  0x61   :  { %6056 = vmatprep.subr.bf16.mxu0 %v9361_v3  ;;  %v9656_v3 = vand.u32 4294901760, %v7053_v24  ;;  %5948 = vmatprep.subr.bf16.mxu1 %v9660_v55  ;;  %v7336_v24 = vand.u32 4294901760, %v7284_v57  ;;  %v7342_v47 = vand.u32 4294901760, %v7295_v21  ;;  %9670 = vst [vmem:[#allocation73_spill] sm:$0xff] %v7377_v16  ;;  %9673 = vst [vmem:[#allocation74_spill] sm:$0xff] %v7390_v60 }
  0x62   :  { %v7419_v28 = vand.u32 4294901760, %v97_v52 }
  0x63   :  { %v7310_v39 = vpack.c.bf16 %v9657_v0, %v9656_v3  ;;  %v7331_v3 = vld [vmem:[%s9315_s4 + $0x28] sm:$0xff]  ;;  %9661 = vst [vmem:[#allocation66_spill] sm:$0xff] %v7336_v24  ;;  %v7339_v0 = vand.u32 4294901760, %v7290_v5  ;;  %9663 = vst [vmem:[#allocation68_spill] sm:$0xff] %v7342_v47  ;;  %v7396_v62 = vsub.f32 %v7284_v57, %v7336_v24  ;;  %v7409_v31 = vsub.f32 %v7295_v21, %v7342_v47 }
  0x64   :  { %6058 = vmatpush1.bf16.msra.mxu0 %v7279_v11  ;;  %v95_v11 = vmul.f32 %v6913_v41, %v6913_v41  ;;  %v7364_v7 = vand.u32 4294901760, %v7331_v3  ;;  %v7417_v24 = vsub.f32 %v7300_v19, %v7345_v53  ;;  %9676 = vst [vmem:[#allocation77_spill] sm:$0xff] %v7419_v28  ;;  %v9680_v47 = vand.u32 4294901760, %v6830_v14 }
  0x65   :  { %9658 = vst [vmem:[#allocation64_spill] sm:$0xff] %v7310_v39  ;;  %9662 = vst [vmem:[#allocation67_spill] sm:$0xff] %v7339_v0  ;;  %6059 = vmatprep.subr.bf16.mxu0 %v9660_v55  ;;  %5950 = vmatpush1.bf16.msra.mxu1 %v7310_v39  ;;  %v98_v39 = vmul.f32 %v7273_v10, %v7273_v10  ;;  %v7404_v50 = vsub.f32 %v7290_v5, %v7339_v0  ;;  %v9678_v0 = vand.u32 4294901760, %v7115_v20 }
  0x66   :  { %9666 = vst [vmem:[#allocation71_spill] sm:$0xff] %v7364_v7  ;;  %5951 = vmatprep.subr.bf16.mxu1 %v9660_v55  ;;  %v7411_v63 = vand.u32 4294901760, %v95_v11  ;;  %v7432_v10 = vpack.c.bf16 %v9681_v43, %v9680_v47  ;;  %v7437_v53 = vsub.f32 %v7331_v3, %v7364_v7  ;;  %v101_v20 = vmul.f32 %v7284_v57, %v7284_v57 }
  0x67   :  { %1259 = vmatmul.mubr.f32.vlgmr.msra.gmra.mrb[0].mxu0 %v7314_v33  ;;  %v7426_v60 = vpack.c.bf16 %v9678_v0, %v9677_v54  ;;  %v7446_v54 = vand.u32 4294901760, %v7383_v2  ;;  %v7451_v43 = vand.u32 4294901760, %v98_v39  ;;  %v7468_v6 = vsub.f32 %v97_v52, %v7419_v28 }
  0x68   :  { %1265 = vmatprep.mubr.f32.mxu0 %v7318_v32  ;;  %6061 = vmatpush1.bf16.msra.mxu0 %v6961_v56  ;;  %9674 = vst [vmem:[#allocation75_spill] sm:$0xff] %v7411_v63  ;;  %v7413_v56 = vand.u32 4294901760, %v94_v58  ;;  %9682 = vst [vmem:[#allocation79_spill] sm:$0xff] %v7432_v10  ;;  %v9689_v0 = vand.u32 4294901760, %v7142_v26  ;;  %v9690_v47 = vand.u32 4294901760, %v7145_v42  ;;  %v103_v52 = vmul.f32 %v7295_v21, %v7295_v21 }
  0x69   :  { %6062 = vmatprep.subr.bf16.mxu0 %v9660_v55  ;;  %5953 = vmatpush1.bf16.msra.mxu1 %v7373_v49  ;;  %9679 = vst [vmem:[#allocation78_spill] sm:$0xff] %v7426_v60  ;;  %v7441_v49 = vsub.f32 %v7350_v61, %v7377_v16  ;;  %9684 = vst [vmem:[#allocation81_spill] sm:$0xff] %v7446_v54  ;;  %v7459_v16 = vsub.f32 %v95_v11, %v7411_v63  ;;  %v9698_v42 = vand.u32 4294901760, %v7314_v33 }
  0x6a   :  { %9675 = vst [vmem:[#allocation76_spill] sm:$0xff] %v7413_v56  ;;  %5954 = vmatprep.subr.bf16.mxu1 %v9660_v55  ;;  %9685 = vst [vmem:[#allocation82_spill] sm:$0xff] %v7451_v43  ;;  %v7462_v7 = vsub.f32 %v94_v58, %v7413_v56  ;;  %v7475_v45 = vpack.c.bf16 %v9690_v47, %v9689_v0  ;;  %v9692_v58 = vand.u32 4294901760, %v6853_v22  ;;  %v9693_v56 = vand.u32 4294901760, %v6858_v23 }
  0x6b   :  { %1268 = vmatmul.mubr.f32.gmra.mrb[2].mxu0 %v7322_v25  ;;  %9686 = vst [vmem:[#allocation83_spill] sm:$0xff] %v7459_v16  ;;  %9688 = vst [vmem:[#allocation85_spill] sm:$0xff] %v7468_v6  ;;  %v102_v26 = vmul.f32 %v7300_v19, %v7300_v19  ;;  %v7497_v0 = vand.u32 4294901760, %v101_v20  ;;  %v104_v47 = vmul.f32 %v7350_v61, %v7350_v61 }
  0x6c   :  { %1274 = vmatprep.mubr.f32.mxu0 %v7326_v9  ;;  %6064 = vmatpush1.bf16.msra.mxu0 %v6971_v59  ;;  %9687 = vst [vmem:[#allocation84_spill] sm:$0xff] %v7462_v7  ;;  %v100_v59 = vmul.f32 %v7290_v5, %v7290_v5  ;;  %9691 = vst [vmem:[#allocation86_spill] sm:$0xff] %v7475_v45  ;;  %v7482_v63 = vpack.c.bf16 %v9693_v56, %v9692_v58 }
  0x6d   :  { %6065 = vmatprep.subr.bf16.mxu0 %v9660_v55  ;;  %5956 = vmatpush1.bf16.msra.mxu1 %v7426_v60  ;;  %v7495_v56 = vsub.f32 %v96_v18, %v7443_v38  ;;  %9696 = vst [vmem:[#allocation89_spill] sm:$0xff] %v7497_v0  ;;  %v105_v58 = vmul.f32 %v7331_v3, %v7331_v3  ;;  %v9699_v18 = vand.u32 4294901760, %v6869_v27  ;;  %v9700_v38 = vand.u32 4294901760, %v6879_v29 }
  0x6e   :  { %9694 = vst [vmem:[#allocation87_spill] sm:$0xff] %v7482_v63  ;;  %5957 = vmatprep.subr.bf16.mxu1 %v9660_v55  ;;  %v7503_v10 = vand.u32 4294901760, %v100_v59  ;;  %v107_v11 = vmul.f32 %v7284_v57, %v6913_v41  ;;  %v9701_v63 = vand.u32 4294901760, %v7172_v34  ;;  %v9702_v60 = vand.u32 4294901760, %v7175_v30 }
  0x6f   :  { %1277 = vmatmul.mubr.f32.gmra.mrb[4].mxu0 %v7361_v8  ;;  %9695 = vst [vmem:[#allocation88_spill] sm:$0xff] %v7495_v56  ;;  %v7514_v28 = vpack.c.bf16 %v9700_v38, %v9699_v18  ;;  %v9704_v56 = vand.u32 4294901760, %v7318_v32  ;;  %v7532_v38 = vsub.f32 %v7383_v2, %v7446_v54  ;;  %v7535_v41 = vsub.f32 %v98_v39, %v7451_v43  ;;  %v9744_v43 = vld [vmem:[#allocation70_spill] sm:$0xff] }
  0x70   :  { %1283 = vmatprep.mubr.f32.mxu0 %v7396_v62  ;;  %6067 = vmatpush1.bf16.msra.mxu0 %v7001_v4  ;;  %9697 = vst [vmem:[#allocation90_spill] sm:$0xff] %v7503_v10  ;;  %v249_v4 = vsub.f32 %v7314_v33, %v9698_v42  ;;  %v7523_v61 = vpack.c.bf16 %v9702_v60, %v9701_v63  ;;  %v7537_v34 = vand.u32 4294901760, %v103_v52  ;;  %v7539_v30 = vand.u32 4294901760, %v102_v26 }
  0x71   :  { %6068 = vmatprep.subr.bf16.mxu0 %v9660_v55  ;;  %5959 = vmatpush1.bf16.msra.mxu1 %v7475_v45  ;;  %v258_v42 = vsub.f32 %v7318_v32, %v9704_v56  ;;  %9705 = vst [vmem:[#allocation92_spill] sm:$0xff] %v7532_v38  ;;  %9706 = vst [vmem:[#allocation93_spill] sm:$0xff] %v7535_v41  ;;  %v7545_v57 = vsub.f32 %v101_v20, %v7497_v0  ;;  %v7547_v60 = vand.u32 4294901760, %v105_v58 }
  0x72   :  { %9703 = vst [vmem:[#allocation91_spill] sm:$0xff] %v7523_v61  ;;  %9707 = vst [vmem:[#allocation94_spill] sm:$0xff] %v7537_v34  ;;  %5960 = vmatprep.subr.bf16.mxu1 %v9660_v55  ;;  %v106_v2 = vmul.f32 %v7290_v5, %v7217_v35  ;;  %v9711_v39 = vand.u32 4294901760, %v7322_v25  ;;  %v7556_v56 = vsub.f32 %v100_v59, %v7503_v10  ;;  %v7558_v18 = vand.u32 4294901760, %v104_v47 }
  0x73   :  { %1286 = vmatmul.mubr.f32.gmra.mrb[6].mxu0 %v7404_v50  ;;  %9708 = vst [vmem:[#allocation95_spill] sm:$0xff] %v7539_v30  ;;  %9709 = vst [vmem:[#allocation96_spill] sm:$0xff] %v7545_v57  ;;  %v250_v33 = vand.u32 4294901760, %v249_v4  ;;  %v259_v0 = vand.u32 4294901760, %v258_v42  ;;  %v9715_v35 = vand.u32 4294901760, %v7326_v9  ;;  %v7570_v59 = vsub.f32 %v103_v52, %v7537_v34 }
  0x74   :  { %1292 = vmatprep.mubr.f32.mxu0 %v7409_v31  ;;  %6070 = vmatpush1.bf16.msra.mxu0 %v7031_v15  ;;  %9710 = vst [vmem:[#allocation97_spill] sm:$0xff] %v7547_v60  ;;  %v264_v63 = vsub.f32 %v7322_v25, %v9711_v39  ;;  %9712 = vst [vmem:[#allocation98_spill] sm:$0xff] %v7556_v56  ;;  %v7561_v15 = vand.u32 4294901760, %v107_v11  ;;  %v7573_v4 = vsub.f32 %v102_v26, %v7539_v30 }
  0x75   :  { %6071 = vmatprep.subr.bf16.mxu0 %v9660_v55  ;;  %9713 = vst [vmem:[#allocation99_spill] sm:$0xff] %v7558_v18  ;;  %5962 = vmatpush1.bf16.msra.mxu1 %v7523_v61  ;;  %v273_v5 = vsub.f32 %v7326_v9, %v9715_v35  ;;  %9716 = vst [vmem:[#allocation101_spill] sm:$0xff] %v7570_v59  ;;  %v7581_v42 = vsub.f32 %v105_v58, %v7547_v60  ;;  %v7583_v35 = vand.u32 4294901760, %v106_v2 }
  0x76   :  { %9714 = vst [vmem:[#allocation100_spill] sm:$0xff] %v7561_v15  ;;  %9717 = vst [vmem:[#allocation102_spill] sm:$0xff] %v7573_v4  ;;  %5963 = vmatprep.subr.bf16.mxu1 %v9660_v55  ;;  %v7587_v52 = vmul.f32 %v7295_v21, %v7238_v40  ;;  %v265_v26 = vand.u32 4294901760, %v264_v63  ;;  %v9720_v39 = vand.u32 4294901760, %v7361_v8  ;;  %v9722_v58 = vand.u32 4294901760, %v6902_v37 }
  0x77   :  { %1295 = vmatmul.mubr.f32.gmra.mrb[8].mxu0 %v7417_v24  ;;  %9718 = vst [vmem:[#allocation103_spill] sm:$0xff] %v7581_v42  ;;  %9719 = vst [vmem:[#allocation104_spill] sm:$0xff] %v7583_v35  ;;  %v9723_v30 = vand.u32 4294901760, %v6822_v12  ;;  %v274_v40 = vand.u32 4294901760, %v273_v5  ;;  %v9725_v20 = vand.u32 4294901760, %v6825_v13  ;;  %v9731_v5 = vand.u32 4294901760, %v6830_v14 }
  0x78   :  { %1301 = vmatprep.mubr.f32.mxu0 %v7437_v53  ;;  %6073 = vmatpush1.bf16.msra.mxu0 %v7061_v51  ;;  %v279_v10 = vsub.f32 %v7361_v8, %v9720_v39  ;;  %v9721_v51 = vand.u32 4294901760, %v6897_v36 }
  0x79   :  { %6074 = vmatprep.subr.bf16.mxu0 %v9660_v55  ;;  %251 = vmatmul.mubr.f32.vlgmr.msra.gmra.mrb[0].mxu1 %v250_v33  ;;  %v695_v21 = vsub.f32 %v6822_v12, %v9723_v30  ;;  %v9724_v33 = vand.u32 4294901760, %v7396_v62  ;;  %v702_v34 = vsub.f32 %v6825_v13, %v9725_v20  ;;  %v7619_v12 = vmul.f32 %v7300_v19, %v7243_v48 }
  0x7a   :  { %v7598_v60 = vpack.c.bf16 %v9722_v58, %v9721_v51  ;;  %260 = vmatprep.mubr.f32.mxu1 %v259_v0  ;;  %v7612_v51 = vsub.f32 %v104_v47, %v7558_v18  ;;  %v7615_v58 = vsub.f32 %v107_v11, %v7561_v15  ;;  %v7624_v30 = vsub.f32 %v106_v2, %v7583_v35 }
  0x7b   :  { %v288_v63 = vsub.f32 %v7396_v62, %v9724_v33  ;;  %1304 = vmatmul.mubr.f32.gmra.mrb[10].mxu0 %v7441_v49  ;;  %v696_v0 = vand.u32 4294901760, %v695_v21  ;;  %v7627_v13 = vand.u32 4294901760, %v7587_v52  ;;  %v703_v20 = vand.u32 4294901760, %v702_v34 }
  0x7c   :  { %9726 = vst [vmem:[#allocation105_spill] sm:$0xff] %v7612_v51  ;;  %9727 = vst [vmem:[#allocation106_spill] sm:$0xff] %v7615_v58  ;;  %1310 = vmatprep.mubr.f32.mxu0 %v7459_v16  ;;  %6076 = vmatpush1.bf16.msra.mxu0 %v7091_v46  ;;  %v280_v11 = vand.u32 4294901760, %v279_v10  ;;  %v9730_v19 = vand.u32 4294901760, %v7404_v50  ;;  %v709_v21 = vsub.f32 %v6830_v14, %v9731_v5  ;;  %v9732_v2 = vand.u32 4294901760, %v6836_v17  ;;  %v9734_v5 = vld [vmem:[#allocation13_spill] sm:$0xff] }
  0x7d   :  { %9728 = vst [vmem:[#allocation107_spill] sm:$0xff] %v7624_v30  ;;  %9729 = vst [vmem:[#allocation108_spill] sm:$0xff] %v7627_v13  ;;  %6077 = vmatprep.subr.bf16.mxu0 %v9660_v55  ;;  %266 = vmatmul.mubr.f32.gmra.mrb[2].mxu1 %v265_v26  ;;  %v289_v39 = vand.u32 4294901760, %v288_v63  ;;  %v9733_v34 = vand.u32 4294901760, %v7409_v31  ;;  %v5964_v26 = vpack.c.bf16 %v703_v20, %v696_v0  ;;  %v9467_v14 = vand.u32 4294901760, %v6924_v44  ;;  %v7659_v0 = vld [vmem:[%s9314_s3 + $0x38] sm:$0xff] }
  0x7e   :  { %v294_v48 = vsub.f32 %v7404_v50, %v9730_v19  ;;  %v716_v33 = vsub.f32 %v6836_v17, %v9732_v2  ;;  %275 = vmatprep.mubr.f32.mxu1 %v274_v40  ;;  %v7647_v19 = vmul.f32 %v7331_v3, %v7248_v1  ;;  %v9466_v46 = vand.u32 4294901760, %v9734_v5  ;;  %v9735_v40 = vld [vmem:[#allocation40_spill] sm:$0xff] }
  0x7f   :  { %v303_v47 = vsub.f32 %v7409_v31, %v9733_v34  ;;  %1313 = vmatmul.mubr.f32.gmra.mrb[12].mxu0 %v7462_v7  ;;  %v710_v17 = vand.u32 4294901760, %v709_v21  ;;  %v7654_v63 = vand.u32 4294901760, %v7619_v12  ;;  %v9737_v1 = vand.u32 4294901760, %v7417_v24  ;;  %v7669_v21 = vld [vmem:[%s9314_s3 + $0x30] sm:$0xff]  ;;  %5965 = vmatpush1.bf16.msra.mxu1 %v5964_v26 }
  0x80   :  { %1319 = vmatprep.mubr.f32.mxu0 %v7468_v6  ;;  %6079 = vmatpush1.bf16.msra.mxu0 %v9735_v40  ;;  %v717_v2 = vand.u32 4294901760, %v716_v33  ;;  %v295_v34 = vand.u32 4294901760, %v294_v48  ;;  %v7675_v10 = vpack.c.bf16 %v9466_v46, %v9467_v14  ;;  %v9740_v33 = vand.u32 4294901760, %v6858_v23  ;;  %v9742_v46 = vld [vmem:[#allocation88_spill] sm:$0xff]  ;;  %v9743_v14 = vld [vmem:[#allocation61_spill] sm:$0xff] }
  0x81   :  { %9736 = vst [vmem:[#allocation13_spill] sm:$0xff] %v7654_v63  ;;  %v309_v3 = vsub.f32 %v7417_v24, %v9737_v1  ;;  %6080 = vmatprep.subr.bf16.mxu0 %v9660_v55  ;;  %281 = vmatmul.mubr.f32.gmra.mrb[4].mxu1 %v280_v11  ;;  %v9739_v1 = vand.u32 4294901760, %v6853_v22  ;;  %v304_v35 = vand.u32 4294901760, %v303_v47  ;;  %v9741_v15 = vand.u32 4294901760, %v7437_v53  ;;  %v9747_v47 = vld [vmem:[#allocation44_spill] sm:$0xff] }
  0x82   :  { %9738 = vst [vmem:[#allocation109_spill] sm:$0xff] %v7675_v10  ;;  %v730_v40 = vsub.f32 %v6858_v23, %v9740_v33  ;;  %290 = vmatprep.mubr.f32.mxu1 %v289_v39  ;;  %v5967_v18 = vpack.c.bf16 %v717_v2, %v710_v17  ;;  %v7690_v54 = vmul.f32 %v9744_v43, %v9743_v14  ;;  %v7703_v26 = vand.u32 4294901760, %v7669_v21  ;;  %v7708_v43 = vld [vmem:[%s9314_s3 + $0x48] sm:$0xff] }
  0x83   :  { %v723_v20 = vsub.f32 %v6853_v22, %v9739_v1  ;;  %v318_v11 = vsub.f32 %v7437_v53, %v9741_v15  ;;  %1322 = vmatmul.mubr.f32.gmra.mrb[14].mxu0 %v9742_v46  ;;  %v7693_v22 = vand.u32 4294901760, %v7659_v0  ;;  %5966 = vmatprep.subr.bf16.mxu1 %v9660_v55  ;;  %v7699_v15 = vsub.f32 %v7587_v52, %v7627_v13 }
  0x84   :  { %v731_v39 = vand.u32 4294901760, %v730_v40  ;;  %1328 = vmatprep.mubr.f32.mxu0 %v7532_v38  ;;  %6082 = vmatpush1.bf16.msra.mxu0 %v9747_v47  ;;  %9748 = vst [vmem:[#allocation110_spill] sm:$0xff] %v7703_v26  ;;  %v7713_v40 = vand.u32 4294901760, %v7647_v19  ;;  %v310_v52 = vand.u32 4294901760, %v309_v3  ;;  %v9751_v1 = vand.u32 4294901760, %v6869_v27 }
  0x85   :  { %9745 = vst [vmem:[#allocation61_spill] sm:$0xff] %v7693_v22  ;;  %v724_v23 = vand.u32 4294901760, %v723_v20  ;;  %9746 = vst [vmem:[#allocation70_spill] sm:$0xff] %v7699_v15  ;;  %6083 = vmatprep.subr.bf16.mxu0 %v9660_v55  ;;  %296 = vmatmul.mubr.f32.gmra.mrb[6].mxu1 %v295_v34  ;;  %v9750_v20 = vand.u32 4294901760, %v7441_v49  ;;  %v319_v48 = vand.u32 4294901760, %v318_v11  ;;  %v9752_v14 = vand.u32 4294901760, %v7459_v16 }
  0x86   :  { %9749 = vst [vmem:[#allocation111_spill] sm:$0xff] %v7713_v40  ;;  %v737_v33 = vsub.f32 %v6869_v27, %v9751_v1  ;;  %305 = vmatprep.mubr.f32.mxu1 %v304_v35  ;;  %5968 = vmatpush1.bf16.msra.mxu1 %v5967_v18  ;;  %v9753_v13 = vand.u32 4294901760, %v6879_v29  ;;  %v7730_v34 = vand.u32 4294901760, %v7708_v43  ;;  %v9755_v27 = vld [vmem:[#allocation15_spill] sm:$0xff]  ;;  %v9756_v11 = vld [vmem:[#allocation18_spill] sm:$0xff]  ;;  %v9757_v18 = vld [vmem:[#allocation48_spill] sm:$0xff] }
  0x87   :  { %v324_v2 = vsub.f32 %v7441_v49, %v9750_v20  ;;  %v333_v17 = vsub.f32 %v7459_v16, %v9752_v14  ;;  %v5970_v47 = vpack.c.bf16 %v731_v39, %v724_v23  ;;  %1331 = vmatmul.mubr.f32.gmra.mrb[16].mxu0 %v7535_v41  ;;  %5969 = vmatprep.subr.bf16.mxu1 %v9660_v55  ;;  %v9476_v35 = vand.u32 4294901760, %v9755_v27 }
  0x88   :  { %v744_v3 = vsub.f32 %v6879_v29, %v9753_v13  ;;  %9754 = vst [vmem:[#allocation112_spill] sm:$0xff] %v7730_v34  ;;  %v738_v1 = vand.u32 4294901760, %v737_v33  ;;  %1337 = vmatprep.mubr.f32.mxu0 %v7545_v57  ;;  %6085 = vmatpush1.bf16.msra.mxu0 %v9757_v18  ;;  %v9758_v23 = vand.u32 4294901760, %v7462_v7  ;;  %v9759_v13 = vand.u32 4294901760, %v7468_v6 }
  0x89   :  { %6086 = vmatprep.subr.bf16.mxu0 %v9660_v55  ;;  %311 = vmatmul.mubr.f32.gmra.mrb[8].mxu1 %v310_v52  ;;  %v325_v20 = vand.u32 4294901760, %v324_v2  ;;  %v9760_v33 = vand.u32 4294901760, %v9756_v11  ;;  %v9762_v16 = vand.u32 4294901760, %v6897_v36  ;;  %v334_v52 = vand.u32 4294901760, %v333_v17 }
  0x8a   :  { %v339_v29 = vsub.f32 %v7462_v7, %v9758_v23  ;;  %v348_v39 = vsub.f32 %v7468_v6, %v9759_v13  ;;  %v745_v10 = vand.u32 4294901760, %v744_v3  ;;  %v9763_v7 = vand.u32 4294901760, %v6902_v37  ;;  %320 = vmatprep.mubr.f32.mxu1 %v319_v48  ;;  %5971 = vmatpush1.bf16.msra.mxu1 %v5970_v47  ;;  %v9769_v48 = vld [vmem:[#allocation52_spill] sm:$0xff] }
  0x8b   :  { %v7749_v18 = vpack.c.bf16 %v9760_v33, %v9476_v35  ;;  %v751_v23 = vsub.f32 %v6897_v36, %v9762_v16  ;;  %v7759_v3 = vsub.f32 %v7619_v12, %v7654_v63  ;;  %1340 = vmatmul.mubr.f32.gmra.mrb[18].mxu0 %v7556_v56  ;;  %v7764_v33 = vand.u32 4294901760, %v7690_v54  ;;  %5972 = vmatprep.subr.bf16.mxu1 %v9660_v55 }
  0x8c   :  { %v758_v13 = vsub.f32 %v6902_v37, %v9763_v7  ;;  %v5973_v14 = vpack.c.bf16 %v745_v10, %v738_v1  ;;  %v7768_v36 = vsub.f32 %v7659_v0, %v7693_v22  ;;  %1346 = vmatprep.mubr.f32.mxu0 %v7570_v59  ;;  %v7774_v16 = vsub.f32 %v7647_v19, %v7713_v40  ;;  %v7783_v10 = vld [vmem:[%s9314_s3 + $0x40] sm:$0xff] }
  0x8d   :  { %9761 = vst [vmem:[#allocation15_spill] sm:$0xff] %v7749_v18  ;;  %9764 = vst [vmem:[#allocation18_spill] sm:$0xff] %v7759_v3  ;;  %v752_v37 = vand.u32 4294901760, %v751_v23  ;;  %v7778_v12 = vsub.f32 %v7669_v21, %v7703_v26  ;;  %6088 = vmatpush1.bf16.msra.mxu0 %v9769_v48  ;;  %v9770_v47 = vand.u32 4294901760, %v9742_v46  ;;  %v7792_v19 = vsub.f32 %v7708_v43, %v7730_v34 }
  0x8e   :  { %9765 = vst [vmem:[#allocation113_spill] sm:$0xff] %v7764_v33  ;;  %9766 = vst [vmem:[#allocation114_spill] sm:$0xff] %v7768_v36  ;;  %v759_v7 = vand.u32 4294901760, %v758_v13  ;;  %6089 = vmatprep.subr.bf16.mxu0 %v9660_v55  ;;  %326 = vmatmul.mubr.f32.gmra.mrb[10].mxu1 %v325_v20  ;;  %v340_v23 = vand.u32 4294901760, %v339_v29  ;;  %v349_v13 = vand.u32 4294901760, %v348_v39  ;;  %v9772_v35 = vand.u32 4294901760, %v6924_v44 }
  0x8f   :  { %9767 = vst [vmem:[#allocation115_spill] sm:$0xff] %v7774_v16  ;;  %9768 = vst [vmem:[#allocation116_spill] sm:$0xff] %v7778_v12  ;;  %v354_v17 = vsub.f32 %v9742_v46, %v9770_v47  ;;  %335 = vmatprep.mubr.f32.mxu1 %v334_v52  ;;  %v9773_v48 = vand.u32 4294901760, %v7532_v38  ;;  %5974 = vmatpush1.bf16.msra.mxu1 %v5973_v14  ;;  %v9774_v34 = vand.u32 4294901760, %v9734_v5  ;;  %v7807_v20 = vand.u32 4294901760, %v7783_v10  ;;  %v9777_v39 = vld [vmem:[#allocation23_spill] sm:$0xff] }
  0x90   :  { %9771 = vst [vmem:[#allocation117_spill] sm:$0xff] %v7792_v19  ;;  %v765_v2 = vsub.f32 %v6924_v44, %v9772_v35  ;;  %v5976_v26 = vpack.c.bf16 %v759_v7, %v752_v37  ;;  %1349 = vmatmul.mubr.f32.gmra.mrb[20].mxu0 %v7573_v4  ;;  %v7812_v44 = vld [vmem:[%s9314_s3 + $0x58] sm:$0xff]  ;;  %5975 = vmatprep.subr.bf16.mxu1 %v9660_v55  ;;  %v9776_v35 = vld [vmem:[#allocation21_spill] sm:$0xff]  ;;  %v799_v14 = vand.u32 4294901760, %v9777_v39  ;;  %v9779_v7 = vand.u32 4294901760, %v7535_v41 }
  0x91   :  { %v363_v47 = vsub.f32 %v7532_v38, %v9773_v48  ;;  %v772_v22 = vsub.f32 %v9734_v5, %v9774_v34  ;;  %9775 = vst [vmem:[#allocation118_spill] sm:$0xff] %v7807_v20  ;;  %v792_v29 = vand.u32 4294901760, %v9776_v35  ;;  %1355 = vmatprep.mubr.f32.mxu0 %v7581_v42  ;;  %v7821_v5 = vld [vmem:[%s9314_s3 + $0x50] sm:$0xff]  ;;  %v9778_v34 = vld [vmem:[#allocation56_spill] sm:$0xff]  ;;  %v355_v37 = vand.u32 4294901760, %v354_v17 }
  0x92   :  { %v766_v52 = vand.u32 4294901760, %v765_v2  ;;  %6091 = vmatpush1.bf16.msra.mxu0 %v9778_v34  ;;  %v369_v48 = vsub.f32 %v7535_v41, %v9779_v7  ;;  %341 = vmatmul.mubr.f32.gmra.mrb[12].mxu1 %v340_v23  ;;  %v9781_v38 = vand.u32 4294901760, %v9755_v27  ;;  %v9782_v17 = vand.u32 4294901760, %v9756_v11 }
  0x93   :  { %v773_v40 = vand.u32 4294901760, %v772_v22  ;;  %6092 = vmatprep.subr.bf16.mxu0 %v9660_v55  ;;  %v7830_v63 = vpack.c.bf16 %v799_v14, %v792_v29  ;;  %v7839_v7 = vand.u32 4294901760, %v7812_v44  ;;  %350 = vmatprep.mubr.f32.mxu1 %v349_v13  ;;  %v364_v22 = vand.u32 4294901760, %v363_v47  ;;  %v9788_v47 = vld [vmem:[#allocation26_spill] sm:$0xff] }
  0x94   :  { %v779_v46 = vsub.f32 %v9755_v27, %v9781_v38  ;;  %v786_v34 = vsub.f32 %v9756_v11, %v9782_v17  ;;  %v9784_v1 = vand.u32 4294901760, %v7545_v57  ;;  %5977 = vmatpush1.bf16.msra.mxu1 %v5976_v26  ;;  %1358 = vmatmul.mubr.f32.gmra.mrb[22].mxu0 %v7612_v51  ;;  %v7847_v38 = vsub.f32 %v7690_v54, %v7764_v33  ;;  %v7857_v26 = vld [vmem:[%s9315_s4 + $0x38] sm:$0xff] }
  0x95   :  { %9780 = vst [vmem:[#allocation21_spill] sm:$0xff] %v7830_v63  ;;  %9783 = vst [vmem:[#allocation23_spill] sm:$0xff] %v7839_v7  ;;  %v5979_v2 = vpack.c.bf16 %v773_v40, %v766_v52  ;;  %v7850_v27 = vand.u32 4294901760, %v7821_v5  ;;  %5978 = vmatprep.subr.bf16.mxu1 %v9660_v55  ;;  %1364 = vmatprep.mubr.f32.mxu0 %v7615_v58  ;;  %v9787_v40 = vld [vmem:[#allocation64_spill] sm:$0xff]  ;;  %v806_v52 = vand.u32 4294901760, %v9788_v47  ;;  %v9789_v17 = vld [vmem:[#allocation27_spill] sm:$0xff] }
  0x96   :  { %v378_v23 = vsub.f32 %v7545_v57, %v9784_v1  ;;  %9785 = vst [vmem:[#allocation119_spill] sm:$0xff] %v7847_v38  ;;  %v780_v11 = vand.u32 4294901760, %v779_v46  ;;  %v787_v13 = vand.u32 4294901760, %v786_v34  ;;  %6094 = vmatpush1.bf16.msra.mxu0 %v9787_v40  ;;  %v370_v1 = vand.u32 4294901760, %v369_v48  ;;  %v7866_v46 = vld [vmem:[%s9315_s4 + $0x30] sm:$0xff]  ;;  %356 = vmatmul.mubr.f32.gmra.mrb[14].mxu1 %v355_v37 }
  0x97   :  { %9786 = vst [vmem:[#allocation120_spill] sm:$0xff] %v7850_v27  ;;  %v813_v33 = vand.u32 4294901760, %v9789_v17  ;;  %6095 = vmatprep.subr.bf16.mxu0 %v9660_v55  ;;  %v9790_v34 = vand.u32 4294901760, %v7556_v56  ;;  %v9791_v48 = vand.u32 4294901760, %v7570_v59  ;;  %v793_v41 = vsub.f32 %v9776_v35, %v792_v29  ;;  %365 = vmatprep.mubr.f32.mxu1 %v364_v22 }
  0x98   :  { %v379_v63 = vand.u32 4294901760, %v378_v23  ;;  %5980 = vmatpush1.bf16.msra.mxu1 %v5979_v2  ;;  %v5982_v6 = vpack.c.bf16 %v787_v13, %v780_v11  ;;  %v800_v37 = vsub.f32 %v9777_v39, %v799_v14  ;;  %1367 = vmatmul.mubr.f32.gmra.mrb[24].mxu0 %v7624_v30  ;;  %v7890_v35 = vand.u32 4294901760, %v7857_v26  ;;  %v9797_v14 = vld [vmem:[#allocation72_spill] sm:$0xff] }
  0x99   :  { %v384_v57 = vsub.f32 %v7556_v56, %v9790_v34  ;;  %v393_v54 = vsub.f32 %v7570_v59, %v9791_v48  ;;  %v7877_v18 = vpack.c.bf16 %v813_v33, %v806_v52  ;;  %v7883_v34 = vsub.f32 %v7783_v10, %v7807_v20  ;;  %5981 = vmatprep.subr.bf16.mxu1 %v9660_v55 }
  0x9a   :  { %v7887_v48 = vsub.f32 %v7812_v44, %v7839_v7  ;;  %9795 = vst [vmem:[#allocation122_spill] sm:$0xff] %v7890_v35  ;;  %v794_v29 = vand.u32 4294901760, %v793_v41  ;;  %1373 = vmatprep.mubr.f32.mxu0 %v7699_v15  ;;  %v7895_v39 = vand.u32 4294901760, %v7866_v46  ;;  %6097 = vmatpush1.bf16.msra.mxu0 %v9797_v14  ;;  %v9798_v2 = vand.u32 4294901760, %v7573_v4 }
  0x9b   :  { %9792 = vst [vmem:[#allocation26_spill] sm:$0xff] %v7877_v18  ;;  %9793 = vst [vmem:[#allocation27_spill] sm:$0xff] %v7883_v34  ;;  %v801_v11 = vand.u32 4294901760, %v800_v37  ;;  %v7904_v13 = vsub.f32 %v7821_v5, %v7850_v27  ;;  %6098 = vmatprep.subr.bf16.mxu0 %v9660_v55  ;;  %371 = vmatmul.mubr.f32.gmra.mrb[16].mxu1 %v370_v1  ;;  %v385_v41 = vand.u32 4294901760, %v384_v57  ;;  %v394_v14 = vand.u32 4294901760, %v393_v54  ;;  %v7921_v57 = vld [vmem:[%s9315_s4 + $0x48] sm:$0xff] }
  0x9c   :  { %9794 = vst [vmem:[#allocation121_spill] sm:$0xff] %v7887_v48  ;;  %9796 = vst [vmem:[#allocation123_spill] sm:$0xff] %v7895_v39  ;;  %v399_v22 = vsub.f32 %v7573_v4, %v9798_v2  ;;  %v807_v40 = vsub.f32 %v9788_v47, %v806_v52  ;;  %v814_v7 = vsub.f32 %v9789_v17, %v813_v33  ;;  %380 = vmatprep.mubr.f32.mxu1 %v379_v63  ;;  %v9802_v63 = vld [vmem:[#allocation30_spill] sm:$0xff] }
  0x9d   :  { %9799 = vst [vmem:[#allocation124_spill] sm:$0xff] %v7904_v13  ;;  %v9800_v20 = vand.u32 4294901760, %v7581_v42  ;;  %5983 = vmatpush1.bf16.msra.mxu1 %v5982_v6  ;;  %v5985_v23 = vpack.c.bf16 %v801_v11, %v794_v29  ;;  %1376 = vmatmul.mubr.f32.gmra.mrb[26].mxu0 %v7759_v3  ;;  %v7916_v1 = vsub.f32 %v7857_v26, %v7890_v35  ;;  %v820_v33 = vand.u32 4294901760, %v9802_v63  ;;  %v9804_v6 = vld [vmem:[#allocation78_spill] sm:$0xff]  ;;  %v7935_v35 = vld [vmem:[%s9315_s4 + $0x40] sm:$0xff] }
  0x9e   :  { %5984 = vmatprep.subr.bf16.mxu1 %v9660_v55  ;;  %v808_v47 = vand.u32 4294901760, %v807_v40  ;;  %1382 = vmatprep.mubr.f32.mxu0 %v7774_v16  ;;  %v400_v52 = vand.u32 4294901760, %v399_v22  ;;  %v9805_v17 = vand.u32 4294901760, %v7612_v51  ;;  %v815_v37 = vand.u32 4294901760, %v814_v7  ;;  %v7940_v40 = vld [vmem:[%s9315_s4 + $0x58] sm:$0xff] }
  0x9f   :  { %v408_v2 = vsub.f32 %v7581_v42, %v9800_v20  ;;  %9801 = vst [vmem:[#allocation125_spill] sm:$0xff] %v7916_v1  ;;  %v9803_v20 = vld [vmem:[#allocation31_spill] sm:$0xff]  ;;  %6100 = vmatpush1.bf16.msra.mxu0 %v9804_v6  ;;  %386 = vmatmul.mubr.f32.gmra.mrb[18].mxu1 %v385_v41  ;;  %v9511_v22 = vand.u32 4294901760, %v7699_v15  ;;  %v7949_v11 = vand.u32 4294901760, %v7921_v57  ;;  %v7957_v41 = vsub.f32 %v7866_v46, %v7895_v39 }
  0xa0   :  { %v827_v54 = vand.u32 4294901760, %v9803_v20  ;;  %v414_v29 = vsub.f32 %v7612_v51, %v9805_v17  ;;  %6101 = vmatprep.subr.bf16.mxu0 %v9660_v55  ;;  %v821_v17 = vsub.f32 %v9802_v63, %v820_v33  ;;  %395 = vmatprep.mubr.f32.mxu1 %v394_v14  ;;  %v9808_v51 = vand.u32 4294901760, %v7615_v58 }
  0xa1   :  { %9807 = vst [vmem:[#allocation31_spill] sm:$0xff] %v7949_v11  ;;  %v409_v27 = vand.u32 4294901760, %v408_v2  ;;  %5986 = vmatpush1.bf16.msra.mxu1 %v5985_v23  ;;  %v5988_v4 = vpack.c.bf16 %v815_v37, %v808_v47  ;;  %1385 = vmatmul.mubr.f32.gmra.mrb[28].mxu0 %v7847_v38  ;;  %v7963_v14 = vand.u32 4294901760, %v7935_v35  ;;  %v7971_v23 = vld [vmem:[%s9315_s4 + $0x50] sm:$0xff]  ;;  %v9812_v2 = vand.u32 4294901760, %v7624_v30  ;;  %v9813_v47 = vld [vmem:[#allocation35_spill] sm:$0xff] }
  0xa2   :  { %v7944_v6 = vpack.c.bf16 %v827_v54, %v820_v33  ;;  %v828_v7 = vsub.f32 %v9803_v20, %v827_v54  ;;  %v423_v42 = vsub.f32 %v7615_v58, %v9808_v51  ;;  %5987 = vmatprep.subr.bf16.mxu1 %v9660_v55  ;;  %v822_v63 = vand.u32 4294901760, %v821_v17  ;;  %v9809_v20 = vld [vmem:[#allocation33_spill] sm:$0xff]  ;;  %1391 = vmatprep.mubr.f32.mxu0 %v7768_v36 }
  0xa3   :  { %v834_v54 = vand.u32 4294901760, %v9809_v20  ;;  %9810 = vst [vmem:[#allocation33_spill] sm:$0xff] %v7963_v14  ;;  %v7966_v51 = vand.u32 4294901760, %v7940_v40  ;;  %6103 = vmatpush1.bf16.msra.mxu0 %v7475_v45  ;;  %v429_v37 = vsub.f32 %v7624_v30, %v9812_v2  ;;  %v841_v17 = vand.u32 4294901760, %v9813_v47  ;;  %401 = vmatmul.mubr.f32.gmra.mrb[20].mxu1 %v400_v52 }
  0xa4   :  { %9806 = vst [vmem:[#allocation30_spill] sm:$0xff] %v7944_v6  ;;  %v829_v33 = vand.u32 4294901760, %v828_v7  ;;  %6104 = vmatprep.subr.bf16.mxu0 %v9660_v55  ;;  %v415_v7 = vand.u32 4294901760, %v414_v29  ;;  %v438_v39 = vsub.f32 %v7699_v15, %v9511_v22  ;;  %v9515_v58 = vand.u32 4294901760, %v7759_v3  ;;  %410 = vmatprep.mubr.f32.mxu1 %v409_v27 }
  0xa5   :  { %9811 = vst [vmem:[#allocation126_spill] sm:$0xff] %v7966_v51  ;;  %v835_v6 = vsub.f32 %v9809_v20, %v834_v54  ;;  %v424_v45 = vand.u32 4294901760, %v423_v42  ;;  %5989 = vmatpush1.bf16.msra.mxu1 %v5988_v4  ;;  %v842_v30 = vsub.f32 %v9813_v47, %v841_v17  ;;  %1394 = vmatmul.mubr.f32.gmra.mrb[30].mxu0 %v7778_v12  ;;  %v7992_v29 = vand.u32 4294901760, %v7971_v23 }
  0xa6   :  { %v5991_v2 = vpack.c.bf16 %v829_v33, %v822_v63  ;;  %v7989_v52 = vsub.f32 %v7921_v57, %v7949_v11  ;;  %5990 = vmatprep.subr.bf16.mxu1 %v9660_v55  ;;  %v7995_v20 = vpack.c.bf16 %v841_v17, %v834_v54  ;;  %1400 = vmatprep.mubr.f32.mxu0 %v7792_v19  ;;  %v430_v27 = vand.u32 4294901760, %v429_v37  ;;  %v9816_v33 = vld [vmem:[#allocation38_spill] sm:$0xff]  ;;  %v9817_v17 = vld [vmem:[#allocation39_spill] sm:$0xff] }
  0xa7   :  { %9814 = vst [vmem:[#allocation35_spill] sm:$0xff] %v7992_v29  ;;  %v836_v42 = vand.u32 4294901760, %v835_v6  ;;  %v8000_v4 = vmul.f32 %v7659_v0, %v7659_v0  ;;  %6106 = vmatpush1.bf16.msra.mxu0 %v7523_v61  ;;  %v843_v63 = vand.u32 4294901760, %v842_v30  ;;  %v848_v47 = vand.u32 4294901760, %v9816_v33  ;;  %416 = vmatmul.mubr.f32.gmra.mrb[22].mxu1 %v415_v7 }
  0xa8   :  { %9815 = vst [vmem:[#allocation127_spill] sm:$0xff] %v7995_v20  ;;  %6107 = vmatprep.subr.bf16.mxu0 %v9660_v55  ;;  %v439_v22 = vand.u32 4294901760, %v438_v39  ;;  %v444_v6 = vsub.f32 %v7759_v3, %v9515_v58  ;;  %v855_v59 = vand.u32 4294901760, %v9817_v17  ;;  %425 = vmatprep.mubr.f32.mxu1 %v424_v45  ;;  %v9818_v11 = vand.u32 4294901760, %v7774_v16 }
  0xa9   :  { %5992 = vmatpush1.bf16.msra.mxu1 %v5991_v2  ;;  %v5994_v61 = vpack.c.bf16 %v843_v63, %v836_v42  ;;  %v849_v7 = vsub.f32 %v9816_v33, %v848_v47  ;;  %1403 = vmatmul.mubr.f32.gmra.mrb[32].mxu0 %v7883_v34  ;;  %v8018_v39 = vsub.f32 %v7935_v35, %v7963_v14  ;;  %v9820_v33 = vld [vmem:[#allocation43_spill] sm:$0xff]  ;;  %v9821_v14 = vand.u32 4294901760, %v7847_v38 }
  0xaa   :  { %v453_v37 = vsub.f32 %v7774_v16, %v9818_v11  ;;  %v8022_v58 = vsub.f32 %v7940_v40, %v7966_v51  ;;  %5993 = vmatprep.subr.bf16.mxu1 %v9660_v55  ;;  %v856_v45 = vsub.f32 %v9817_v17, %v855_v59  ;;  %v9819_v11 = vld [vmem:[#allocation42_spill] sm:$0xff]  ;;  %1409 = vmatprep.mubr.f32.mxu0 %v7887_v48  ;;  %v869_v54 = vand.u32 4294901760, %v9820_v33 }
  0xab   :  { %v9523_v30 = vand.u32 4294901760, %v9819_v11  ;;  %v8030_v2 = vmul.f32 %v7669_v21, %v7669_v21  ;;  %v850_v63 = vand.u32 4294901760, %v849_v7  ;;  %431 = vmatmul.mubr.f32.gmra.mrb[24].mxu1 %v430_v27  ;;  %v445_v51 = vand.u32 4294901760, %v444_v6 }
  0xac   :  { %v459_v16 = vsub.f32 %v7847_v38, %v9821_v14  ;;  %v857_v17 = vand.u32 4294901760, %v856_v45  ;;  %440 = vmatprep.mubr.f32.mxu1 %v439_v22  ;;  %v454_v15 = vand.u32 4294901760, %v453_v37  ;;  %v9822_v20 = vand.u32 4294901760, %v7768_v36 }
  0xad   :  { %v863_v3 = vsub.f32 %v9819_v11, %v9523_v30  ;;  %5995 = vmatpush1.bf16.msra.mxu1 %v5994_v61  ;;  %v870_v27 = vsub.f32 %v9820_v33, %v869_v54  ;;  %1412 = vmatmul.mubr.f32.gmra.mrb[34].mxu0 %v7904_v13  ;;  %v8048_v14 = vmul.f32 %v7708_v43, %v7708_v43  ;;  %v9824_v61 = vand.u32 4294901760, %v7778_v12 }
  0xae   :  { %v468_v42 = vsub.f32 %v7768_v36, %v9822_v20  ;;  %5996 = vmatprep.subr.bf16.mxu1 %v9660_v55  ;;  %v5997_v6 = vpack.c.bf16 %v857_v17, %v850_v63  ;;  %v8051_v22 = vpack.c.bf16 %v855_v59, %v848_v47  ;;  %1418 = vmatprep.mubr.f32.mxu0 %v7916_v1  ;;  %v460_v7 = vand.u32 4294901760, %v459_v16  ;;  %v9825_v59 = vld [vmem:[#allocation46_spill] sm:$0xff]  ;;  %v9832_v63 = vld [vmem:[#allocation51_spill] sm:$0xff] }
  0xaf   :  { %v864_v37 = vand.u32 4294901760, %v863_v3  ;;  %v8056_v20 = vsub.f32 %v7971_v23, %v7992_v29  ;;  %v474_v45 = vsub.f32 %v7778_v12, %v9824_v61  ;;  %v871_v30 = vand.u32 4294901760, %v870_v27  ;;  %446 = vmatmul.mubr.f32.gmra.mrb[26].mxu1 %v445_v51  ;;  %v9826_v3 = vld [vmem:[#allocation47_spill] sm:$0xff] }
  0xb0   :  { %9823 = vst [vmem:[#allocation38_spill] sm:$0xff] %v8051_v22  ;;  %v9530_v47 = vand.u32 4294901760, %v9825_v59  ;;  %v9532_v17 = vand.u32 4294901760, %v9826_v3  ;;  %v8066_v36 = vand.u32 4294901760, %v8000_v4  ;;  %455 = vmatprep.mubr.f32.mxu1 %v454_v15  ;;  %v469_v29 = vand.u32 4294901760, %v468_v42 }
  0xb1   :  { %v9828_v38 = vand.u32 4294901760, %v7792_v19  ;;  %5998 = vmatpush1.bf16.msra.mxu1 %v5997_v6  ;;  %v6000_v33 = vpack.c.bf16 %v871_v30, %v864_v37  ;;  %1421 = vmatmul.mubr.f32.gmra.mrb[36].mxu0 %v7957_v41  ;;  %v8073_v16 = vand.u32 4294901760, %v8030_v2  ;;  %v8077_v51 = vmul.f32 %v7783_v10, %v7783_v10  ;;  %v9831_v6 = vld [vmem:[#allocation49_spill] sm:$0xff] }
  0xb2   :  { %9827 = vst [vmem:[#allocation39_spill] sm:$0xff] %v8066_v36  ;;  %5999 = vmatprep.subr.bf16.mxu1 %v9660_v55  ;;  %v877_v15 = vsub.f32 %v9825_v59, %v9530_v47  ;;  %1427 = vmatprep.mubr.f32.mxu0 %v7989_v52  ;;  %v475_v30 = vand.u32 4294901760, %v474_v45  ;;  %v9830_v42 = vand.u32 4294901760, %v7883_v34  ;;  %v9534_v37 = vand.u32 4294901760, %v9831_v6 }
  0xb3   :  { %v483_v61 = vsub.f32 %v7792_v19, %v9828_v38  ;;  %9829 = vst [vmem:[#allocation42_spill] sm:$0xff] %v8073_v16  ;;  %v884_v38 = vsub.f32 %v9826_v3, %v9532_v17  ;;  %v9533_v19 = vand.u32 4294901760, %v9832_v63  ;;  %461 = vmatmul.mubr.f32.gmra.mrb[28].mxu1 %v460_v7  ;;  %v9833_v12 = vand.u32 4294901760, %v7887_v48 }
  0xb4   :  { %v489_v27 = vsub.f32 %v7883_v34, %v9830_v42  ;;  %v878_v56 = vand.u32 4294901760, %v877_v15  ;;  %470 = vmatprep.mubr.f32.mxu1 %v469_v29  ;;  %v891_v42 = vsub.f32 %v9831_v6, %v9534_v37  ;;  %v131_v29 = vmul.f32 %v7812_v44, %v7812_v44 }
  0xb5   :  { %v498_v47 = vsub.f32 %v7887_v48, %v9833_v12  ;;  %v885_v17 = vand.u32 4294901760, %v884_v38  ;;  %v484_v18 = vand.u32 4294901760, %v483_v61  ;;  %6001 = vmatpush1.bf16.msra.mxu1 %v6000_v33  ;;  %v898_v7 = vsub.f32 %v9832_v63, %v9533_v19  ;;  %1430 = vmatmul.mubr.f32.gmra.mrb[38].mxu0 %v8018_v39 }
  0xb6   :  { %v8105_v12 = vand.u32 4294901760, %v8048_v14  ;;  %6002 = vmatprep.subr.bf16.mxu1 %v9660_v55  ;;  %v9835_v33 = vand.u32 4294901760, %v9819_v11  ;;  %1436 = vmatprep.mubr.f32.mxu0 %v8022_v58  ;;  %v8117_v38 = vsub.f32 %v8000_v4, %v8066_v36  ;;  %v490_v19 = vand.u32 4294901760, %v489_v27  ;;  %v9837_v11 = vld [vmem:[#allocation54_spill] sm:$0xff] }
  0xb7   :  { %v6003_v61 = vpack.c.bf16 %v885_v17, %v878_v56  ;;  %v892_v37 = vand.u32 4294901760, %v891_v42  ;;  %v899_v45 = vand.u32 4294901760, %v898_v7  ;;  %476 = vmatmul.mubr.f32.gmra.mrb[30].mxu1 %v475_v30  ;;  %v499_v22 = vand.u32 4294901760, %v498_v47  ;;  %v9839_v42 = vld [vmem:[#allocation55_spill] sm:$0xff] }
  0xb8   :  { %9834 = vst [vmem:[#allocation43_spill] sm:$0xff] %v8105_v12  ;;  %v8112_v15 = vpack.c.bf16 %v869_v54, %v9835_v33  ;;  %v9836_v48 = vand.u32 4294901760, %v7904_v13  ;;  %v9546_v56 = vand.u32 4294901760, %v7957_v41  ;;  %v9537_v54 = vand.u32 4294901760, %v9837_v11  ;;  %485 = vmatprep.mubr.f32.mxu1 %v484_v18 }
  0xb9   :  { %v9838_v17 = vand.u32 4294901760, %v7916_v1  ;;  %6004 = vmatpush1.bf16.msra.mxu1 %v6003_v61  ;;  %v6006_v27 = vpack.c.bf16 %v899_v45, %v892_v37  ;;  %v9547_v30 = vand.u32 4294901760, %v9839_v42  ;;  %1439 = vmatmul.mubr.f32.gmra.mrb[40].mxu0 %v8056_v20  ;;  %v8135_v47 = vand.u32 4294901760, %v8077_v51 }
  0xba   :  { %v504_v34 = vsub.f32 %v7904_v13, %v9836_v48  ;;  %v8132_v48 = vsub.f32 %v8030_v2, %v8073_v16  ;;  %v130_v18 = vmul.f32 %v7821_v5, %v7821_v5  ;;  %6005 = vmatprep.subr.bf16.mxu1 %v9660_v55  ;;  %v905_v37 = vsub.f32 %v9837_v11, %v9537_v54 }
  0xbb   :  { %v513_v33 = vsub.f32 %v7916_v1, %v9838_v17  ;;  %1445 = vmatprep.mubr.f32.mxu0 %v8117_v38  ;;  %v8146_v45 = vsub.f32 %v8048_v14, %v8105_v12  ;;  %v8148_v2 = vand.u32 4294901760, %v131_v29  ;;  %v133_v7 = vmul.f32 %v7857_v26, %v7857_v26  ;;  %491 = vmatmul.mubr.f32.gmra.mrb[32].mxu1 %v490_v19 }
  0xbc   :  { %v912_v61 = vsub.f32 %v9839_v42, %v9547_v30  ;;  %v505_v17 = vand.u32 4294901760, %v504_v34  ;;  %v519_v54 = vsub.f32 %v7957_v41, %v9546_v56  ;;  %v9549_v4 = vand.u32 4294901760, %v8018_v39  ;;  %500 = vmatprep.mubr.f32.mxu1 %v499_v22 }
  0xbd   :  { %9840 = vst [vmem:[#allocation46_spill] sm:$0xff] %v8148_v2  ;;  %v906_v16 = vand.u32 4294901760, %v905_v37  ;;  %v514_v14 = vand.u32 4294901760, %v513_v33  ;;  %v9841_v12 = vand.u32 4294901760, %v7989_v52  ;;  %v9548_v1 = vand.u32 4294901760, %v8022_v58  ;;  %6007 = vmatpush1.bf16.msra.mxu1 %v6006_v27  ;;  %1448 = vmatmul.mubr.f32.gmra.mrb[42].mxu0 %v8132_v48 }
  0xbe   :  { %v913_v13 = vand.u32 4294901760, %v912_v61  ;;  %v8166_v19 = vsub.f32 %v8077_v51, %v8135_v47  ;;  %v8168_v34 = vand.u32 4294901760, %v130_v18  ;;  %v132_v22 = vmul.f32 %v7866_v46, %v7866_v46  ;;  %6008 = vmatprep.subr.bf16.mxu1 %v9660_v55  ;;  %1454 = vmatprep.mubr.f32.mxu0 %v8146_v45 }
  0xbf   :  { %v528_v36 = vsub.f32 %v7989_v52, %v9841_v12  ;;  %v9843_v33 = vand.u32 4294901760, %v9825_v59  ;;  %v9844_v12 = vand.u32 4294901760, %v9826_v3  ;;  %v8181_v27 = vsub.f32 %v131_v29, %v8148_v2  ;;  %506 = vmatmul.mubr.f32.gmra.mrb[34].mxu1 %v505_v17 }
  0xc0   :  { %9842 = vst [vmem:[#allocation47_spill] sm:$0xff] %v8168_v34  ;;  %v8183_v51 = vand.u32 4294901760, %v133_v7  ;;  %v135_v61 = vmul.f32 %v7921_v57, %v7921_v57  ;;  %v6009_v56 = vpack.c.bf16 %v913_v13, %v906_v16  ;;  %v520_v30 = vand.u32 4294901760, %v519_v54  ;;  %515 = vmatprep.mubr.f32.mxu1 %v514_v14 }
  0xc1   :  { %v8177_v37 = vpack.c.bf16 %v9844_v12, %v9843_v33  ;;  %v534_v59 = vsub.f32 %v8018_v39, %v9549_v4  ;;  %v9556_v3 = vand.u32 4294901760, %v8056_v20  ;;  %v529_v33 = vand.u32 4294901760, %v528_v36  ;;  %1457 = vmatmul.mubr.f32.gmra.mrb[44].mxu0 %v8166_v19 }
  0xc2   :  { %9845 = vst [vmem:[#allocation49_spill] sm:$0xff] %v8183_v51  ;;  %v543_v29 = vsub.f32 %v8022_v58, %v9548_v1  ;;  %v9557_v12 = vand.u32 4294901760, %v8117_v38  ;;  %6010 = vmatpush1.bf16.msra.mxu1 %v6009_v56  ;;  %v8197_v13 = vsub.f32 %v130_v18, %v8168_v34  ;;  %v8199_v16 = vand.u32 4294901760, %v132_v22  ;;  %1463 = vmatprep.mubr.f32.mxu0 %v8181_v27 }
  0xc3   :  { %v134_v54 = vmul.f32 %v7935_v35, %v7935_v35  ;;  %6335 = vmatprep.subr.bf16.mxu1 %v9660_v55  ;;  %v8206_v36 = vsub.f32 %v133_v7, %v8183_v51  ;;  %v8208_v17 = vand.u32 4294901760, %v135_v61  ;;  %v137_v56 = vmul.f32 %v7940_v40, %v7940_v40  ;;  %521 = vmatmul.mubr.f32.gmra.mrb[36].mxu1 %v520_v30 }
  0xc4   :  { %9846 = vst [vmem:[#allocation51_spill] sm:$0xff] %v8199_v16  ;;  %v535_v18 = vand.u32 4294901760, %v534_v59  ;;  %v549_v14 = vsub.f32 %v8056_v20, %v9556_v3  ;;  %v9562_v1 = vand.u32 4294901760, %v8132_v48  ;;  %530 = vmatprep.mubr.f32.mxu1 %v529_v33  ;;  %v544_v4 = vand.u32 4294901760, %v543_v29 }
  0xc5   :  { %9847 = vst [vmem:[#allocation54_spill] sm:$0xff] %v8208_v17  ;;  %v558_v7 = vsub.f32 %v8117_v38, %v9557_v12  ;;  %v9565_v51 = vand.u32 4294901760, %v8146_v45  ;;  %v9848_v34 = vand.u32 4294901760, %v9831_v6  ;;  %v9849_v2 = vand.u32 4294901760, %v9832_v63  ;;  %1466 = vmatmul.mubr.f32.gmra.mrb[46].mxu0 %v8197_v13 }
  0xc6   :  { %v8228_v59 = vsub.f32 %v132_v22, %v8199_v16  ;;  %v8230_v3 = vand.u32 4294901760, %v134_v54  ;;  %v136_v33 = vmul.f32 %v7971_v23, %v7971_v23  ;;  %1472 = vmatprep.mubr.f32.mxu0 %v8206_v36  ;;  %v8236_v29 = vsub.f32 %v135_v61, %v8208_v17 }
  0xc7   :  { %v8224_v30 = vpack.c.bf16 %v9849_v2, %v9848_v34  ;;  %v8238_v6 = vand.u32 4294901760, %v137_v56  ;;  %536 = vmatmul.mubr.f32.gmra.mrb[38].mxu1 %v535_v18  ;;  %v550_v63 = vand.u32 4294901760, %v549_v14  ;;  %v564_v2 = vsub.f32 %v8132_v48, %v9562_v1 }
  0xc8   :  { %v9563_v34 = vand.u32 4294901760, %v8166_v19  ;;  %545 = vmatprep.mubr.f32.mxu1 %v544_v4  ;;  %v559_v22 = vand.u32 4294901760, %v558_v7  ;;  %v573_v12 = vsub.f32 %v8146_v45, %v9565_v51  ;;  %v9564_v16 = vand.u32 4294901760, %v8181_v27 }
  0xc9   :  { %v9850_v61 = vand.u32 4294901760, %v9837_v11  ;;  %v9851_v17 = vand.u32 4294901760, %v9839_v42  ;;  %1475 = vmatmul.mubr.f32.gmra.mrb[48].mxu0 %v8228_v59  ;;  %v8256_v14 = vsub.f32 %v134_v54, %v8230_v3  ;;  %v8258_v1 = vand.u32 4294901760, %v136_v33 }
  0xca   :  { %1481 = vmatprep.mubr.f32.mxu0 %v8236_v29  ;;  %v8262_v4 = vsub.f32 %v137_v56, %v8238_v6  ;;  %v565_v7 = vand.u32 4294901760, %v564_v2  ;;  %v579_v11 = vsub.f32 %v8166_v19, %v9563_v34  ;;  %v9566_v42 = vand.u32 4294901760, %v8197_v13 }
  0xcb   :  { %v8252_v18 = vpack.c.bf16 %v9851_v17, %v9850_v61  ;;  %551 = vmatmul.mubr.f32.gmra.mrb[40].mxu1 %v550_v63  ;;  %v9567_v17 = vand.u32 4294901760, %v8206_v36  ;;  %v574_v54 = vand.u32 4294901760, %v573_v12  ;;  %v588_v61 = vsub.f32 %v8181_v27, %v9564_v16 }
  0xcc   :  { %560 = vmatprep.mubr.f32.mxu1 %v559_v22  ;;  %v139_v56 = vmul.f32 %v7857_v26, %v7659_v0  ;;  %v8276_v63 = vsub.f32 %v136_v33, %v8258_v1  ;;  %v9569_v2 = vand.u32 4294901760, %v8228_v59  ;;  %v9568_v34 = vand.u32 4294901760, %v8236_v29 }
  0xcd   :  { %1484 = vmatmul.mubr.f32.gmra.mrb[50].mxu0 %v8256_v14  ;;  %v580_v12 = vand.u32 4294901760, %v579_v11  ;;  %v594_v22 = vsub.f32 %v8197_v13, %v9566_v42  ;;  %v603_v0 = vsub.f32 %v8206_v36, %v9567_v17  ;;  %v138_v26 = vmul.f32 %v7866_v46, %v7669_v21 }
  0xce   :  { %1490 = vmatprep.mubr.f32.mxu0 %v8262_v4  ;;  %v589_v33 = vand.u32 4294901760, %v588_v61  ;;  %v8289_v16 = vand.u32 4294901760, %v139_v56  ;;  %v141_v51 = vmul.f32 %v7921_v57, %v7708_v43  ;;  %v609_v42 = vsub.f32 %v8228_v59, %v9569_v2  ;;  %v9854_v2 = vld [vmem:[#allocation65_spill] sm:$0xff] }
  0xcf   :  { %566 = vmatmul.mubr.f32.gmra.mrb[42].mxu1 %v565_v7  ;;  %v9852_v7 = vld [vmem:[#allocation16_spill] sm:$0xff]  ;;  %v618_v21 = vsub.f32 %v8236_v29, %v9568_v34  ;;  %v9578_v46 = vand.u32 4294901760, %v8256_v14  ;;  %v604_v61 = vand.u32 4294901760, %v603_v0  ;;  %v8303_v17 = vand.u32 4294901760, %v138_v26  ;;  %v9857_v0 = vld [vmem:[#allocation74_spill] sm:$0xff] }
  0xd0   :  { %575 = vmatprep.mubr.f32.mxu1 %v574_v54  ;;  %v9853_v11 = vand.u32 4294901760, %v9852_v7  ;;  %v595_v54 = vand.u32 4294901760, %v594_v22  ;;  %v140_v43 = vmul.f32 %v7935_v35, %v7783_v10  ;;  %v9577_v57 = vand.u32 4294901760, %v8262_v4 }
  0xd1   :  { %1493 = vmatmul.mubr.f32.gmra.mrb[52].mxu0 %v8276_v63  ;;  %v8309_v7 = vsub.f32 %v139_v56, %v8289_v16  ;;  %v143_v34 = vmul.f32 %v7940_v40, %v7812_v44  ;;  %v9856_v22 = vand.u32 4294901760, %v7318_v32  ;;  %v610_v10 = vand.u32 4294901760, %v609_v42 }
  0xd2   :  { %1624 = vmatprep.mubr.f32.mxu0 %v9853_v11  ;;  %v8311_v11 = vand.u32 4294901760, %v141_v51  ;;  %v619_v35 = vand.u32 4294901760, %v618_v21  ;;  %v624_v56 = vsub.f32 %v8256_v14, %v9578_v46  ;;  %v8326_v44 = vsub.f32 %v138_v26, %v8303_v17 }
  0xd3   :  { %581 = vmatmul.mubr.f32.gmra.mrb[44].mxu1 %v580_v12  ;;  %v9855_v12 = vand.u32 4294901760, %v9854_v2  ;;  %v8328_v40 = vand.u32 4294901760, %v140_v43  ;;  %v142_v32 = vmul.f32 %v7971_v23, %v7821_v5  ;;  %v633_v42 = vsub.f32 %v8262_v4, %v9577_v57 }
  0xd4   :  { %590 = vmatprep.mubr.f32.mxu1 %v589_v33  ;;  %v9576_v33 = vand.u32 4294901760, %v8276_v63  ;;  %v9575_v2 = vand.u32 4294901760, %v8309_v7  ;;  %v8337_v21 = vsub.f32 %v141_v51, %v8311_v11  ;;  %v9858_v26 = vand.u32 4294901760, %v7322_v25 }
  0xd5   :  { %1628 = vmatmul.mubr.f32.vlgmr.msra.gmra.mrb[0].mxu0 %v9855_v12  ;;  %v9859_v12 = vand.u32 4294901760, %v7326_v9  ;;  %v625_v5 = vand.u32 4294901760, %v624_v56  ;;  %v9574_v51 = vand.u32 4294901760, %v8326_v44  ;;  %v8354_v25 = vand.u32 4294901760, %v142_v32 }
  0xd6   :  { %1635 = vmatprep.mubr.f32.mxu0 %v9856_v22  ;;  %6109 = vmatpush1.bf16.msra.mxu0 %v9857_v0  ;;  %v9860_v22 = vld [vmem:[#allocation79_spill] sm:$0xff]  ;;  %v639_v23 = vsub.f32 %v8276_v63, %v9576_v33  ;;  %v634_v9 = vand.u32 4294901760, %v633_v42  ;;  %v648_v0 = vsub.f32 %v8309_v7, %v9575_v2  ;;  %v9573_v56 = vand.u32 4294901760, %v8337_v21  ;;  %v9954_v33 = vld [vmem:[#allocation124_spill] sm:$0xff] }
  0xd7   :  { %6110 = vmatprep.subr.bf16.mxu0 %v9660_v55  ;;  %596 = vmatmul.mubr.f32.gmra.mrb[46].mxu1 %v595_v54  ;;  %v8339_v54 = vand.u32 4294901760, %v143_v34  ;;  %9861 = vst [vmem:[#allocation55_spill] sm:$0xff] %v8354_v25  ;;  %v654_v42 = vsub.f32 %v8326_v44, %v9574_v51  ;;  %v9940_v51 = vld [vmem:[#allocation116_spill] sm:$0xff]  ;;  %v9947_v2 = vld [vmem:[#allocation27_spill] sm:$0xff]  ;;  %v9955_v57 = vand.u32 4294901760, %v9954_v33 }
  0xd8   :  { %605 = vmatprep.mubr.f32.mxu1 %v604_v61  ;;  %v8352_v61 = vsub.f32 %v140_v43, %v8328_v40  ;;  %v9864_v43 = vld [vmem:[#allocation87_spill] sm:$0xff]  ;;  %v9964_v33 = vld [vmem:[#allocation100_spill] sm:$0xff] }
  0xd9   :  { %1639 = vmatmul.mubr.f32.gmra.mrb[2].mxu0 %v9858_v26  ;;  %v9862_v26 = vand.u32 4294901760, %v7361_v8  ;;  %v649_v8 = vand.u32 4294901760, %v648_v0 }
  0xda   :  { %1646 = vmatprep.mubr.f32.mxu0 %v9859_v12  ;;  %6112 = vmatpush1.bf16.msra.mxu0 %v9860_v22  ;;  %v9863_v12 = vand.u32 4294901760, %v7396_v62  ;;  %v9572_v22 = vand.u32 4294901760, %v8352_v61  ;;  %v663_v62 = vsub.f32 %v8337_v21, %v9573_v56  ;;  %v9933_v56 = vld [vmem:[#allocation119_spill] sm:$0xff] }
  0xdb   :  { %6113 = vmatprep.subr.bf16.mxu0 %v9660_v55  ;;  %611 = vmatmul.mubr.f32.gmra.mrb[48].mxu1 %v610_v10  ;;  %v8361_v10 = vsub.f32 %v143_v34, %v8339_v54  ;;  %v8374_v34 = vsub.f32 %v142_v32, %v8354_v25  ;;  %v655_v32 = vand.u32 4294901760, %v654_v42 }
  0xdc   :  { %620 = vmatprep.mubr.f32.mxu1 %v619_v35  ;;  %v640_v35 = vand.u32 4294901760, %v639_v23  ;;  %v9866_v23 = vand.u32 4294901760, %v7409_v31  ;;  %v9867_v31 = vand.u32 4294901760, %v7417_v24  ;;  %v9870_v24 = vld [vmem:[#allocation83_spill] sm:$0xff] }
  0xdd   :  { %1650 = vmatmul.mubr.f32.gmra.mrb[4].mxu0 %v9862_v26  ;;  %v9571_v26 = vand.u32 4294901760, %v8361_v10  ;;  %v9570_v0 = vand.u32 4294901760, %v8374_v34 }
  0xde   :  { %1657 = vmatprep.mubr.f32.mxu0 %v9863_v12  ;;  %6115 = vmatpush1.bf16.msra.mxu0 %v9864_v43  ;;  %v664_v12 = vand.u32 4294901760, %v663_v62  ;;  %v9871_v62 = vand.u32 4294901760, %v9870_v24  ;;  %v9886_v24 = vld [vmem:[#allocation8_spill] sm:$0xff] }
  0xdf   :  { %6116 = vmatprep.subr.bf16.mxu0 %v9660_v55  ;;  %626 = vmatmul.mubr.f32.gmra.mrb[50].mxu1 %v625_v5  ;;  %v9865_v5 = vand.u32 4294901760, %v7404_v50  ;;  %v678_v50 = vsub.f32 %v8361_v10, %v9571_v26  ;;  %v9919_v26 = vld [vmem:[#allocation107_spill] sm:$0xff] }
  0xe0   :  { %635 = vmatprep.mubr.f32.mxu1 %v634_v9  ;;  %v669_v9 = vsub.f32 %v8352_v61, %v9572_v22  ;;  %v9926_v22 = vld [vmem:[#allocation18_spill] sm:$0xff] }
  0xe1   :  { %1661 = vmatmul.mubr.f32.gmra.mrb[6].mxu0 %v9865_v5  ;;  %v679_v42 = vand.u32 4294901760, %v678_v50  ;;  %v9873_v5 = vld [vmem:[#allocation84_spill] sm:$0xff] }
  0xe2   :  { %1668 = vmatprep.mubr.f32.mxu0 %v9866_v23  ;;  %6118 = vmatpush1.bf16.msra.mxu0 %v7514_v28  ;;  %v9868_v28 = vand.u32 4294901760, %v7437_v53  ;;  %v670_v43 = vand.u32 4294901760, %v669_v9  ;;  %v9872_v53 = vld [vmem:[#allocation109_spill] sm:$0xff]  ;;  %v9874_v23 = vand.u32 4294901760, %v9873_v5  ;;  %v9879_v50 = vld [vmem:[#allocation88_spill] sm:$0xff] }
  0xe3   :  { %6119 = vmatprep.subr.bf16.mxu0 %v9660_v55  ;;  %641 = vmatmul.mubr.f32.gmra.mrb[52].mxu1 %v640_v35  ;;  %v684_v35 = vsub.f32 %v8374_v34, %v9570_v0  ;;  %v9918_v0 = vld [vmem:[#allocation12_spill] sm:$0xff] }
  0xe4   :  { %650 = vmatprep.mubr.f32.mxu1 %v649_v8  ;;  %v9869_v8 = vand.u32 4294901760, %v7441_v49  ;;  %v9878_v49 = vld [vmem:[#allocation14_spill] sm:$0xff] }
  0xe5   :  { %1672 = vmatmul.mubr.f32.gmra.mrb[8].mxu0 %v9867_v31  ;;  %v9880_v31 = vand.u32 4294901760, %v9879_v50  ;;  %v9895_v50 = vld [vmem:[#allocation98_spill] sm:$0xff] }
  0xe6   :  { %1679 = vmatprep.mubr.f32.mxu0 %v9868_v28  ;;  %6121 = vmatpush1.bf16.msra.mxu0 %v7598_v60  ;;  %v685_v60 = vand.u32 4294901760, %v684_v35  ;;  %v9881_v28 = vld [vmem:[#allocation92_spill] sm:$0xff]  ;;  %v9883_v35 = vld [vmem:[#allocation21_spill] sm:$0xff] }
  0xe7   :  { %6122 = vmatprep.subr.bf16.mxu0 %v9660_v55  ;;  %656 = vmatmul.mubr.f32.gmra.mrb[54].mxu1 %v655_v32  ;;  %v9875_v32 = vld [vmem:[#allocation85_spill] sm:$0xff] }
  0xe8   :  { %665 = vmatprep.mubr.f32.mxu1 %v664_v12  ;;  %v9876_v9 = vand.u32 4294901760, %v9875_v32  ;;  %v9877_v12 = vld [vmem:[#allocation15_spill] sm:$0xff] }
  0xe9   :  { %1683 = vmatmul.mubr.f32.gmra.mrb[10].mxu0 %v9869_v8  ;;  %v9885_v8 = vld [vmem:[#allocation58_spill] sm:$0xff]  ;;  %v9892_v32 = vld [vmem:[#allocation59_spill] sm:$0xff] }
  0xea   :  { %1690 = vmatprep.mubr.f32.mxu0 %v9871_v62  ;;  %6124 = vmatpush1.bf16.msra.mxu0 %v9872_v53  ;;  %v9887_v62 = vld [vmem:[#allocation93_spill] sm:$0xff] }
  0xeb   :  { %6125 = vmatprep.subr.bf16.mxu0 %v9660_v55  ;;  %671 = vmatmul.mubr.f32.gmra.mrb[56].mxu1 %v670_v43  ;;  %v9882_v43 = vand.u32 4294901760, %v9881_v28  ;;  %v9888_v53 = vand.u32 4294901760, %v9887_v62  ;;  %v9897_v28 = vld [vmem:[#allocation101_spill] sm:$0xff]  ;;  %v9901_v62 = vld [vmem:[#allocation66_spill] sm:$0xff] }
  0xec   :  { %680 = vmatprep.mubr.f32.mxu1 %v679_v42  ;;  %v9884_v42 = vld [vmem:[#allocation57_spill] sm:$0xff] }
  0xed   :  { %1694 = vmatmul.mubr.f32.gmra.mrb[12].mxu0 %v9874_v23  ;;  %v9891_v23 = vld [vmem:[#allocation26_spill] sm:$0xff] }
  0xee   :  { %1701 = vmatprep.mubr.f32.mxu0 %v9876_v9  ;;  %6127 = vmatpush1.bf16.msra.mxu0 %v9877_v12  ;;  %v9893_v9 = vld [vmem:[#allocation60_spill] sm:$0xff]  ;;  %v9894_v12 = vld [vmem:[#allocation9_spill] sm:$0xff] }
  0xef   :  { %6128 = vmatprep.subr.bf16.mxu0 %v9660_v55  ;;  %686 = vmatmul.mubr.f32.gmra.mrb[58].mxu1 %v685_v60  ;;  %v9889_v60 = vld [vmem:[#allocation96_spill] sm:$0xff] }
  0xf0   :  { %916 = vmatprep.mubr.f32.mxu1 %v9878_v49  ;;  %v9890_v5 = vand.u32 4294901760, %v9889_v60  ;;  %v9903_v60 = vld [vmem:[#allocation102_spill] sm:$0xff] }
  0xf1   :  { %1705 = vmatmul.mubr.f32.gmra.mrb[14].mxu0 %v9880_v31  ;;  %v9896_v31 = vand.u32 4294901760, %v9895_v50  ;;  %v9907_v50 = vld [vmem:[#allocation127_spill] sm:$0xff] }
  0xf2   :  { %1712 = vmatprep.mubr.f32.mxu0 %v9882_v43  ;;  %6130 = vmatpush1.bf16.msra.mxu0 %v9883_v35  ;;  %v9898_v43 = vand.u32 4294901760, %v9897_v28  ;;  %v9899_v35 = vld [vmem:[#allocation30_spill] sm:$0xff]  ;;  %v9909_v28 = vld [vmem:[#allocation68_spill] sm:$0xff] }
  0xf3   :  { %6131 = vmatprep.subr.bf16.mxu0 %v9660_v55  ;;  %918 = vmatmul.mubr.f32.vlgmr.msra.gmra.mrb[0].mxu1 %v9884_v42 }
  0xf4   :  { %923 = vmatprep.mubr.f32.mxu1 %v9885_v8  ;;  %6351 = vmatpush1.bf16.msra.mxu1 %v9886_v24  ;;  %v9900_v24 = vld [vmem:[#allocation63_spill] sm:$0xff] }
  0xf5   :  { %1716 = vmatmul.mubr.f32.gmra.mrb[16].mxu0 %v9888_v53  ;;  %6336 = vmatprep.subr.bf16.mxu1 %v9660_v55  ;;  %v9902_v53 = vld [vmem:[#allocation10_spill] sm:$0xff] }
  0xf6   :  { %1723 = vmatprep.mubr.f32.mxu0 %v9890_v5  ;;  %6133 = vmatpush1.bf16.msra.mxu0 %v9891_v23  ;;  %v9904_v5 = vand.u32 4294901760, %v9903_v60  ;;  %v9905_v23 = vld [vmem:[#allocation103_spill] sm:$0xff]  ;;  %v9913_v60 = vld [vmem:[#allocation106_spill] sm:$0xff] }
  0xf7   :  { %6134 = vmatprep.subr.bf16.mxu0 %v9660_v55  ;;  %925 = vmatmul.mubr.f32.gmra.mrb[2].mxu1 %v9892_v32 }
  0xf8   :  { %930 = vmatprep.mubr.f32.mxu1 %v9893_v9  ;;  %6352 = vmatpush1.bf16.msra.mxu1 %v9894_v12  ;;  %v9906_v12 = vand.u32 4294901760, %v9905_v23  ;;  %v9915_v23 = vld [vmem:[#allocation38_spill] sm:$0xff] }
  0xf9   :  { %1727 = vmatmul.mubr.f32.gmra.mrb[18].mxu0 %v9896_v31  ;;  %6337 = vmatprep.subr.bf16.mxu1 %v9660_v55  ;;  %v9908_v31 = vld [vmem:[#allocation67_spill] sm:$0xff] }
  0xfa   :  { %1734 = vmatprep.mubr.f32.mxu0 %v9898_v43  ;;  %6136 = vmatpush1.bf16.msra.mxu0 %v9899_v35  ;;  %v9910_v43 = vld [vmem:[#allocation11_spill] sm:$0xff]  ;;  %v9911_v35 = vld [vmem:[#allocation105_spill] sm:$0xff] }
  0xfb   :  { %6137 = vmatprep.subr.bf16.mxu0 %v9660_v55  ;;  %932 = vmatmul.mubr.f32.gmra.mrb[4].mxu1 %v9900_v24 }
  0xfc   :  { %937 = vmatprep.mubr.f32.mxu1 %v9901_v62  ;;  %6353 = vmatpush1.bf16.msra.mxu1 %v9902_v53  ;;  %v9912_v53 = vand.u32 4294901760, %v9911_v35  ;;  %v9921_v35 = vld [vmem:[#allocation70_spill] sm:$0xff] }
  0xfd   :  { %1738 = vmatmul.mubr.f32.gmra.mrb[20].mxu0 %v9904_v5  ;;  %6338 = vmatprep.subr.bf16.mxu1 %v9660_v55  ;;  %v9914_v5 = vand.u32 4294901760, %v9913_v60  ;;  %v9923_v60 = vld [vmem:[#allocation73_spill] sm:$0xff] }
  0xfe   :  { %1745 = vmatprep.mubr.f32.mxu0 %v9906_v12  ;;  %6139 = vmatpush1.bf16.msra.mxu0 %v9907_v50  ;;  %v9916_v12 = vld [vmem:[#allocation69_spill] sm:$0xff]  ;;  %v9917_v50 = vld [vmem:[#allocation71_spill] sm:$0xff] }
  0xff   :  { %6140 = vmatprep.subr.bf16.mxu0 %v9660_v55  ;;  %939 = vmatmul.mubr.f32.gmra.mrb[6].mxu1 %v9908_v31 }
 0x100   :  { %944 = vmatprep.mubr.f32.mxu1 %v9909_v28  ;;  %6354 = vmatpush1.bf16.msra.mxu1 %v9910_v43  ;;  %v9920_v43 = vand.u32 4294901760, %v9919_v26  ;;  %v9928_v26 = vld [vmem:[#allocation115_spill] sm:$0xff] }
 0x101   :  { %1749 = vmatmul.mubr.f32.gmra.mrb[22].mxu0 %v9912_v53  ;;  %6339 = vmatprep.subr.bf16.mxu1 %v9660_v55  ;;  %v9922_v53 = vand.u32 4294901760, %v9921_v35  ;;  %v9931_v35 = vld [vmem:[#allocation77_spill] sm:$0xff] }
 0x102   :  { %1756 = vmatprep.mubr.f32.mxu0 %v9914_v5  ;;  %6142 = vmatpush1.bf16.msra.mxu0 %v9915_v23  ;;  %v9924_v5 = vld [vmem:[#allocation75_spill] sm:$0xff]  ;;  %v9925_v23 = vld [vmem:[#allocation17_spill] sm:$0xff] }
 0x103   :  { %6143 = vmatprep.subr.bf16.mxu0 %v9660_v55  ;;  %946 = vmatmul.mubr.f32.gmra.mrb[8].mxu1 %v9916_v12 }
 0x104   :  { %951 = vmatprep.mubr.f32.mxu1 %v9917_v50  ;;  %6355 = vmatpush1.bf16.msra.mxu1 %v9918_v0  ;;  %v9927_v0 = vand.u32 4294901760, %v9926_v22  ;;  %v9935_v22 = vld [vmem:[#allocation114_spill] sm:$0xff] }
 0x105   :  { %1760 = vmatmul.mubr.f32.gmra.mrb[24].mxu0 %v9920_v43  ;;  %6340 = vmatprep.subr.bf16.mxu1 %v9660_v55  ;;  %v9929_v43 = vand.u32 4294901760, %v9928_v26  ;;  %v9938_v26 = vld [vmem:[#allocation81_spill] sm:$0xff] }
 0x106   :  { %1767 = vmatprep.mubr.f32.mxu0 %v9922_v53  ;;  %6145 = vmatpush1.bf16.msra.mxu0 %v8112_v15  ;;  %v9930_v15 = vld [vmem:[#allocation76_spill] sm:$0xff]  ;;  %v9932_v53 = vld [vmem:[#allocation22_spill] sm:$0xff] }
 0x107   :  { %6146 = vmatprep.subr.bf16.mxu0 %v9660_v55  ;;  %953 = vmatmul.mubr.f32.gmra.mrb[10].mxu1 %v9923_v60 }
 0x108   :  { %958 = vmatprep.mubr.f32.mxu1 %v9924_v5  ;;  %6356 = vmatpush1.bf16.msra.mxu1 %v9925_v23  ;;  %v9934_v23 = vand.u32 4294901760, %v9933_v56  ;;  %v9942_v56 = vld [vmem:[#allocation117_spill] sm:$0xff] }
 0x109   :  { %1771 = vmatmul.mubr.f32.gmra.mrb[26].mxu0 %v9927_v0  ;;  %6341 = vmatprep.subr.bf16.mxu1 %v9660_v55  ;;  %v9936_v0 = vand.u32 4294901760, %v9935_v22  ;;  %v9945_v22 = vld [vmem:[#allocation89_spill] sm:$0xff] }
 0x10a   :  { %1778 = vmatprep.mubr.f32.mxu0 %v9929_v43  ;;  %6148 = vmatpush1.bf16.msra.mxu0 %v8177_v37  ;;  %v9937_v37 = vld [vmem:[#allocation80_spill] sm:$0xff]  ;;  %v9939_v43 = vld [vmem:[#allocation25_spill] sm:$0xff] }
 0x10b   :  { %6149 = vmatprep.subr.bf16.mxu0 %v9660_v55  ;;  %960 = vmatmul.mubr.f32.gmra.mrb[12].mxu1 %v9930_v15 }
 0x10c   :  { %965 = vmatprep.mubr.f32.mxu1 %v9931_v35  ;;  %6357 = vmatpush1.bf16.msra.mxu1 %v9932_v53  ;;  %v9941_v53 = vand.u32 4294901760, %v9940_v51  ;;  %v9949_v51 = vld [vmem:[#allocation121_spill] sm:$0xff] }
 0x10d   :  { %1782 = vmatmul.mubr.f32.gmra.mrb[28].mxu0 %v9934_v23  ;;  %6342 = vmatprep.subr.bf16.mxu1 %v9660_v55  ;;  %v9943_v23 = vand.u32 4294901760, %v9942_v56  ;;  %v9951_v56 = vld [vmem:[#allocation90_spill] sm:$0xff] }
 0x10e   :  { %1789 = vmatprep.mubr.f32.mxu0 %v9936_v0  ;;  %6151 = vmatpush1.bf16.msra.mxu0 %v8224_v30  ;;  %v9944_v30 = vld [vmem:[#allocation82_spill] sm:$0xff]  ;;  %v9946_v0 = vld [vmem:[#allocation29_spill] sm:$0xff] }
 0x10f   :  { %6152 = vmatprep.subr.bf16.mxu0 %v9660_v55  ;;  %967 = vmatmul.mubr.f32.gmra.mrb[14].mxu1 %v9937_v37 }
 0x110   :  { %972 = vmatprep.mubr.f32.mxu1 %v9938_v26  ;;  %6358 = vmatpush1.bf16.msra.mxu1 %v9939_v43  ;;  %v9948_v43 = vand.u32 4294901760, %v9947_v2  ;;  %v9958_v2 = vld [vmem:[#allocation95_spill] sm:$0xff] }
 0x111   :  { %1793 = vmatmul.mubr.f32.gmra.mrb[30].mxu0 %v9941_v53  ;;  %6343 = vmatprep.subr.bf16.mxu1 %v9660_v55  ;;  %v9950_v53 = vand.u32 4294901760, %v9949_v51  ;;  %v9960_v51 = vld [vmem:[#allocation37_spill] sm:$0xff] }
 0x112   :  { %1800 = vmatprep.mubr.f32.mxu0 %v9943_v23  ;;  %6154 = vmatpush1.bf16.msra.mxu0 %v8252_v18  ;;  %v9952_v23 = vld [vmem:[#allocation94_spill] sm:$0xff] }
 0x113   :  { %6155 = vmatprep.subr.bf16.mxu0 %v9660_v55  ;;  %974 = vmatmul.mubr.f32.gmra.mrb[16].mxu1 %v9944_v30  ;;  %v9953_v18 = vld [vmem:[#allocation34_spill] sm:$0xff] }
 0x114   :  { %979 = vmatprep.mubr.f32.mxu1 %v9945_v22  ;;  %6359 = vmatpush1.bf16.msra.mxu1 %v9946_v0  ;;  %v9956_v0 = vld [vmem:[#allocation125_spill] sm:$0xff] }
 0x115   :  { %1804 = vmatmul.mubr.f32.gmra.mrb[32].mxu0 %v9948_v43  ;;  %6344 = vmatprep.subr.bf16.mxu1 %v9660_v55  ;;  %v9957_v46 = vand.u32 4294901760, %v9956_v0  ;;  %v9959_v43 = vld [vmem:[#allocation97_spill] sm:$0xff] }
 0x116   :  { %1811 = vmatprep.mubr.f32.mxu0 %v9950_v53  ;;  %v9961_v53 = vand.u32 4294901760, %v7957_v41  ;;  %v9965_v0 = vld [vmem:[#allocation41_spill] sm:$0xff]  ;;  %v9968_v41 = vld [vmem:[#allocation104_spill] sm:$0xff] }
 0x117   :  { %981 = vmatmul.mubr.f32.gmra.mrb[18].mxu1 %v9951_v56 }
 0x118   :  { %986 = vmatprep.mubr.f32.mxu1 %v9952_v23  ;;  %6360 = vmatpush1.bf16.msra.mxu1 %v9953_v18  ;;  %v9962_v18 = vand.u32 4294901760, %v7989_v52  ;;  %v9970_v52 = vld [vmem:[#allocation45_spill] sm:$0xff] }
 0x119   :  { %1815 = vmatmul.mubr.f32.gmra.mrb[34].mxu0 %v9955_v57  ;;  %6345 = vmatprep.subr.bf16.mxu1 %v9660_v55  ;;  %v9963_v57 = vld [vmem:[#allocation99_spill] sm:$0xff] }
 0x11a   :  { %1822 = vmatprep.mubr.f32.mxu0 %v9957_v46  ;;  %v9966_v46 = vand.u32 4294901760, %v8018_v39  ;;  %v9973_v39 = vld [vmem:[#allocation13_spill] sm:$0xff] }
 0x11b   :  { %988 = vmatmul.mubr.f32.gmra.mrb[20].mxu1 %v9958_v2 }
 0x11c   :  { %993 = vmatprep.mubr.f32.mxu1 %v9959_v43  ;;  %6361 = vmatpush1.bf16.msra.mxu1 %v9960_v51  ;;  %v9967_v51 = vand.u32 4294901760, %v8022_v58  ;;  %v9975_v58 = vld [vmem:[#allocation50_spill] sm:$0xff] }
 0x11d   :  { %1826 = vmatmul.mubr.f32.gmra.mrb[36].mxu0 %v9961_v53  ;;  %6346 = vmatprep.subr.bf16.mxu1 %v9660_v55  ;;  %v9969_v53 = vld [vmem:[#allocation108_spill] sm:$0xff] }
 0x11e   :  { %1833 = vmatprep.mubr.f32.mxu0 %v9962_v18  ;;  %v9971_v18 = vand.u32 4294901760, %v8056_v20  ;;  %v9978_v20 = vld [vmem:[#allocation113_spill] sm:$0xff] }
 0x11f   :  { %995 = vmatmul.mubr.f32.gmra.mrb[22].mxu1 %v9963_v57 }
 0x120   :  { %1000 = vmatprep.mubr.f32.mxu1 %v9964_v33  ;;  %6362 = vmatpush1.bf16.msra.mxu1 %v9965_v0  ;;  %v9972_v0 = vand.u32 4294901760, %v8117_v38  ;;  %v9980_v38 = vld [vmem:[#allocation53_spill] sm:$0xff] }
 0x121   :  { %1837 = vmatmul.mubr.f32.gmra.mrb[38].mxu0 %v9966_v46  ;;  %6347 = vmatprep.subr.bf16.mxu1 %v9660_v55  ;;  %v9974_v46 = vld [vmem:[#allocation111_spill] sm:$0xff] }
 0x122   :  { %1844 = vmatprep.mubr.f32.mxu0 %v9967_v51  ;;  %v9976_v51 = vand.u32 4294901760, %v8132_v48  ;;  %v9983_v48 = vld [vmem:[#allocation110_spill] sm:$0xff] }
 0x123   :  { %1002 = vmatmul.mubr.f32.gmra.mrb[24].mxu1 %v9968_v41 }
 0x124   :  { %1007 = vmatprep.mubr.f32.mxu1 %v9969_v53  ;;  %6363 = vmatpush1.bf16.msra.mxu1 %v9970_v52  ;;  %v9977_v52 = vand.u32 4294901760, %v8146_v45  ;;  %v9985_v45 = vld [vmem:[#allocation62_spill] sm:$0xff] }
 0x125   :  { %1848 = vmatmul.mubr.f32.gmra.mrb[40].mxu0 %v9971_v18  ;;  %6348 = vmatprep.subr.bf16.mxu1 %v9660_v55  ;;  %v9979_v18 = vld [vmem:[#allocation61_spill] sm:$0xff] }
 0x126   :  { %1855 = vmatprep.mubr.f32.mxu0 %v9972_v0  ;;  %v9981_v0 = vand.u32 4294901760, %v8166_v19  ;;  %v9989_v19 = vld [vmem:[#allocation23_spill] sm:$0xff] }
 0x127   :  { %1009 = vmatmul.mubr.f32.gmra.mrb[26].mxu1 %v9973_v39 }
 0x128   :  { %1014 = vmatprep.mubr.f32.mxu1 %v9974_v46  ;;  %6364 = vmatpush1.bf16.msra.mxu1 %v9975_v58  ;;  %v9982_v58 = vand.u32 4294901760, %v8181_v27  ;;  %v9991_v27 = vand.u32 4294901760, %v8236_v29  ;;  %v9999_v29 = vand.u32 4294901760, %v8309_v7 }
 0x129   :  { %1859 = vmatmul.mubr.f32.gmra.mrb[42].mxu0 %v9976_v51  ;;  %6349 = vmatprep.subr.bf16.mxu1 %v9660_v55  ;;  %v9984_v51 = vld [vmem:[#allocation112_spill] sm:$0xff] }
 0x12a   :  { %1866 = vmatprep.mubr.f32.mxu0 %v9977_v52  ;;  %v9986_v52 = vand.u32 4294901760, %v8197_v13  ;;  %v9994_v13 = vand.u32 4294901760, %v8256_v14  ;;  %v10002_v14 = vand.u32 4294901760, %v8326_v44 }
 0x12b   :  { %1016 = vmatmul.mubr.f32.gmra.mrb[28].mxu1 %v9978_v20 }
 0x12c   :  { %1021 = vmatprep.mubr.f32.mxu1 %v9979_v18  ;;  %6365 = vmatpush1.bf16.msra.mxu1 %v9980_v38  ;;  %v9987_v18 = vand.u32 4294901760, %v8206_v36  ;;  %v9988_v38 = vld [vmem:[#allocation118_spill] sm:$0xff]  ;;  %v9995_v36 = vand.u32 4294901760, %v8262_v4  ;;  %v10003_v4 = vand.u32 4294901760, %v8337_v21 }
 0x12d   :  { %1870 = vmatmul.mubr.f32.gmra.mrb[44].mxu0 %v9981_v0  ;;  %6350 = vmatprep.subr.bf16.mxu1 %v9660_v55  ;;  %v9990_v0 = vand.u32 4294901760, %v8228_v59  ;;  %v9998_v59 = vand.u32 4294901760, %v8276_v63  ;;  %v10006_v63 = vand.u32 4294901760, %v8352_v61 }
 0x12e   :  { %1877 = vmatprep.mubr.f32.mxu0 %v9982_v58  ;;  %v9992_v58 = vld [vmem:[#allocation120_spill] sm:$0xff] }
 0x12f   :  { %1023 = vmatmul.mubr.f32.gmra.mrb[30].mxu1 %v9983_v48 }
 0x130   :  { %1028 = vmatprep.mubr.f32.mxu1 %v9984_v51  ;;  %6366 = vmatpush1.bf16.msra.mxu1 %v9985_v45  ;;  %v9993_v51 = vld [vmem:[#allocation122_spill] sm:$0xff]  ;;  %v9997_v45 = vld [vmem:[#allocation31_spill] sm:$0xff] }
 0x131   :  { %1881 = vmatmul.mubr.f32.gmra.mrb[46].mxu0 %v9986_v52  ;;  %v10000_v52 = vld [vmem:[#allocation33_spill] sm:$0xff] }
 0x132   :  { %1888 = vmatprep.mubr.f32.mxu0 %v9987_v18  ;;  %v9996_v18 = vld [vmem:[#allocation123_spill] sm:$0xff] }
 0x133   :  { %1030 = vmatmul.mubr.f32.gmra.mrb[32].mxu1 %v9988_v38 }
 0x134   :  { %1035 = vmatprep.mubr.f32.mxu1 %v9989_v19 }
 0x135   :  { %1892 = vmatmul.mubr.f32.gmra.mrb[48].mxu0 %v9990_v0  ;;  %v10001_v0 = vld [vmem:[#allocation126_spill] sm:$0xff] }
 0x136   :  { %1899 = vmatprep.mubr.f32.mxu0 %v9991_v27  ;;  %v10004_v27 = vld [vmem:[#allocation35_spill] sm:$0xff] }
 0x137   :  { %1037 = vmatmul.mubr.f32.gmra.mrb[34].mxu1 %v9992_v58 }
 0x138   :  { %1042 = vmatprep.mubr.f32.mxu1 %v9993_v51 }
 0x139   :  { %1903 = vmatmul.mubr.f32.gmra.mrb[50].mxu0 %v9994_v13  ;;  %v10005_v13 = vld [vmem:[#allocation39_spill] sm:$0xff] }
 0x13a   :  { %1910 = vmatprep.mubr.f32.mxu0 %v9995_v36  ;;  %v10007_v36 = vand.u32 4294901760, %v8361_v10 }
 0x13b   :  { %1044 = vmatmul.mubr.f32.gmra.mrb[36].mxu1 %v9996_v18 }
 0x13c   :  { %1049 = vmatprep.mubr.f32.mxu1 %v9997_v45 }
 0x13d   :  { %1914 = vmatmul.mubr.f32.gmra.mrb[52].mxu0 %v9998_v59  ;;  %v10008_v59 = vld [vmem:[#allocation42_spill] sm:$0xff] }
 0x13e   :  { %1921 = vmatprep.mubr.f32.mxu0 %v9999_v29  ;;  %v10009_v29 = vld [vmem:[#allocation43_spill] sm:$0xff] }
 0x13f   :  { %1051 = vmatmul.mubr.f32.gmra.mrb[38].mxu1 %v10000_v52 }
 0x140   :  { %1056 = vmatprep.mubr.f32.mxu1 %v10001_v0  ;;  %v10010_v0 = vand.u32 4294901760, %v8374_v34 }
 0x141   :  { %1925 = vmatmul.mubr.f32.gmra.mrb[54].mxu0 %v10002_v14  ;;  %v10011_v14 = vld [vmem:[#allocation46_spill] sm:$0xff] }
 0x142   :  { %1932 = vmatprep.mubr.f32.mxu0 %v10003_v4  ;;  %v10012_v4 = vld [vmem:[#allocation19_spill] sm:$0xff] }
 0x143   :  { %1058 = vmatmul.mubr.f32.gmra.mrb[40].mxu1 %v10004_v27 }
 0x144   :  { %1063 = vmatprep.mubr.f32.mxu1 %v10005_v13 }
 0x145   :  { %1936 = vmatmul.mubr.f32.gmra.mrb[56].mxu0 %v10006_v63  ;;  %v10013_v63 = vld [vmem:[#allocation47_spill] sm:$0xff] }
 0x146   :  { %1943 = vmatprep.mubr.f32.mxu0 %v10007_v36  ;;  %v10014_v36 = vld [vmem:[#allocation49_spill] sm:$0xff] }
 0x147   :  { %1065 = vmatmul.mubr.f32.gmra.mrb[42].mxu1 %v10008_v59 }
 0x148   :  { %1070 = vmatprep.mubr.f32.mxu1 %v10009_v29 }
 0x149   :  { %1947 = vmatmul.mubr.f32.gmra.mrb[58].mxu0 %v10010_v0  ;;  %v10015_v0 = vld [vmem:[#allocation20_spill] sm:$0xff] }
 0x14a   :  { %2113 = vmatprep.mubr.f32.mxu0 %v9878_v49  ;;  %v10016_v49 = vld [vmem:[#allocation51_spill] sm:$0xff] }
 0x14b   :  { %1072 = vmatmul.mubr.f32.gmra.mrb[44].mxu1 %v8135_v47 }
 0x14c   :  { %1077 = vmatprep.mubr.f32.mxu1 %v10011_v14 }
 0x14d   :  { %2115 = vmatmul.mubr.f32.vlgmr.msra.gmra.mrb[0].mxu0 %v9884_v42  ;;  %v10017_v42 = vld [vmem:[#allocation54_spill] sm:$0xff] }
 0x14e   :  { %2120 = vmatprep.mubr.f32.mxu0 %v9885_v8  ;;  %6157 = vmatpush1.bf16.msra.mxu0 %v10012_v4  ;;  %v10018_v4 = vld [vmem:[#allocation24_spill] sm:$0xff] }
 0x14f   :  { %6158 = vmatprep.subr.bf16.mxu0 %v9660_v55  ;;  %1079 = vmatmul.mubr.f32.gmra.mrb[46].mxu1 %v10013_v63 }
 0x150   :  { %1084 = vmatprep.mubr.f32.mxu1 %v10014_v36 }
 0x151   :  { %2122 = vmatmul.mubr.f32.gmra.mrb[2].mxu0 %v9892_v32 }
 0x152   :  { %2127 = vmatprep.mubr.f32.mxu0 %v9893_v9  ;;  %6160 = vmatpush1.bf16.msra.mxu0 %v10015_v0  ;;  %v10019_v0 = vld [vmem:[#allocation28_spill] sm:$0xff] }
 0x153   :  { %6161 = vmatprep.subr.bf16.mxu0 %v9660_v55  ;;  %1086 = vmatmul.mubr.f32.gmra.mrb[48].mxu1 %v10016_v49 }
 0x154   :  { %1091 = vmatprep.mubr.f32.mxu1 %v10017_v42 }
 0x155   :  { %2129 = vmatmul.mubr.f32.gmra.mrb[4].mxu0 %v9900_v24 }
 0x156   :  { %2134 = vmatprep.mubr.f32.mxu0 %v9901_v62  ;;  %6163 = vmatpush1.bf16.msra.mxu0 %v10018_v4  ;;  %v10020_v4 = vld [vmem:[#allocation32_spill] sm:$0xff] }
 0x157   :  { %6164 = vmatprep.subr.bf16.mxu0 %v9660_v55  ;;  %1093 = vmatmul.mubr.f32.gmra.mrb[50].mxu1 %v8230_v3 }
 0x158   :  { %1098 = vmatprep.mubr.f32.mxu1 %v8238_v6 }
 0x159   :  { %2136 = vmatmul.mubr.f32.gmra.mrb[6].mxu0 %v9908_v31 }
 0x15a   :  { %2141 = vmatprep.mubr.f32.mxu0 %v9909_v28  ;;  %6166 = vmatpush1.bf16.msra.mxu0 %v10019_v0  ;;  %v10021_v0 = vld [vmem:[#allocation36_spill] sm:$0xff] }
 0x15b   :  { %6167 = vmatprep.subr.bf16.mxu0 %v9660_v55  ;;  %1100 = vmatmul.mubr.f32.gmra.mrb[52].mxu1 %v8258_v1 }
 0x15c   :  { %1105 = vmatprep.mubr.f32.mxu1 %v8289_v16 }
 0x15d   :  { %2143 = vmatmul.mubr.f32.gmra.mrb[8].mxu0 %v9916_v12 }
 0x15e   :  { %2148 = vmatprep.mubr.f32.mxu0 %v9917_v50  ;;  %6169 = vmatpush1.bf16.msra.mxu0 %v10020_v4  ;;  %v10022_v4 = vld [vmem:[#allocation40_spill] sm:$0xff] }
 0x15f   :  { %6170 = vmatprep.subr.bf16.mxu0 %v9660_v55  ;;  %1107 = vmatmul.mubr.f32.gmra.mrb[54].mxu1 %v8303_v17 }
 0x160   :  { %1112 = vmatprep.mubr.f32.mxu1 %v8311_v11 }
 0x161   :  { %2150 = vmatmul.mubr.f32.gmra.mrb[10].mxu0 %v9923_v60 }
 0x162   :  { %2155 = vmatprep.mubr.f32.mxu0 %v9924_v5  ;;  %6172 = vmatpush1.bf16.msra.mxu0 %v10021_v0  ;;  %v10023_v0 = vld [vmem:[#allocation44_spill] sm:$0xff] }
 0x163   :  { %6173 = vmatprep.subr.bf16.mxu0 %v9660_v55  ;;  %1114 = vmatmul.mubr.f32.gmra.mrb[56].mxu1 %v8328_v40 }
 0x164   :  { %1119 = vmatprep.mubr.f32.mxu1 %v8339_v54 }
 0x165   :  { %2157 = vmatmul.mubr.f32.gmra.mrb[12].mxu0 %v9930_v15 }
 0x166   :  { %2162 = vmatprep.mubr.f32.mxu0 %v9931_v35  ;;  %6175 = vmatpush1.bf16.msra.mxu0 %v10022_v4  ;;  %v10024_v4 = vld [vmem:[#allocation48_spill] sm:$0xff] }
 0x167   :  { %6176 = vmatprep.subr.bf16.mxu0 %v9660_v55  ;;  %1121 = vmatmul.mubr.f32.gmra.mrb[58].mxu1 %v8354_v25 }
 0x168   :  { %1499 = vmatprep.mubr.f32.mxu1 %v8309_v7  ;;  %v10025_v7 = vld [vmem:[#allocation52_spill] sm:$0xff] }
 0x169   :  { %2164 = vmatmul.mubr.f32.gmra.mrb[14].mxu0 %v9937_v37 }
 0x16a   :  { %2169 = vmatprep.mubr.f32.mxu0 %v9938_v26  ;;  %6178 = vmatpush1.bf16.msra.mxu0 %v10023_v0  ;;  %v10031_v0 = vld [vmem:[#allocation86_spill] sm:$0xff] }
 0x16b   :  { %6179 = vmatprep.subr.bf16.mxu0 %v9660_v55  ;;  %1502 = vmatmul.mubr.f32.vlgmr.msra.gmra.mrb[54].mxu1 %v8326_v44  ;;  %v10026_v44 = vld [vmem:[#allocation56_spill] sm:$0xff] }
 0x16c   :  { %1508 = vmatprep.mubr.f32.mxu1 %v8337_v21  ;;  %v10027_v21 = vld [vmem:[#allocation64_spill] sm:$0xff] }
 0x16d   :  { %2171 = vmatmul.mubr.f32.gmra.mrb[16].mxu0 %v9944_v30 }
 0x16e   :  { %2176 = vmatprep.mubr.f32.mxu0 %v9945_v22  ;;  %6181 = vmatpush1.bf16.msra.mxu0 %v10024_v4  ;;  %v10032_v4 = vld [vmem:[#allocation112_spill] sm:$0xff] }
 0x16f   :  { %6182 = vmatprep.subr.bf16.mxu0 %v9660_v55  ;;  %1511 = vmatmul.mubr.f32.gmra.mrb[56].mxu1 %v8352_v61  ;;  %v10028_v61 = vld [vmem:[#allocation72_spill] sm:$0xff] }
 0x170   :  { %1517 = vmatprep.mubr.f32.mxu1 %v8361_v10  ;;  %v10029_v10 = vld [vmem:[#allocation78_spill] sm:$0xff] }
 0x171   :  { %2178 = vmatmul.mubr.f32.gmra.mrb[18].mxu0 %v9951_v56 }
 0x172   :  { %2183 = vmatprep.mubr.f32.mxu0 %v9952_v23  ;;  %6184 = vmatpush1.bf16.msra.mxu0 %v10025_v7  ;;  %v10033_v7 = vld [vmem:[#allocation91_spill] sm:$0xff] }
 0x173   :  { %6185 = vmatprep.subr.bf16.mxu0 %v9660_v55  ;;  %1520 = vmatmul.mubr.f32.gmra.mrb[58].mxu1 %v8374_v34  ;;  %v10030_v34 = vld [vmem:[#allocation61_spill] sm:$0xff] }
 0x175   :  { %2185 = vmatmul.mubr.f32.gmra.mrb[20].mxu0 %v9958_v2 }
 0x176   :  { %2190 = vmatprep.mubr.f32.mxu0 %v9959_v43  ;;  %6187 = vmatpush1.bf16.msra.mxu0 %v10026_v44  ;;  %v10034_v44 = vld [vmem:[#allocation126_spill] sm:$0xff] }
 0x177   :  { %6188 = vmatprep.subr.bf16.mxu0 %v9660_v55 }
 0x179   :  { %2192 = vmatmul.mubr.f32.gmra.mrb[22].mxu0 %v9963_v57 }
 0x17a   :  { %2197 = vmatprep.mubr.f32.mxu0 %v9964_v33  ;;  %6190 = vmatpush1.bf16.msra.mxu0 %v10027_v21  ;;  %v10035_v21 = vld [vmem:[#allocation14_spill] sm:$0xff] }
 0x17b   :  { %6191 = vmatprep.subr.bf16.mxu0 %v9660_v55 }
 0x17d   :  { %2199 = vmatmul.mubr.f32.gmra.mrb[24].mxu0 %v9968_v41 }
 0x17e   :  { %2204 = vmatprep.mubr.f32.mxu0 %v9969_v53  ;;  %6193 = vmatpush1.bf16.msra.mxu0 %v10028_v61  ;;  %v10036_v61 = vld [vmem:[#allocation57_spill] sm:$0xff] }
 0x17f   :  { %6194 = vmatprep.subr.bf16.mxu0 %v9660_v55 }
 0x181   :  { %2206 = vmatmul.mubr.f32.gmra.mrb[26].mxu0 %v9973_v39 }
 0x182   :  { %2211 = vmatprep.mubr.f32.mxu0 %v9974_v46  ;;  %6196 = vmatpush1.bf16.msra.mxu0 %v10029_v10 }
 0x183   :  { %6197 = vmatprep.subr.bf16.mxu0 %v9660_v55 }
 0x185   :  { %2213 = vmatmul.mubr.f32.gmra.mrb[28].mxu0 %v9978_v20 }
 0x186   :  { %2218 = vmatprep.mubr.f32.mxu0 %v10030_v34  ;;  %6199 = vmatpush1.bf16.msra.mxu0 %v10031_v0 }
 0x187   :  { %6200 = vmatprep.subr.bf16.mxu0 %v9660_v55 }
 0x189   :  { %2220 = vmatmul.mubr.f32.gmra.mrb[30].mxu0 %v9983_v48 }
 0x18a   :  { %2225 = vmatprep.mubr.f32.mxu0 %v10032_v4  ;;  %6202 = vmatpush1.bf16.msra.mxu0 %v10033_v7 }
 0x18d   :  { %2227 = vmatmul.mubr.f32.gmra.mrb[32].mxu0 %v9988_v38 }
 0x18e   :  { %2232 = vmatprep.mubr.f32.mxu0 %v9989_v19 }
 0x191   :  { %2234 = vmatmul.mubr.f32.gmra.mrb[34].mxu0 %v9992_v58 }
 0x192   :  { %2239 = vmatprep.mubr.f32.mxu0 %v9993_v51 }
 0x195   :  { %2241 = vmatmul.mubr.f32.gmra.mrb[36].mxu0 %v9996_v18 }
 0x196   :  { %2246 = vmatprep.mubr.f32.mxu0 %v9997_v45 }
 0x199   :  { %2248 = vmatmul.mubr.f32.gmra.mrb[38].mxu0 %v10000_v52 }
 0x19a   :  { %2253 = vmatprep.mubr.f32.mxu0 %v10034_v44 }
 0x19d   :  { %2255 = vmatmul.mubr.f32.gmra.mrb[40].mxu0 %v10004_v27 }
 0x19e   :  { %2260 = vmatprep.mubr.f32.mxu0 %v10005_v13 }
 0x1a1   :  { %2262 = vmatmul.mubr.f32.gmra.mrb[42].mxu0 %v10008_v59 }
 0x1a2   :  { %2267 = vmatprep.mubr.f32.mxu0 %v10009_v29 }
 0x1a5   :  { %2269 = vmatmul.mubr.f32.gmra.mrb[44].mxu0 %v8135_v47 }
 0x1a6   :  { %2274 = vmatprep.mubr.f32.mxu0 %v10011_v14 }
 0x1a9   :  { %2276 = vmatmul.mubr.f32.gmra.mrb[46].mxu0 %v10013_v63 }
 0x1aa   :  { %2281 = vmatprep.mubr.f32.mxu0 %v10014_v36 }
 0x1ad   :  { %2283 = vmatmul.mubr.f32.gmra.mrb[48].mxu0 %v10016_v49 }
 0x1ae   :  { %2288 = vmatprep.mubr.f32.mxu0 %v10017_v42 }
 0x1b1   :  { %2290 = vmatmul.mubr.f32.gmra.mrb[50].mxu0 %v8230_v3 }
 0x1b2   :  { %2295 = vmatprep.mubr.f32.mxu0 %v8238_v6 }
 0x1b5   :  { %2297 = vmatmul.mubr.f32.gmra.mrb[52].mxu0 %v8258_v1 }
 0x1b6   :  { %2302 = vmatprep.mubr.f32.mxu0 %v8289_v16 }
 0x1b9   :  { %2304 = vmatmul.mubr.f32.gmra.mrb[54].mxu0 %v8303_v17 }
 0x1ba   :  { %2309 = vmatprep.mubr.f32.mxu0 %v8311_v11 }
 0x1bd   :  { %2311 = vmatmul.mubr.f32.gmra.mrb[56].mxu0 %v8328_v40 }
 0x1be   :  { %2316 = vmatprep.mubr.f32.mxu0 %v8339_v54 }
 0x1c1   :  { %2318 = vmatmul.mubr.f32.gmra.mrb[58].mxu0 %v8354_v25 }
 0x1c2   :  { %2420 = vmatprep.mubr.f32.mxu0 %v10035_v21 }
 0x1c5   :  { %2422 = vmatmul.mubr.f32.vlgmr.msra.gmra.mrb[0].mxu0 %v10036_v61 }
 0x1c6   :  { %2427 = vmatprep.mubr.f32.mxu0 %v9885_v8  ;;  %v8713_v10 = vpop.f32.mrb[0].mxu1 }
 0x1c7   :  { %v921_v0 = vpop.f32.mrb[1].mxu1 }
 0x1c9   :  { %2429 = vmatmul.mubr.f32.gmra.mrb[2].mxu0 %v9892_v32 }
 0x1ca   :  { %2434 = vmatprep.mubr.f32.mxu0 %v9893_v9  ;;  %v8717_v7 = vpop.f32.mrb[2].mxu1 }
 0x1cb   :  { %v928_v55 = vpop.f32.mrb[3].mxu1 }
 0x1cd   :  { %2436 = vmatmul.mubr.f32.gmra.mrb[4].mxu0 %v9900_v24 }
 0x1ce   :  { %2441 = vmatprep.mubr.f32.mxu0 %v9901_v62  ;;  %v8721_v25 = vpop.f32.mrb[4].mxu1 }
 0x1cf   :  { %v935_v21 = vpop.f32.mrb[5].mxu1 }
 0x1d1   :  { %2443 = vmatmul.mubr.f32.gmra.mrb[6].mxu0 %v9908_v31 }
 0x1d2   :  { %2448 = vmatprep.mubr.f32.mxu0 %v9909_v28  ;;  %v8725_v8 = vpop.f32.mrb[6].mxu1 }
 0x1d3   :  { %v942_v61 = vpop.f32.mrb[7].mxu1 }
 0x1d5   :  { %2450 = vmatmul.mubr.f32.gmra.mrb[8].mxu0 %v9916_v12 }
 0x1d6   :  { %2455 = vmatprep.mubr.f32.mxu0 %v9917_v50  ;;  %v8729_v32 = vpop.f32.mrb[8].mxu1 }
 0x1d7   :  { %v949_v55 = vpop.f32.mrb[9].mxu1 }
 0x1d9   :  { %2457 = vmatmul.mubr.f32.gmra.mrb[10].mxu0 %v9923_v60 }
 0x1da   :  { %2462 = vmatprep.mubr.f32.mxu0 %v9924_v5  ;;  %v8733_v9 = vpop.f32.mrb[10].mxu1 }
 0x1db   :  { %v956_v24 = vpop.f32.mrb[11].mxu1 }
 0x1dd   :  { %2464 = vmatmul.mubr.f32.gmra.mrb[12].mxu0 %v9930_v15 }
 0x1de   :  { %2469 = vmatprep.mubr.f32.mxu0 %v9931_v35  ;;  %v8737_v62 = vpop.f32.mrb[12].mxu1 }
 0x1df   :  { %v963_v31 = vpop.f32.mrb[13].mxu1 }
 0x1e1   :  { %2471 = vmatmul.mubr.f32.gmra.mrb[14].mxu0 %v9937_v37 }
 0x1e2   :  { %2476 = vmatprep.mubr.f32.mxu0 %v9938_v26  ;;  %v8741_v28 = vpop.f32.mrb[14].mxu1 }
 0x1e3   :  { %v970_v12 = vpop.f32.mrb[15].mxu1 }
 0x1e5   :  { %2478 = vmatmul.mubr.f32.gmra.mrb[16].mxu0 %v9944_v30 }
 0x1e6   :  { %2483 = vmatprep.mubr.f32.mxu0 %v9945_v22  ;;  %v8745_v50 = vpop.f32.mrb[16].mxu1 }
 0x1e7   :  { %v977_v60 = vpop.f32.mrb[17].mxu1 }
 0x1e9   :  { %2485 = vmatmul.mubr.f32.gmra.mrb[18].mxu0 %v9951_v56 }
 0x1ea   :  { %2490 = vmatprep.mubr.f32.mxu0 %v9952_v23  ;;  %v8749_v5 = vpop.f32.mrb[18].mxu1 }
 0x1eb   :  { %v984_v15 = vpop.f32.mrb[19].mxu1 }
 0x1ed   :  { %2492 = vmatmul.mubr.f32.gmra.mrb[20].mxu0 %v9958_v2 }
 0x1ee   :  { %2497 = vmatprep.mubr.f32.mxu0 %v9959_v43  ;;  %v8753_v35 = vpop.f32.mrb[20].mxu1 }
 0x1ef   :  { %v991_v37 = vpop.f32.mrb[21].mxu1 }
 0x1f1   :  { %2499 = vmatmul.mubr.f32.gmra.mrb[22].mxu0 %v9963_v57 }
 0x1f2   :  { %2504 = vmatprep.mubr.f32.mxu0 %v9964_v33  ;;  %v8757_v26 = vpop.f32.mrb[22].mxu1 }
 0x1f3   :  { %v998_v30 = vpop.f32.mrb[23].mxu1 }
 0x1f5   :  { %2506 = vmatmul.mubr.f32.gmra.mrb[24].mxu0 %v9968_v41 }
 0x1f6   :  { %2511 = vmatprep.mubr.f32.mxu0 %v9969_v53  ;;  %v8761_v22 = vpop.f32.mrb[24].mxu1 }
 0x1f7   :  { %v1005_v56 = vpop.f32.mrb[25].mxu1 }
 0x1f9   :  { %2513 = vmatmul.mubr.f32.gmra.mrb[26].mxu0 %v9973_v39 }
 0x1fa   :  { %2518 = vmatprep.mubr.f32.mxu0 %v9974_v46  ;;  %v8765_v23 = vpop.f32.mrb[26].mxu1 }
 0x1fb   :  { %v1012_v2 = vpop.f32.mrb[27].mxu1 }
 0x1fd   :  { %2520 = vmatmul.mubr.f32.gmra.mrb[28].mxu0 %v9978_v20 }
 0x1fe   :  { %2525 = vmatprep.mubr.f32.mxu0 %v10030_v34  ;;  %v8769_v43 = vpop.f32.mrb[28].mxu1 }
 0x1ff   :  { %v1019_v57 = vpop.f32.mrb[29].mxu1 }
 0x201   :  { %2527 = vmatmul.mubr.f32.gmra.mrb[30].mxu0 %v9983_v48 }
 0x202   :  { %2532 = vmatprep.mubr.f32.mxu0 %v10032_v4  ;;  %v8773_v33 = vpop.f32.mrb[30].mxu1 }
 0x203   :  { %v1026_v41 = vpop.f32.mrb[31].mxu1 }
 0x205   :  { %2534 = vmatmul.mubr.f32.gmra.mrb[32].mxu0 %v9988_v38 }
 0x206   :  { %2539 = vmatprep.mubr.f32.mxu0 %v9989_v19  ;;  %v8777_v53 = vpop.f32.mrb[32].mxu1 }
 0x207   :  { %v1033_v39 = vpop.f32.mrb[33].mxu1 }
 0x209   :  { %2541 = vmatmul.mubr.f32.gmra.mrb[34].mxu0 %v9992_v58 }
 0x20a   :  { %2546 = vmatprep.mubr.f32.mxu0 %v9993_v51  ;;  %v8781_v46 = vpop.f32.mrb[34].mxu1 }
 0x20b   :  { %v1040_v20 = vpop.f32.mrb[35].mxu1 }
 0x20d   :  { %2548 = vmatmul.mubr.f32.gmra.mrb[36].mxu0 %v9996_v18 }
 0x20e   :  { %2553 = vmatprep.mubr.f32.mxu0 %v9997_v45  ;;  %v8785_v48 = vpop.f32.mrb[36].mxu1 }
 0x20f   :  { %v1047_v34 = vpop.f32.mrb[37].mxu1 }
 0x211   :  { %2555 = vmatmul.mubr.f32.gmra.mrb[38].mxu0 %v10000_v52 }
 0x212   :  { %2560 = vmatprep.mubr.f32.mxu0 %v10034_v44  ;;  %v8789_v38 = vpop.f32.mrb[38].mxu1 }
 0x213   :  { %v1054_v19 = vpop.f32.mrb[39].mxu1 }
 0x215   :  { %2562 = vmatmul.mubr.f32.gmra.mrb[40].mxu0 %v10004_v27 }
 0x216   :  { %2567 = vmatprep.mubr.f32.mxu0 %v10005_v13  ;;  %v8793_v51 = vpop.f32.mrb[40].mxu1 }
 0x217   :  { %v1061_v58 = vpop.f32.mrb[41].mxu1 }
 0x219   :  { %2569 = vmatmul.mubr.f32.gmra.mrb[42].mxu0 %v10008_v59 }
 0x21a   :  { %2574 = vmatprep.mubr.f32.mxu0 %v10009_v29  ;;  %v8797_v18 = vpop.f32.mrb[42].mxu1 }
 0x21b   :  { %v1068_v45 = vpop.f32.mrb[43].mxu1 }
 0x21d   :  { %2576 = vmatmul.mubr.f32.gmra.mrb[44].mxu0 %v8135_v47 }
 0x21e   :  { %2581 = vmatprep.mubr.f32.mxu0 %v10011_v14  ;;  %v8801_v52 = vpop.f32.mrb[44].mxu1 }
 0x21f   :  { %v1075_v4 = vpop.f32.mrb[45].mxu1 }
 0x221   :  { %2583 = vmatmul.mubr.f32.gmra.mrb[46].mxu0 %v10013_v63 }
 0x222   :  { %2588 = vmatprep.mubr.f32.mxu0 %v10014_v36  ;;  %v8805_v27 = vpop.f32.mrb[46].mxu1 }
 0x223   :  { %v1082_v13 = vpop.f32.mrb[47].mxu1 }
 0x225   :  { %2590 = vmatmul.mubr.f32.gmra.mrb[48].mxu0 %v10016_v49  ;;  %v6755_v49 = vmov 0.0  }
 0x226   :  { %2595 = vmatprep.mubr.f32.mxu0 %v10017_v42  ;;  %v8809_v59 = vpop.f32.mrb[48].mxu1  ;;  %2704 = vmatprep.mubr.f32.mxu1 %v6755_v49 }
 0x227   :  { %v1089_v29 = vpop.f32.mrb[49].mxu1 }
 0x229   :  { %2597 = vmatmul.mubr.f32.gmra.mrb[50].mxu0 %v8230_v3  ;;  %v10037_v3 = vld [vmem:[#allocation55_spill] sm:$0xff] }
 0x22a   :  { %2602 = vmatprep.mubr.f32.mxu0 %v8238_v6  ;;  %v8813_v47 = vpop.f32.mrb[50].mxu1 }
 0x22b   :  { %v1096_v14 = vpop.f32.mrb[51].mxu1 }
 0x22d   :  { %2604 = vmatmul.mubr.f32.gmra.mrb[52].mxu0 %v8258_v1 }
 0x22e   :  { %2609 = vmatprep.mubr.f32.mxu0 %v8289_v16  ;;  %v8817_v63 = vpop.f32.mrb[52].mxu1 }
 0x22f   :  { %v1103_v36 = vpop.f32.mrb[53].mxu1 }
 0x231   :  { %2611 = vmatmul.mubr.f32.gmra.mrb[54].mxu0 %v8303_v17 }
 0x232   :  { %2616 = vmatprep.mubr.f32.mxu0 %v8311_v11 }
 0x235   :  { %2618 = vmatmul.mubr.f32.gmra.mrb[56].mxu0 %v8328_v40  ;;  %v81_v40 = vld [vmem:[%s9313_s2] sm:$0xff]  ;;  %s47_s2 = sld [smem:[#allocation2]] }
 0x236   :  { %2623 = vmatprep.mubr.f32.mxu0 %v8339_v54  ;;  %v2632_v12 = vsel %vm2630_vm0, %v81_v40, 0 }
 0x237   :  { %v8839_v30 = vand.u32 4294901760, %v2632_v12 }
 0x239   :  { %2625 = vmatmul.mubr.f32.gmra.mrb[58].mxu0 %v10037_v3  ;;  %v8851_v34 = vsub.f32 %v2632_v12, %v8839_v30 }
 0x23b   :  { %v8858_v36 = vand.u32 4294901760, %v8851_v34 }
 0x23d   :  { %v2708_v40 = vsub.f32 %v8851_v34, %v8858_v36 }
 0x23e   :  { %v8825_v6 = vpop.f32.mrb[54].mxu1 }
 0x23f   :  { %v1505_v1 = vpop.f32.mrb[55].mxu1 }
 0x242   :  { %v8827_v16 = vpop.f32.mrb[56].mxu1 }
 0x243   :  { %v1514_v42 = vpop.f32.mrb[57].mxu1 }
 0x246   :  { %v8829_v44 = vpop.f32.mrb[58].mxu1 }
 0x247   :  { %v1523_v17 = vpop.f32.mrb[59].mxu1 }
 0x298   :  { %v2423_v0 = vpop.f32.mrb[0].mxu0 }
 0x299   :  { %v6367_v11 = vadd.f32 %v2423_v0, %v8713_v10  ;;  %v2425_v21 = vpop.f32.mrb[1].mxu0 }
 0x29b   :  { %v2636_v54 = vand.u32 4294901760, %v6367_v11 }
 0x29c   :  { %v2430_v61 = vpop.f32.mrb[2].mxu0 }
 0x29d   :  { %v8835_v55 = vsub.f32 %v6367_v11, %v2636_v54  ;;  %v6368_v24 = vadd.f32 %v2430_v61, %v8717_v7  ;;  %v2432_v31 = vpop.f32.mrb[3].mxu0 }
 0x29f   :  { %v2724_v60 = vand.u32 4294901760, %v8835_v55  ;;  %v2640_v15 = vand.u32 4294901760, %v6368_v24 }
 0x2a0   :  { %v2437_v37 = vpop.f32.mrb[4].mxu0 }
 0x2a1   :  { %v8841_v10 = vpack.c.bf16 %v2640_v15, %v2636_v54  ;;  %v8843_v56 = vsub.f32 %v6368_v24, %v2640_v15  ;;  %v6369_v2 = vadd.f32 %v2437_v37, %v8721_v25  ;;  %v2439_v57 = vpop.f32.mrb[5].mxu0  ;;  %v2725_v41 = vsub.f32 %v8835_v55, %v2724_v60 }
 0x2a3   :  { %v2736_v39 = vand.u32 4294901760, %v8843_v56  ;;  %v6213_v7 = vpack.c.bf16 %v8843_v56, %v8835_v55  ;;  %v2726_v25 = vand.u32 4294901760, %v2725_v41  ;;  %v8863_v0 = vand.u32 4294901760, %v6369_v2 }
 0x2a4   :  { %v2444_v20 = vpop.f32.mrb[6].mxu0  ;;  %v8880_v41 = vand.u32 4294901760, %v2708_v40 }
 0x2a5   :  { %v2737_v19 = vsub.f32 %v8843_v56, %v2736_v39  ;;  %v6370_v58 = vadd.f32 %v2444_v20, %v8725_v8  ;;  %v2446_v45 = vpop.f32.mrb[7].mxu0  ;;  %v8855_v4 = vpack.c.bf16 %v2736_v39, %v2724_v60  ;;  %v8872_v12 = vsub.f32 %v6369_v2, %v8863_v0 }
 0x2a7   :  { %v2738_v13 = vand.u32 4294901760, %v2737_v19  ;;  %v2634_v29 = vand.u32 4294901760, %v6370_v58 }
 0x2a8   :  { %v2451_v14 = vpop.f32.mrb[8].mxu0 }
 0x2a9   :  { %v8860_v3 = vsub.f32 %v6370_v58, %v2634_v29  ;;  %v6371_v1 = vadd.f32 %v2451_v14, %v8729_v32  ;;  %v2453_v42 = vpop.f32.mrb[9].mxu0  ;;  %v6209_v17 = vpack.c.bf16 %v2738_v13, %v2726_v25  ;;  %v2748_v58 = vand.u32 4294901760, %v8872_v12 }
 0x2ab   :  { %v2718_v8 = vand.u32 4294901760, %v8860_v3  ;;  %v2638_v11 = vand.u32 4294901760, %v6371_v1 }
 0x2ac   :  { %v2458_v21 = vpop.f32.mrb[10].mxu0 }
 0x2ad   :  { %v2729_v54 = vsub.f32 %v6371_v1, %v2638_v11  ;;  %v6372_v61 = vadd.f32 %v2458_v21, %v8733_v9  ;;  %v2460_v24 = vpop.f32.mrb[11].mxu0  ;;  %v8869_v31 = vpack.c.bf16 %v2638_v11, %v2634_v29  ;;  %v2719_v15 = vsub.f32 %v8860_v3, %v2718_v8 }
 0x2ae   :  { %v2749_v11 = vsub.f32 %v8872_v12, %v2748_v58 }
 0x2af   :  { %v2730_v32 = vand.u32 4294901760, %v2729_v54  ;;  %v8874_v60 = vand.u32 4294901760, %v6372_v61  ;;  %6204 = vmatprep.subr.bf16.mxu1 %v8869_v31  ;;  %v6211_v37 = vpack.c.bf16 %v2729_v54, %v8860_v3  ;;  %v2720_v25 = vand.u32 4294901760, %v2719_v15 }
 0x2b0   :  { %v2465_v57 = vpop.f32.mrb[12].mxu0  ;;  %6206 = vmatpush1.bf16.msra.mxu1 %v8841_v10 }
 0x2b1   :  { %v8883_v9 = vsub.f32 %v6372_v61, %v8874_v60  ;;  %v6373_v2 = vadd.f32 %v2465_v57, %v8737_v62  ;;  %v2467_v39 = vpop.f32.mrb[13].mxu0  ;;  %2643 = vmatprep.subr.mxu1 %v8874_v60  ;;  %v2731_v20 = vsub.f32 %v2729_v54, %v2730_v32  ;;  %v8887_v19 = vpack.c.bf16 %v2730_v32, %v2718_v8 }
 0x2b2   :  { %v2750_v57 = vand.u32 4294901760, %v2749_v11 }
 0x2b3   :  { %v3153_v45 = vand.u32 4294901760, %v6373_v2  ;;  %v2732_v13 = vand.u32 4294901760, %v2731_v20  ;;  %v2742_v29 = vand.u32 4294901760, %v8883_v9 }
 0x2b4   :  { %v2472_v14 = vpop.f32.mrb[14].mxu0  ;;  %2645 = vmatpush1.msra.mxu1 %v8863_v0 }
 0x2b5   :  { %v8892_v3 = vsub.f32 %v6373_v2, %v3153_v45  ;;  %v6374_v62 = vadd.f32 %v2472_v14, %v8741_v28  ;;  %v2474_v1 = vpop.f32.mrb[15].mxu0  ;;  %2710 = vmatmul.mubr.f32.vlgmr.msra.gmra.mrb[60].mxu1 %v8880_v41  ;;  %v6207_v42 = vpack.c.bf16 %v2732_v13, %v2720_v25  ;;  %v2743_v8 = vsub.f32 %v8883_v9, %v2742_v29 }
 0x2b6   :  { %2810 = vmatprep.mubr.f32.mxu1 %v6755_v49 }
 0x2b7   :  { %v3241_v21 = vand.u32 4294901760, %v8892_v3  ;;  %v3157_v40 = vand.u32 4294901760, %v6374_v62  ;;  %6208 = vmatprep.subr.bf16.mxu1 %v6207_v42  ;;  %v2744_v54 = vand.u32 4294901760, %v2743_v8 }
 0x2b8   :  { %v2479_v28 = vpop.f32.mrb[16].mxu0  ;;  %6210 = vmatpush1.bf16.msra.mxu1 %v6209_v17 }
 0x2b9   :  { %v8904_v61 = vpack.c.bf16 %v3157_v40, %v3153_v45  ;;  %v8906_v24 = vsub.f32 %v6374_v62, %v3157_v40  ;;  %v8909_v32 = vadd.f32 %v2479_v28, %v8745_v50  ;;  %v2481_v15 = vpop.f32.mrb[17].mxu0  ;;  %2745 = vmatprep.subr.mxu1 %v2744_v54  ;;  %v3242_v2 = vsub.f32 %v8892_v3, %v3241_v21 }
 0x2bb   :  { %v3253_v39 = vand.u32 4294901760, %v8906_v24  ;;  %v6237_v20 = vpack.c.bf16 %v8906_v24, %v8892_v3  ;;  %v3243_v14 = vand.u32 4294901760, %v3242_v2 }
 0x2bc   :  { %v2486_v25 = vpop.f32.mrb[18].mxu0  ;;  %2751 = vmatpush1.msra.mxu1 %v2750_v57 }
 0x2bd   :  { %v3254_v17 = vsub.f32 %v8906_v24, %v3253_v39  ;;  %v6376_v45 = vadd.f32 %v2486_v25, %v8749_v5  ;;  %v2488_v13 = vpop.f32.mrb[19].mxu0  ;;  %2812 = vmatmul.mubr.f32.vlgmr.msra.gmra.mrb[60].mxu1 %v8839_v30  ;;  %6212 = vmatprep.subr.bf16.mxu1 %v6211_v37  ;;  %v8922_v50 = vpack.c.bf16 %v3253_v39, %v3241_v21 }
 0x2be   :  { %6214 = vmatpush1.bf16.msra.mxu1 %v6213_v7  ;;  %2894 = vmatprep.mubr.f32.mxu1 %v6755_v49 }
 0x2bf   :  { %v3255_v62 = vand.u32 4294901760, %v3254_v17  ;;  %v3151_v1 = vand.u32 4294901760, %v6376_v45  ;;  %2832 = vmatprep.subr.mxu1 %v8883_v9 }
 0x2c0   :  { %v2493_v42 = vpop.f32.mrb[20].mxu0 }
 0x2c1   :  { %v8925_v8 = vsub.f32 %v6376_v45, %v3151_v1  ;;  %v6377_v5 = vadd.f32 %v2493_v42, %v8753_v35  ;;  %v2495_v11 = vpop.f32.mrb[21].mxu0  ;;  %v8928_v37 = vpack.c.bf16 %v3255_v62, %v3243_v14 }
 0x2c2   :  { %2835 = vmatpush1.msra.mxu1 %v8872_v12 }
 0x2c3   :  { %v3235_v55 = vand.u32 4294901760, %v8925_v8  ;;  %v3155_v56 = vand.u32 4294901760, %v6377_v5  ;;  %6216 = vmatprep.subr.bf16.mxu1 %v8869_v31 }
 0x2c4   :  { %v2500_v7 = vpop.f32.mrb[22].mxu0 }
 0x2c5   :  { %v8933_v21 = vsub.f32 %v6377_v5, %v3155_v56  ;;  %v6378_v40 = vadd.f32 %v2500_v7, %v8757_v26  ;;  %v2502_v54 = vpop.f32.mrb[23].mxu0  ;;  %2897 = vmatmul.mubr.f32.vlgmr.msra.gmra.mrb[60].mxu1 %v8851_v34  ;;  %v8937_v28 = vpack.c.bf16 %v3155_v56, %v3151_v1  ;;  %v3236_v15 = vsub.f32 %v8925_v8, %v3235_v55 }
 0x2c6   :  { %6218 = vmatpush1.bf16.msra.mxu1 %v8841_v10  ;;  %2973 = vmatprep.mubr.f32.mxu1 %v6755_v49 }
 0x2c7   :  { %v3247_v35 = vand.u32 4294901760, %v8933_v21  ;;  %2912 = vmatprep.subr.mxu1 %v8874_v60  ;;  %v6235_v57 = vpack.c.bf16 %v8933_v21, %v8925_v8  ;;  %v3237_v13 = vand.u32 4294901760, %v3236_v15 }
 0x2c8   :  { %v2507_v2 = vpop.f32.mrb[24].mxu0 }
 0x2c9   :  { %v6379_v26 = vadd.f32 %v2507_v2, %v8761_v22  ;;  %v2509_v39 = vpop.f32.mrb[25].mxu0  ;;  %v3248_v25 = vsub.f32 %v8933_v21, %v3247_v35  ;;  %v8948_v17 = vpack.c.bf16 %v3247_v35, %v3235_v55 }
 0x2ca   :  { %2914 = vmatpush1.msra.mxu1 %v8863_v0 }
 0x2cb   :  { %v3669_v45 = vand.u32 4294901760, %v6379_v26  ;;  %6220 = vmatprep.subr.bf16.mxu1 %v8887_v19  ;;  %v3249_v14 = vand.u32 4294901760, %v3248_v25 }
 0x2cc   :  { %v2514_v62 = vpop.f32.mrb[26].mxu0 }
 0x2cd   :  { %v8952_v1 = vsub.f32 %v6379_v26, %v3669_v45  ;;  %v6380_v42 = vadd.f32 %v2514_v62, %v8765_v23  ;;  %v2516_v5 = vpop.f32.mrb[27].mxu0  ;;  %2977 = vmatmul.mubr.f32.vlgmr.msra.gmra.mrb[60].mxu1 %v8858_v36  ;;  %v8956_v22 = vpack.c.bf16 %v3249_v14, %v3237_v13 }
 0x2ce   :  { %6222 = vmatpush1.bf16.msra.mxu1 %v8855_v4  ;;  %3065 = vmatprep.mubr.f32.mxu1 %v6755_v49  ;;  %v8972_v4 = vand.u32 4294901760, %v6378_v40 }
 0x2cf   :  { %v3749_v11 = vand.u32 4294901760, %v8952_v1  ;;  %v3672_v55 = vand.u32 4294901760, %v6380_v42  ;;  %3002 = vmatprep.subr.mxu1 %v2742_v29 }
 0x2d0   :  { %v2521_v19 = vpop.f32.mrb[28].mxu0  ;;  %v8990_v39 = vsub.f32 %v6378_v40, %v8972_v4 }
 0x2d1   :  { %v8963_v56 = vpack.c.bf16 %v3672_v55, %v3669_v45  ;;  %v8965_v7 = vsub.f32 %v6380_v42, %v3672_v55  ;;  %v8968_v23 = vadd.f32 %v2521_v19, %v8769_v43  ;;  %v2523_v54 = vpop.f32.mrb[29].mxu0  ;;  %v3750_v35 = vsub.f32 %v8952_v1, %v3749_v11 }
 0x2d2   :  { %3006 = vmatpush1.msra.mxu1 %v2748_v58  ;;  %v8985_v58 = vand.u32 4294901760, %v8909_v32 }
 0x2d3   :  { %v3756_v15 = vand.u32 4294901760, %v8965_v7  ;;  %v6258_v9 = vpack.c.bf16 %v8965_v7, %v8952_v1  ;;  %6224 = vmatprep.subr.bf16.mxu1 %v8869_v31  ;;  %v3751_v31 = vand.u32 4294901760, %v3750_v35 }
 0x2d4   :  { %v2528_v29 = vpop.f32.mrb[30].mxu0 }
 0x2d5   :  { %v3757_v2 = vsub.f32 %v8965_v7, %v3756_v15  ;;  %v6382_v43 = vadd.f32 %v2528_v29, %v8773_v33  ;;  %v2530_v26 = vpop.f32.mrb[31].mxu0  ;;  %3067 = vmatmul.mubr.f32.vlgmr.msra.gmra.mrb[60].mxu1 %v8839_v30  ;;  %v8982_v12 = vpack.c.bf16 %v3756_v15, %v3749_v11 }
 0x2d6   :  { %6226 = vmatpush1.bf16.msra.mxu1 %v8841_v10  ;;  %3143 = vmatprep.mubr.f32.mxu1 %v6755_v49  ;;  %v9000_v10 = vsub.f32 %v8909_v32, %v8985_v58 }
 0x2d7   :  { %v3758_v25 = vand.u32 4294901760, %v3757_v2  ;;  %v4190_v45 = vand.u32 4294901760, %v6382_v43  ;;  %3082 = vmatprep.subr.mxu1 %v8874_v60  ;;  %v3259_v60 = vand.u32 4294901760, %v8990_v39 }
 0x2d8   :  { %v2535_v33 = vpop.f32.mrb[32].mxu0 }
 0x2d9   :  { %v8993_v13 = vsub.f32 %v6382_v43, %v4190_v45  ;;  %v6383_v14 = vadd.f32 %v2535_v33, %v8777_v53  ;;  %v2537_v62 = vpop.f32.mrb[33].mxu0  ;;  %v8996_v42 = vpack.c.bf16 %v3758_v25, %v3751_v31 }
 0x2da   :  { %3084 = vmatpush1.msra.mxu1 %v8863_v0  ;;  %v3265_v0 = vand.u32 4294901760, %v9000_v10 }
 0x2db   :  { %v4278_v40 = vand.u32 4294901760, %v8993_v13  ;;  %v4194_v5 = vand.u32 4294901760, %v6383_v14  ;;  %6228 = vmatprep.subr.bf16.mxu1 %v8937_v28 }
 0x2dc   :  { %v2542_v11 = vpop.f32.mrb[34].mxu0  ;;  %v3266_v25 = vsub.f32 %v9000_v10, %v3265_v0 }
 0x2dd   :  { %v9006_v55 = vpack.c.bf16 %v4194_v5, %v4190_v45  ;;  %v9008_v53 = vsub.f32 %v6383_v14, %v4194_v5  ;;  %v9011_v19 = vadd.f32 %v2542_v11, %v8781_v46  ;;  %v2544_v54 = vpop.f32.mrb[35].mxu0  ;;  %3145 = vmatmul.mubr.f32.vlgmr.msra.gmra.mrb[60].mxu1 %v8839_v30  ;;  %v4279_v32 = vsub.f32 %v8993_v13, %v4278_v40 }
 0x2de   :  { %6230 = vmatpush1.bf16.msra.mxu1 %v8904_v61  ;;  %3221 = vmatprep.mubr.f32.mxu1 %v6755_v49  ;;  %v3260_v46 = vsub.f32 %v8990_v39, %v3259_v60 }
 0x2df   :  { %v4290_v35 = vand.u32 4294901760, %v9008_v53  ;;  %v6279_v15 = vpack.c.bf16 %v9008_v53, %v8993_v13  ;;  %3160 = vmatprep.subr.mxu1 %v8972_v4  ;;  %v4280_v45 = vand.u32 4294901760, %v4279_v32  ;;  %v3267_v32 = vand.u32 4294901760, %v3266_v25 }
 0x2e0   :  { %v2549_v29 = vpop.f32.mrb[36].mxu0  ;;  %v3261_v62 = vand.u32 4294901760, %v3260_v46  ;;  %v4198_v7 = vand.u32 4294901760, %v9011_v19 }
 0x2e1   :  { %v4291_v2 = vsub.f32 %v9008_v53, %v4290_v35  ;;  %v6385_v43 = vadd.f32 %v2549_v29, %v8785_v48  ;;  %v2551_v26 = vpop.f32.mrb[37].mxu0  ;;  %v9027_v31 = vpack.c.bf16 %v4290_v35, %v4278_v40 }
 0x2e2   :  { %3162 = vmatpush1.msra.mxu1 %v8985_v58 }
 0x2e3   :  { %v4292_v33 = vand.u32 4294901760, %v4291_v2  ;;  %v4188_v14 = vand.u32 4294901760, %v6385_v43  ;;  %3227 = vmatmul.mubr.f32.vlgmr.msra.gmra.mrb[62].mxu1 %v8880_v41  ;;  %6232 = vmatprep.subr.bf16.mxu1 %v8956_v22 }
 0x2e4   :  { %6234 = vmatpush1.bf16.msra.mxu1 %v8928_v37  ;;  %v2556_v48 = vpop.f32.mrb[38].mxu0  ;;  %3327 = vmatprep.mubr.f32.mxu1 %v6755_v49 }
 0x2e5   :  { %v9037_v40 = vsub.f32 %v6385_v43, %v4188_v14  ;;  %v6386_v5 = vadd.f32 %v2556_v48, %v8789_v38  ;;  %3262 = vmatprep.subr.mxu1 %v3261_v62  ;;  %v2558_v11 = vpop.f32.mrb[39].mxu0  ;;  %v9040_v54 = vpack.c.bf16 %v4292_v33, %v4280_v45 }
 0x2e7   :  { %v4272_v35 = vand.u32 4294901760, %v9037_v40  ;;  %v4192_v29 = vand.u32 4294901760, %v6386_v5 }
 0x2e8   :  { %3268 = vmatpush1.msra.mxu1 %v3267_v32  ;;  %v2563_v22 = vpop.f32.mrb[40].mxu0 }
 0x2e9   :  { %v9043_v46 = vsub.f32 %v6386_v5, %v4192_v29  ;;  %v9046_v37 = vadd.f32 %v2563_v22, %v8793_v51  ;;  %6236 = vmatprep.subr.bf16.mxu1 %v6235_v57  ;;  %v2565_v38 = vpop.f32.mrb[41].mxu0  ;;  %v9051_v2 = vpack.c.bf16 %v4192_v29, %v4188_v14  ;;  %v4273_v26 = vsub.f32 %v9037_v40, %v4272_v35 }
 0x2eb   :  { %v4284_v43 = vand.u32 4294901760, %v9043_v46  ;;  %3329 = vmatmul.mubr.f32.vlgmr.msra.gmra.mrb[62].mxu1 %v8839_v30  ;;  %v6277_v25 = vpack.c.bf16 %v9043_v46, %v9037_v40  ;;  %v4274_v14 = vand.u32 4294901760, %v4273_v26  ;;  %v4196_v1 = vand.u32 4294901760, %v9046_v37 }
 0x2ec   :  { %6238 = vmatpush1.bf16.msra.mxu1 %v6237_v20  ;;  %v2570_v51 = vpop.f32.mrb[42].mxu0  ;;  %3411 = vmatprep.mubr.f32.mxu1 %v6755_v49 }
 0x2ed   :  { %3349 = vmatprep.subr.mxu1 %v8990_v39  ;;  %v6388_v8 = vadd.f32 %v2570_v51, %v8797_v18  ;;  %v2572_v21 = vpop.f32.mrb[43].mxu0  ;;  %v4285_v57 = vsub.f32 %v9043_v46, %v4284_v43  ;;  %v9065_v45 = vpack.c.bf16 %v4284_v43, %v4272_v35 }
 0x2ef   :  { %v4707_v33 = vand.u32 4294901760, %v6388_v8  ;;  %v4286_v62 = vand.u32 4294901760, %v4285_v57 }
 0x2f0   :  { %3352 = vmatpush1.msra.mxu1 %v9000_v10  ;;  %v2577_v48 = vpop.f32.mrb[44].mxu0 }
 0x2f1   :  { %v9068_v3 = vsub.f32 %v6388_v8, %v4707_v33  ;;  %6240 = vmatprep.subr.bf16.mxu1 %v8937_v28  ;;  %v6389_v24 = vadd.f32 %v2577_v48, %v8801_v52  ;;  %v2579_v20 = vpop.f32.mrb[45].mxu0  ;;  %v9072_v5 = vpack.c.bf16 %v4286_v62, %v4274_v14 }
 0x2f3   :  { %v4795_v18 = vand.u32 4294901760, %v9068_v3  ;;  %v4711_v11 = vand.u32 4294901760, %v6389_v24  ;;  %3414 = vmatmul.mubr.f32.vlgmr.msra.gmra.mrb[62].mxu1 %v8851_v34 }
 0x2f4   :  { %6242 = vmatpush1.bf16.msra.mxu1 %v8904_v61  ;;  %v2584_v32 = vpop.f32.mrb[46].mxu0  ;;  %3490 = vmatprep.mubr.f32.mxu1 %v6755_v49 }
 0x2f5   :  { %v9078_v35 = vpack.c.bf16 %v4711_v11, %v4707_v33  ;;  %v9080_v29 = vsub.f32 %v6389_v24, %v4711_v11  ;;  %3429 = vmatprep.subr.mxu1 %v8972_v4  ;;  %v9084_v52 = vadd.f32 %v2584_v32, %v8805_v27  ;;  %v2586_v22 = vpop.f32.mrb[47].mxu0  ;;  %v4796_v38 = vsub.f32 %v9068_v3, %v4795_v18 }
 0x2f7   :  { %v4807_v43 = vand.u32 4294901760, %v9080_v29  ;;  %v6303_v26 = vpack.c.bf16 %v9080_v29, %v9068_v3  ;;  %v4797_v33 = vand.u32 4294901760, %v4796_v38  ;;  %v4715_v53 = vand.u32 4294901760, %v9084_v52 }
 0x2f8   :  { %3431 = vmatpush1.msra.mxu1 %v8985_v58  ;;  %v2591_v51 = vpop.f32.mrb[48].mxu0 }
 0x2f9   :  { %v4808_v8 = vsub.f32 %v9080_v29, %v4807_v43  ;;  %6244 = vmatprep.subr.bf16.mxu1 %v8948_v17  ;;  %v6391_v21 = vadd.f32 %v2591_v51, %v8809_v59  ;;  %v2593_v57 = vpop.f32.mrb[49].mxu0  ;;  %v9094_v27 = vpack.c.bf16 %v4807_v43, %v4795_v18 }
 0x2fb   :  { %v4809_v14 = vand.u32 4294901760, %v4808_v8  ;;  %v4705_v62 = vand.u32 4294901760, %v6391_v21  ;;  %3494 = vmatmul.mubr.f32.vlgmr.msra.gmra.mrb[62].mxu1 %v8858_v36 }
 0x2fc   :  { %6246 = vmatpush1.bf16.msra.mxu1 %v8922_v50  ;;  %v2598_v48 = vpop.f32.mrb[50].mxu0  ;;  %3582 = vmatprep.mubr.f32.mxu1 %v6755_v49 }
 0x2fd   :  { %v9099_v24 = vsub.f32 %v6391_v21, %v4705_v62  ;;  %3519 = vmatprep.subr.mxu1 %v3259_v60  ;;  %v6392_v59 = vadd.f32 %v2598_v48, %v8813_v47  ;;  %v2600_v17 = vpop.f32.mrb[51].mxu0  ;;  %v9104_v20 = vpack.c.bf16 %v4809_v14, %v4797_v33 }
 0x2ff   :  { %v4789_v18 = vand.u32 4294901760, %v9099_v24  ;;  %v4709_v11 = vand.u32 4294901760, %v6392_v59 }
 0x300   :  { %3523 = vmatpush1.msra.mxu1 %v3265_v0  ;;  %v2605_v50 = vpop.f32.mrb[52].mxu0  ;;  %v9123_v0 = vand.u32 4294901760, %v8968_v23 }
 0x301   :  { %v9109_v32 = vsub.f32 %v6392_v59, %v4709_v11  ;;  %6248 = vmatprep.subr.bf16.mxu1 %v8937_v28  ;;  %v9113_v22 = vadd.f32 %v2605_v50, %v8817_v63  ;;  %v2607_v39 = vpop.f32.mrb[53].mxu0  ;;  %v9115_v60 = vpack.c.bf16 %v4709_v11, %v4705_v62  ;;  %v4790_v38 = vsub.f32 %v9099_v24, %v4789_v18 }
 0x302   :  { %v3762_v14 = vsub.f32 %v8968_v23, %v9123_v0 }
 0x303   :  { %v4801_v47 = vand.u32 4294901760, %v9109_v32  ;;  %3584 = vmatmul.mubr.f32.vlgmr.msra.gmra.mrb[62].mxu1 %v8839_v30  ;;  %v6301_v10 = vpack.c.bf16 %v9109_v32, %v9099_v24  ;;  %v4791_v57 = vand.u32 4294901760, %v4790_v38  ;;  %v4713_v13 = vand.u32 4294901760, %v9113_v22 }
 0x304   :  { %6250 = vmatpush1.bf16.msra.mxu1 %v8904_v61  ;;  %v2612_v28 = vpop.f32.mrb[54].mxu0  ;;  %3660 = vmatprep.mubr.f32.mxu1 %v6755_v49  ;;  %v3763_v11 = vand.u32 4294901760, %v3762_v14 }
 0x305   :  { %3599 = vmatprep.subr.mxu1 %v8972_v4  ;;  %v6394_v63 = vadd.f32 %v2612_v28, %v8825_v6  ;;  %v2614_v43 = vpop.f32.mrb[55].mxu0  ;;  %v4802_v51 = vsub.f32 %v9109_v32, %v4801_v47  ;;  %v9130_v8 = vpack.c.bf16 %v4801_v47, %v4789_v18  ;;  %v10038_v6 = vmov 0.0|0.0  }
 0x307   :  { %v5223_v21 = vand.u32 4294901760, %v6394_v63  ;;  %v4803_v33 = vand.u32 4294901760, %v4802_v51 }
 0x308   :  { %3601 = vmatpush1.msra.mxu1 %v8985_v58  ;;  %v2619_v61 = vpop.f32.mrb[56].mxu0 }
 0x309   :  { %v9135_v62 = vsub.f32 %v6394_v63, %v5223_v21  ;;  %v6395_v4 = vadd.f32 %v2619_v61, %v8827_v16  ;;  %v2621_v48 = vpop.f32.mrb[57].mxu0  ;;  %6251 = vmatprep.subr.bf16.mxu1 %v10038_v6  ;;  %v9139_v59 = vpack.c.bf16 %v4803_v33, %v4791_v57  ;;  %v3764_v63 = vsub.f32 %v3762_v14, %v3763_v11 }
 0x30b   :  { %v5303_v17 = vand.u32 4294901760, %v9135_v62  ;;  %v5226_v18 = vand.u32 4294901760, %v6395_v4  ;;  %3662 = vmatmul.mubr.f32.vlgmr.msra.gmra.mrb[62].mxu1 %v8839_v30  ;;  %v3765_v57 = vand.u32 4294901760, %v3764_v63 }
 0x30c   :  { %6253 = vmatpush3.bf16.msra.mxu1 %v8963_v56  ;;  %v2626_v23 = vpop.f32.mrb[58].mxu0  ;;  %5813 = vmatprep.mubr.msk.f32.mxu1 %vm6756_vm1, %v6755_v49 }
 0x30d   :  { %v9146_v58 = vpack.c.bf16 %v5226_v18, %v5223_v21  ;;  %v9148_v16 = vsub.f32 %v6395_v4, %v5226_v18  ;;  %v9151_v50 = vadd.f32 %v2626_v23, %v8829_v44  ;;  %v2628_v39 = vpop.f32.mrb[59].mxu0  ;;  %5811 = vmatprep.subr.mxu1 %v6755_v49  ;;  %v5304_v47 = vsub.f32 %v9135_v62, %v5303_v17 }
 0x30e   :  { %v4166_v18 = vlaneseq }
 0x30f   :  { %v5310_v38 = vand.u32 4294901760, %v9148_v16  ;;  %v6324_v28 = vpack.c.bf16 %v9148_v16, %v9135_v62  ;;  %v5305_v51 = vand.u32 4294901760, %v5304_v47 }
 0x310   :  { %5812 = vmatpush3.msra.mxu1 %v9123_v0 }
 0x311   :  { %v5311_v43 = vsub.f32 %v9148_v16, %v5310_v38  ;;  %5814 = vmatmul.mubr.f32.vlgmr.msra.gmra.mrb[64].mxu1 %v8880_v41  ;;  %6254 = vmatprep.subr.bf16.mxu1 %v10038_v6  ;;  %v9162_v44 = vpack.c.bf16 %v5310_v38, %v5303_v17  ;;  %v4173_v38 = vand.u32 127, %v4166_v18 }
 0x312   :  { %6256 = vmatpush3.bf16.msra.mxu1 %v8996_v42  ;;  %5822 = vmatprep.mubr.msk.f32.mxu1 %vm6756_vm1, %v6755_v49 }
 0x313   :  { %v5312_v21 = vand.u32 4294901760, %v5311_v43  ;;  %5820 = vmatprep.subr.mxu1 %v6755_v49  ;;  %vm4174_vm3 = vcmp.lt.s32.totalorder %v4173_v38, 6 }
 0x315   :  { %v9168_v33 = vpack.c.bf16 %v5312_v21, %v5305_v51 }
 0x316   :  { %5821 = vmatpush3.msra.mxu1 %v3765_v57  ;;  %v5757_v57 = vsel %vm4174_vm3, 1.0, %v6755_v49 }
 0x317   :  { %6257 = vmatprep.subr.bf16.mxu1 %v10038_v6 }
 0x319   :  { %5823 = vmatmul.mubr.f32.vlgmr.msra.gmra.mrb[64].mxu1 %v8839_v30 }
 0x31a   :  { %6259 = vmatpush3.bf16.msra.mxu1 %v6258_v9  ;;  %5831 = vmatprep.mubr.msk.f32.mxu1 %vm6756_vm1, %v6755_v49  ;;  %v4295_v9 = vsub.f32 %v9046_v37, %v4196_v1 }
 0x31b   :  { %5829 = vmatprep.subr.mxu1 %v6755_v49 }
 0x31c   :  { %v4296_v42 = vand.u32 4294901760, %v4295_v9 }
 0x31e   :  { %5830 = vmatpush3.msra.mxu1 %v3762_v14 }
 0x31f   :  { %6260 = vmatprep.subr.bf16.mxu1 %v10038_v6 }
 0x321   :  { %5832 = vmatmul.mubr.f32.vlgmr.msra.gmra.mrb[64].mxu1 %v8851_v34 }
 0x322   :  { %6262 = vmatpush3.bf16.msra.mxu1 %v8963_v56  ;;  %5840 = vmatprep.mubr.msk.f32.mxu1 %vm6756_vm1, %v6755_v49 }
 0x323   :  { %5838 = vmatprep.subr.mxu1 %v6755_v49 }
 0x326   :  { %5839 = vmatpush3.msra.mxu1 %v9123_v0 }
 0x327   :  { %6263 = vmatprep.subr.bf16.mxu1 %v10038_v6 }
 0x329   :  { %5841 = vmatmul.mubr.f32.vlgmr.msra.gmra.mrb[64].mxu1 %v8858_v36 }
 0x32a   :  { %6265 = vmatpush3.bf16.msra.mxu1 %v8982_v12  ;;  %5849 = vmatprep.mubr.msk.f32.mxu1 %vm6756_vm1, %v6755_v49  ;;  %v4301_v12 = vsub.f32 %v9011_v19, %v4198_v7 }
 0x32b   :  { %5847 = vmatprep.subr.mxu1 %v6755_v49 }
 0x32c   :  { %v4302_v14 = vand.u32 4294901760, %v4301_v12 }
 0x32e   :  { %5848 = vmatpush3.msra.mxu1 %v3763_v11  ;;  %v4303_v61 = vsub.f32 %v4301_v12, %v4302_v14 }
 0x32f   :  { %6266 = vmatprep.subr.bf16.mxu1 %v10038_v6 }
 0x330   :  { %v4304_v37 = vand.u32 4294901760, %v4303_v61 }
 0x331   :  { %5850 = vmatmul.mubr.f32.vlgmr.msra.gmra.mrb[64].mxu1 %v8839_v30 }
 0x332   :  { %6268 = vmatpush3.bf16.msra.mxu1 %v8963_v56  ;;  %5858 = vmatprep.mubr.msk.f32.mxu1 %vm6756_vm1, %v6755_v49  ;;  %v4297_v56 = vsub.f32 %v4295_v9, %v4296_v42 }
 0x333   :  { %5856 = vmatprep.subr.mxu1 %v6755_v49 }
 0x334   :  { %v4298_v19 = vand.u32 4294901760, %v4297_v56 }
 0x336   :  { %5857 = vmatpush3.msra.mxu1 %v9123_v0 }
 0x337   :  { %6270 = vmatprep.subr.bf16.mxu1 %v9051_v2 }
 0x339   :  { %5859 = vmatmul.mubr.f32.vlgmr.msra.gmra.mrb[64].mxu1 %v8839_v30 }
 0x33a   :  { %6272 = vmatpush1.bf16.msra.mxu1 %v9006_v55  ;;  %4258 = vmatprep.mubr.f32.mxu1 %v6755_v49 }
 0x33b   :  { %4197 = vmatprep.subr.mxu1 %v4196_v1 }
 0x33e   :  { %4199 = vmatpush1.msra.mxu1 %v4198_v7 }
 0x33f   :  { %4264 = vmatmul.mubr.f32.vlgmr.msra.gmra.mrb[66].mxu1 %v8880_v41  ;;  %6274 = vmatprep.subr.bf16.mxu1 %v9072_v5 }
 0x340   :  { %6276 = vmatpush1.bf16.msra.mxu1 %v9040_v54  ;;  %4364 = vmatprep.mubr.f32.mxu1 %v6755_v49 }
 0x341   :  { %4299 = vmatprep.subr.mxu1 %v4298_v19 }
 0x344   :  { %4305 = vmatpush1.msra.mxu1 %v4304_v37 }
 0x345   :  { %6278 = vmatprep.subr.bf16.mxu1 %v6277_v25 }
 0x347   :  { %4366 = vmatmul.mubr.f32.vlgmr.msra.gmra.mrb[66].mxu1 %v8839_v30 }
 0x348   :  { %6280 = vmatpush1.bf16.msra.mxu1 %v6279_v15  ;;  %4448 = vmatprep.mubr.f32.mxu1 %v6755_v49  ;;  %v4812_v15 = vsub.f32 %v9113_v22, %v4713_v13 }
 0x349   :  { %4386 = vmatprep.subr.mxu1 %v4295_v9 }
 0x34a   :  { %v4813_v40 = vand.u32 4294901760, %v4812_v15 }
 0x34c   :  { %4389 = vmatpush1.msra.mxu1 %v4301_v12 }
 0x34d   :  { %6282 = vmatprep.subr.bf16.mxu1 %v9051_v2 }
 0x34f   :  { %4451 = vmatmul.mubr.f32.vlgmr.msra.gmra.mrb[66].mxu1 %v8851_v34 }
 0x350   :  { %6284 = vmatpush1.bf16.msra.mxu1 %v9006_v55  ;;  %4527 = vmatprep.mubr.f32.mxu1 %v6755_v49 }
 0x351   :  { %4466 = vmatprep.subr.mxu1 %v4196_v1 }
 0x354   :  { %4468 = vmatpush1.msra.mxu1 %v4198_v7 }
 0x355   :  { %6286 = vmatprep.subr.bf16.mxu1 %v9065_v45  ;;  %v5229_v45 = vand.u32 4294901760, %v9151_v50 }
 0x357   :  { %4531 = vmatmul.mubr.f32.vlgmr.msra.gmra.mrb[66].mxu1 %v8858_v36  ;;  %v5316_v3 = vsub.f32 %v9151_v50, %v5229_v45  ;;  %v4167_v50 = vshrl.u32 %v4166_v18, 7 }
 0x358   :  { %6288 = vmatpush1.bf16.msra.mxu1 %v9027_v31  ;;  %4619 = vmatprep.mubr.f32.mxu1 %v6755_v49  ;;  %v4818_v31 = vsub.f32 %v9084_v52, %v4715_v53 }
 0x359   :  { %4556 = vmatprep.subr.mxu1 %v4296_v42  ;;  %v5317_v5 = vand.u32 4294901760, %v5316_v3  ;;  %vm4168_vm2 = vcmp.lt.s32.totalorder %v4167_v50, 6 }
 0x35a   :  { %v4819_v54 = vand.u32 4294901760, %v4818_v31  ;;  %v5756_v51 = vsel %vm4168_vm2, 1.0, %v6755_v49 }
 0x35b   :  { %v5318_v29 = vsub.f32 %v5316_v3, %v5317_v5 }
 0x35c   :  { %4560 = vmatpush1.msra.mxu1 %v4302_v14  ;;  %v4820_v46 = vsub.f32 %v4818_v31, %v4819_v54 }
 0x35d   :  { %6290 = vmatprep.subr.bf16.mxu1 %v9051_v2 }
 0x35e   :  { %v4821_v25 = vand.u32 4294901760, %v4820_v46 }
 0x35f   :  { %4621 = vmatmul.mubr.f32.vlgmr.msra.gmra.mrb[66].mxu1 %v8839_v30 }
 0x360   :  { %6292 = vmatpush1.bf16.msra.mxu1 %v9006_v55  ;;  %4697 = vmatprep.mubr.f32.mxu1 %v6755_v49  ;;  %v4814_v55 = vsub.f32 %v4812_v15, %v4813_v40 }
 0x361   :  { %4636 = vmatprep.subr.mxu1 %v4196_v1 }
 0x362   :  { %v4815_v2 = vand.u32 4294901760, %v4814_v55 }
 0x364   :  { %4638 = vmatpush1.msra.mxu1 %v4198_v7 }
 0x365   :  { %6294 = vmatprep.subr.bf16.mxu1 %v9115_v60 }
 0x367   :  { %4699 = vmatmul.mubr.f32.vlgmr.msra.gmra.mrb[66].mxu1 %v8839_v30 }
 0x368   :  { %6296 = vmatpush1.bf16.msra.mxu1 %v9078_v35  ;;  %4775 = vmatprep.mubr.f32.mxu1 %v6755_v49 }
 0x369   :  { %4714 = vmatprep.subr.mxu1 %v4713_v13 }
 0x36c   :  { %4716 = vmatpush1.msra.mxu1 %v4715_v53 }
 0x36d   :  { %4781 = vmatmul.mubr.f32.vlgmr.msra.gmra.mrb[68].mxu1 %v8880_v41  ;;  %6298 = vmatprep.subr.bf16.mxu1 %v9139_v59 }
 0x36e   :  { %6300 = vmatpush1.bf16.msra.mxu1 %v9104_v20  ;;  %4881 = vmatprep.mubr.f32.mxu1 %v6755_v49 }
 0x36f   :  { %4816 = vmatprep.subr.mxu1 %v4815_v2 }
 0x372   :  { %4822 = vmatpush1.msra.mxu1 %v4821_v25 }
 0x373   :  { %6302 = vmatprep.subr.bf16.mxu1 %v6301_v10  ;;  %v4148_v10 = vstv %s5743_s30 }
 0x375   :  { %4883 = vmatmul.mubr.f32.vlgmr.msra.gmra.mrb[68].mxu1 %v8839_v30 }
 0x376   :  { %6304 = vmatpush1.bf16.msra.mxu1 %v6303_v26  ;;  %4965 = vmatprep.mubr.f32.mxu1 %v6755_v49 }
 0x377   :  { %4903 = vmatprep.subr.mxu1 %v4812_v15 }
 0x37a   :  { %4906 = vmatpush1.msra.mxu1 %v4818_v31 }
 0x37b   :  { %6306 = vmatprep.subr.bf16.mxu1 %v9115_v60 }
 0x37d   :  { %4968 = vmatmul.mubr.f32.vlgmr.msra.gmra.mrb[68].mxu1 %v8851_v34 }
 0x37e   :  { %6308 = vmatpush1.bf16.msra.mxu1 %v9078_v35  ;;  %5044 = vmatprep.mubr.f32.mxu1 %v6755_v49 }
 0x37f   :  { %4983 = vmatprep.subr.mxu1 %v4713_v13 }
 0x382   :  { %4985 = vmatpush1.msra.mxu1 %v4715_v53 }
 0x383   :  { %6310 = vmatprep.subr.bf16.mxu1 %v9130_v8 }
 0x385   :  { %5048 = vmatmul.mubr.f32.vlgmr.msra.gmra.mrb[68].mxu1 %v8858_v36 }
 0x386   :  { %6312 = vmatpush1.bf16.msra.mxu1 %v9094_v27  ;;  %5136 = vmatprep.mubr.f32.mxu1 %v6755_v49 }
 0x387   :  { %5073 = vmatprep.subr.mxu1 %v4813_v40 }
 0x38a   :  { %5077 = vmatpush1.msra.mxu1 %v4819_v54 }
 0x38b   :  { %6314 = vmatprep.subr.bf16.mxu1 %v9115_v60  ;;  %v4144_v60 = vstv %s47_s2 }
 0x38d   :  { %5138 = vmatmul.mubr.f32.vlgmr.msra.gmra.mrb[68].mxu1 %v8839_v30 }
 0x38e   :  { %6316 = vmatpush1.bf16.msra.mxu1 %v9078_v35  ;;  %5214 = vmatprep.mubr.f32.mxu1 %v6755_v49  ;;  %v5319_v35 = vand.u32 4294901760, %v5318_v29 }
 0x38f   :  { %5153 = vmatprep.subr.mxu1 %v4713_v13 }
 0x392   :  { %5155 = vmatpush1.msra.mxu1 %v4715_v53 }
 0x393   :  { %6317 = vmatprep.subr.bf16.mxu1 %v10038_v6 }
 0x395   :  { %5216 = vmatmul.mubr.f32.vlgmr.msra.gmra.mrb[68].mxu1 %v8839_v30 }
 0x396   :  { %6319 = vmatpush3.bf16.msra.mxu1 %v9146_v58  ;;  %5867 = vmatprep.mubr.msk.f32.mxu1 %vm6756_vm1, %v6755_v49 }
 0x397   :  { %5865 = vmatprep.subr.mxu1 %v6755_v49 }
 0x39a   :  { %5866 = vmatpush3.msra.mxu1 %v5229_v45 }
 0x39b   :  { %5868 = vmatmul.mubr.f32.vlgmr.msra.gmra.mrb[70].mxu1 %v8880_v41  ;;  %6320 = vmatprep.subr.bf16.mxu1 %v10038_v6 }
 0x39c   :  { %6322 = vmatpush3.bf16.msra.mxu1 %v9168_v33  ;;  %5876 = vmatprep.mubr.msk.f32.mxu1 %vm6756_vm1, %v6755_v49 }
 0x39d   :  { %5874 = vmatprep.subr.mxu1 %v6755_v49 }
 0x3a0   :  { %5875 = vmatpush3.msra.mxu1 %v5319_v35 }
 0x3a1   :  { %6323 = vmatprep.subr.bf16.mxu1 %v10038_v6 }
 0x3a3   :  { %5877 = vmatmul.mubr.f32.vlgmr.msra.gmra.mrb[70].mxu1 %v8839_v30 }
 0x3a4   :  { %6325 = vmatpush3.bf16.msra.mxu1 %v6324_v28  ;;  %5885 = vmatprep.mubr.msk.f32.mxu1 %vm6756_vm1, %v6755_v49 }
 0x3a5   :  { %5883 = vmatprep.subr.mxu1 %v6755_v49 }
 0x3a8   :  { %5884 = vmatpush3.msra.mxu1 %v5316_v3 }
 0x3a9   :  { %6326 = vmatprep.subr.bf16.mxu1 %v10038_v6 }
 0x3ab   :  { %5886 = vmatmul.mubr.f32.vlgmr.msra.gmra.mrb[70].mxu1 %v8851_v34 }
 0x3ac   :  { %6328 = vmatpush3.bf16.msra.mxu1 %v9146_v58  ;;  %5894 = vmatprep.mubr.msk.f32.mxu1 %vm6756_vm1, %v6755_v49 }
 0x3ad   :  { %5892 = vmatprep.subr.mxu1 %v6755_v49 }
 0x3b0   :  { %5893 = vmatpush3.msra.mxu1 %v5229_v45  ;;  %v3146_v41 = vpop.f32.mrb[60].mxu1 }
 0x3b1   :  { %6329 = vmatprep.subr.bf16.mxu1 %v10038_v6  ;;  %v4141_v52 = vmul.f32 %v3146_v41, %v3146_v41  ;;  %v3148_v26 = vpop.f32.mrb[61].mxu1 }
 0x3b2   :  { %v4140_v27 = vmul.f32 %v3148_v26, %v3146_v41  ;;  %v4142_v24 = vmul.f32 %v3148_v26, %v3148_v26 }
 0x3b3   :  { %5895 = vmatmul.mubr.f32.vlgmr.msra.gmra.mrb[70].mxu1 %v8858_v36 }
 0x3b4   :  { %6331 = vmatpush3.bf16.msra.mxu1 %v9162_v44  ;;  %v4151_v34 = vadd.f32 %v4142_v24, %v4141_v52  ;;  %5903 = vmatprep.mubr.msk.f32.mxu1 %vm6756_vm1, %v6755_v49  ;;  %v4143_v23 = vmul.f32 2.0, %v4140_v27 }
 0x3b5   :  { %5901 = vmatprep.subr.mxu1 %v6755_v49 }
 0x3b6   :  { %v4152_v8 = vadd.f32 %v4151_v34, %v4144_v60  ;;  %v4145_v28 = vadd.f32 %v4144_v60, %v4143_v23 }
 0x3b8   :  { %5902 = vmatpush3.msra.mxu1 %v5317_v5 }
 0x3b9   :  { %6332 = vmatprep.subr.bf16.mxu1 %v10038_v6 }
 0x3bb   :  { %5904 = vmatmul.mubr.f32.vlgmr.msra.gmra.mrb[70].mxu1 %v8839_v30 }
 0x3bc   :  { %6334 = vmatpush3.bf16.msra.mxu1 %v9146_v58  ;;  %5912 = vmatprep.mubr.msk.f32.mxu1 %vm6756_vm1, %v6755_v49 }
 0x3bd   :  { %5910 = vmatprep.subr.mxu1 %v6755_v49 }
 0x3c0   :  { %5911 = vmatpush3.msra.mxu1 %v5229_v45 }
 0x3c3   :  { %5913 = vmatmul.mubr.f32.vlgmr.msra.gmra.mrb[70].mxu1 %v8839_v30 }
 0x3de   :  { %v3663_v36 = vpop.f32.mrb[62].mxu1 }
 0x3df   :  { %v4153_v20 = vsub.f32 %v3663_v36, %v4141_v52  ;;  %v3665_v32 = vpop.f32.mrb[63].mxu1 }
 0x3e0   :  { %v4154_v22 = vsub.f32 %v3665_v32, %v4142_v24 }
 0x3e2   :  { %v4155_v0 = vadd.f32 %v4154_v22, %v4153_v20 }
 0x3e4   :  { %v4156_v62 = vadd.f32 %v4155_v0, %v4148_v10 }
 0x3e6   :  { %v4157_v4 = vmul.f32 %v4156_v62, %v4152_v8 }
 0x3e8   :  { %6708 = vrcp.f32 %v4157_v4 }
 0x3f2   :  { %v6709_v48 = vpop.eup %6708 }
 0x3f3   :  { %v4159_v6 = vmul.f32 %v6709_v48, %v4157_v4 }
 0x3f5   :  { %v4160_v59 = vsub.f32 2.0, %v4159_v6 }
 0x3f7   :  { %v4161_v17 = vmul.f32 %v6709_v48, %v4160_v59 }
 0x3f9   :  { %v4162_v11 = vmul.f32 %v4161_v17, %v4157_v4 }
 0x3fb   :  { %v4163_v47 = vsub.f32 2.0, %v4162_v11 }
 0x3fd   :  { %v4164_v44 = vmul.f32 %v4163_v47, %v4161_v17 }
 0x40c   :  { %v4136_v30 = vpop.f32.mrb[64].mxu1 }
 0x40d   :  { %v4146_v58 = vsub.f32 %v4136_v30, %v4140_v27  ;;  %v5860_v16 = vpop.f32.mrb[65].mxu1 }
 0x40f   :  { %v4147_v39 = vmul.f32 2.0, %v4146_v58 }
 0x411   :  { %v4149_v63 = vadd.f32 %v4148_v10, %v4147_v39 }
 0x413   :  { %v4150_v43 = vmul.f32 %v4149_v63, %v4145_v28 }
 0x415   :  { %v4165_v21 = vmul.f32 %v4164_v44, %v4150_v43 }
 0x417   :  { %v4171_v33 = vmul.f32 %v5756_v51, %v4165_v21 }
 0x419   :  { %v4177_v1 = vmul.f32 %v5757_v57, %v4171_v33 }
 0x41b   :  { %4178 = vadd.xlane.f32.xlu0 %v4177_v1 }
 0x43a   :  { %v4700_v7 = vpop.f32.mrb[66].mxu1 }
 0x43b   :  { %v5695_v9 = vmul.f32 %v4700_v7, %v4700_v7  ;;  %v4702_v12 = vpop.f32.mrb[67].mxu1 }
 0x43c   :  { %v5694_v42 = vmul.f32 %v4702_v12, %v4700_v7  ;;  %v5696_v14 = vmul.f32 %v4702_v12, %v4702_v12 }
 0x43e   :  { %v5703_v56 = vadd.f32 %v5696_v14, %v5695_v9  ;;  %v5697_v45 = vmul.f32 2.0, %v5694_v42 }
 0x440   :  { %v5704_v15 = vadd.f32 %v5703_v56, %v4144_v60  ;;  %v5698_v41 = vadd.f32 %v5697_v45, %v4144_v60 }
 0x468   :  { %v5217_v61 = vpop.f32.mrb[68].mxu1 }
 0x469   :  { %v5705_v19 = vsub.f32 %v5217_v61, %v5695_v9  ;;  %v5219_v37 = vpop.f32.mrb[69].mxu1 }
 0x46a   :  { %v5706_v13 = vsub.f32 %v5219_v37, %v5696_v14 }
 0x46c   :  { %v5707_v53 = vadd.f32 %v5706_v13, %v5705_v19 }
 0x46e   :  { %v5708_v31 = vadd.f32 %v5707_v53, %v4148_v10 }
 0x470   :  { %v5709_v40 = vmul.f32 %v5708_v31, %v5704_v15 }
 0x472   :  { %6710 = vrcp.f32 %v5709_v40 }
 0x47c   :  { %v6711_v54 = vpop.eup %6710 }
 0x47d   :  { %v5711_v49 = vmul.f32 %v6711_v54, %v5709_v40 }
 0x47f   :  { %v5712_v55 = vsub.f32 2.0, %v5711_v49 }
 0x481   :  { %v5713_v46 = vmul.f32 %v6711_v54, %v5712_v55 }
 0x483   :  { %v5714_v2 = vmul.f32 %v5713_v46, %v5709_v40 }
 0x485   :  { %v5715_v35 = vsub.f32 2.0, %v5714_v2 }
 0x487   :  { %v5716_v27 = vmul.f32 %v5715_v35, %v5713_v46 }
 0x496   :  { %v5690_v25 = vpop.f32.mrb[70].mxu1 }
 0x497   :  { %v5699_v3 = vsub.f32 %v5690_v25, %v5694_v42  ;;  %v5914_v5 = vpop.f32.mrb[71].mxu1 }
 0x499   :  { %v5700_v29 = vmul.f32 2.0, %v5699_v3 }
 0x49b   :  { %v5701_v52 = vadd.f32 %v5700_v29, %v4148_v10 }
 0x49d   :  { %v5702_v26 = vmul.f32 %v5701_v52, %v5698_v41 }
 0x49f   :  { %v5717_v24 = vmul.f32 %v5716_v27, %v5702_v26 }
 0x4a1   :  { %v5718_v34 = vmul.f32 %v5756_v51, %v5717_v24 }
 0x4a3   :  { %v5719_v36 = vmul.f32 %v5757_v57, %v5718_v34 }
 0x4a5   :  { %5720 = vadd.xlane.f32.xlu0 %v5719_v36 }
 0x4a8   :  { %v4179_v20 = vpop.xlane.xlu0 %4178 }
 0x4a9   :  { %v4180_v32 = vrot.slane %v4179_v20, 4 }
 0x4ab   :  { %v4181_v22 = vadd.f32 %v4180_v32, %v4179_v20 }
 0x4ad   :  { %v4182_v0 = vrot.slane %v4181_v22, 2 }
 0x4af   :  { %v4183_v8 = vadd.f32 %v4182_v0, %v4181_v22 }
 0x4b1   :  { %v4184_v62 = vrot.slane %v4183_v8, 1 }
 0x4b3   :  { %v4185_v4 = vadd.f32 %v4184_v62, %v4183_v8 }
 0x4b5   :  { %6697 = vpush %v4185_v4 }
 0x4e6   :  { %s6698_s6 = spop %6697 }
 0x4e7   :  { %s5730_s7 = smul.f32 0.027777778, %s6698_s6 }
 0x4e9   :  { %v5731_v48 = vstv %s5730_s7 }
 0x4ea   :  { %5732 = vst [vmem:[%s9316_s5] sm:$0xff] %v5731_v48 }
 0x532   :  { %v5721_v60 = vpop.xlane.xlu0 %5720 }
 0x533   :  { %v5722_v10 = vrot.slane %v5721_v60, 4 }
 0x535   :  { %v5723_v6 = vadd.f32 %v5722_v10, %v5721_v60 }
 0x537   :  { %v5724_v59 = vrot.slane %v5723_v6, 2 }
 0x539   :  { %v5725_v17 = vadd.f32 %v5724_v59, %v5723_v6 }
 0x53b   :  { %v5726_v18 = vrot.slane %v5725_v17, 1 }
 0x53d   :  { %v5727_v11 = vadd.f32 %v5726_v18, %v5725_v17 }
 0x53f   :  { %6699 = vpush %v5727_v11 }
 0x570   :  { %s6700_s10 = spop %6699 }
 0x571   :  { %s5733_s1 = smul.f32 0.027777778, %s6700_s10 }
 0x573   :  { %v5734_v30 = vstv %s5733_s1 }
 0x574   :  { %5758 = vst [vmem:[%s9316_s5 + $0x8] sm:$0xff] %v5734_v30 }
 0x575   :  { %5741 = vsyncpa [#allocation3], 1 }
 0x576   :  { %5742 = vsyncpa [#allocation4], 1 }

</bundles_post_ra>
